<compile_context>
chip_gen: v5e
topology: v5e:2x2
jax: 0.10.0
libtpu: 0.0.40
codegen_flags: <defaults>
</compile_context>

<pallas_src>
import math
import jax
import jax.numpy as jnp
from jax import lax
from jax.experimental import pallas as pl
from jax.experimental.pallas import tpu as pltpu


def _round_up(x, m):
    return (x + m - 1) // m * m


# ----------------------------------------------------------------------------
# Pallas kernel: per-chunk input projection + fused bidirectional LSTM recurrence + final FC
# ----------------------------------------------------------------------------
def textrnn_kernel(x_ref,      # (TC, Bs, E2p)  streamed chunk: [emb_fwd | emb_rev | 0-pad], compute dtype
                   wih_ref,    # (E2p, 8Hp)     combined input->gates weight (both directions)
                   whh_ref,    # (2Hp, 8Hp)     block-diagonal hidden->gates weight
                   b_ref,      # (1, 8Hp)       combined bias (b_ih + b_hh), f32
                   fcw_ref,    # (2Hp, Cp)      fc weight laid out on padded hidden
                   fcb_ref,    # (1, Cp)        fc bias, f32
                   out_ref,    # (Bs, Cp)       padded logits (written on last chunk)
                   gin_ref,    # (TC, Bs, 8Hp)  f32 scratch: precomputed input gates
                   h_ref,      # (Bs, 2Hp)      f32 scratch: [h_fwd | h_bwd], carried across chunks
                   c_ref):     # (Bs, 2Hp)      f32 scratch: [c_fwd | c_bwd]
    t_blk = pl.program_id(1)
    TC, Bs, E2 = x_ref.shape
    G = gin_ref.shape[-1]          # 8 * Hp
    H2 = h_ref.shape[-1]           # 2 * Hp
    cdt = wih_ref.dtype            # MXU compute dtype (bf16 or f32)

    @pl.when(t_blk == 0)
    def _():
        h_ref[...] = jnp.zeros_like(h_ref)
        c_ref[...] = jnp.zeros_like(c_ref)

    # --- Hoisted input projection: one large MXU matmul per chunk, both directions,
    #     bias folded in (no per-step bias broadcast).
    x2d = x_ref[...].reshape(TC * Bs, E2)
    gin = jnp.dot(x2d, wih_ref[...], preferred_element_type=jnp.float32) + b_ref[...]
    gin_ref[...] = gin.reshape(TC, Bs, G)

    whh = whh_ref[...]

    # --- Serial recurrence: only the small hidden->gates matmul per step.
    #     Gate layout: [i_f|i_b | f_f|f_b | g_f|g_b | o_f|o_b], each gate padded to Hp lanes,
    #     so every slice below is a whole, 128-lane-aligned block matching the [fwd|bwd]
    #     layout of h/c.  All elementwise gate math stays in f32.
    def step(t, carry):
        h, c = carry
        g = gin_ref[t] + jnp.dot(h.astype(cdt), whh,
                                 preferred_element_type=jnp.float32)   # (Bs, 8Hp)
        i_g = jax.nn.sigmoid(g[:, 0 * H2:1 * H2])
        f_g = jax.nn.sigmoid(g[:, 1 * H2:2 * H2])
        g_g = jnp.tanh(g[:, 2 * H2:3 * H2])
        o_g = jax.nn.sigmoid(g[:, 3 * H2:4 * H2])
        c = f_g * c + i_g * g_g
        h = o_g * jnp.tanh(c)
        return h, c

    unroll = True if TC <= 8 else 8   # full unroll only for short chunks
    h, c = lax.fori_loop(0, TC, step, (h_ref[...], c_ref[...]), unroll=unroll)
    h_ref[...] = h
    c_ref[...] = c

    # --- Final FC on the last chunk.  h == [h_fwd_final | h_bwd_final] (padded).
    # TODO(synk): nn.Dropout is identity in eval mode; no dropout mask is applied here.
    @pl.when(t_blk == pl.num_programs(1) - 1)
    def _():
        out_ref[...] = (jnp.dot(h.astype(cdt), fcw_ref[...],
                                preferred_element_type=jnp.float32) + fcb_ref[...])


# ----------------------------------------------------------------------------
# One-time weight packing (transpose / combine / pad) — not done per forward call
# ----------------------------------------------------------------------------
def pack_textrnn_params(params, compute_dtype=jnp.bfloat16):
    E = params["w_ih_f"].shape[1]
    H = params["w_hh_f"].shape[1]
    C = params["fc_w"].shape[0]
    Hp = _round_up(H, 128)           # pad each gate to a full 128-lane block
    Cp = _round_up(C, 128)           # lane-dense output
    E2p = _round_up(2 * E, 128)      # lane-dense streamed input / aligned matmul K

    wihf_t = params["w_ih_f"].T.astype(jnp.float32)   # (E, 4H), gate cols [i|f|g|o]
    wihb_t = params["w_ih_b"].T.astype(jnp.float32)
    whhf_t = params["w_hh_f"].T.astype(jnp.float32)   # (H, 4H)
    whhb_t = params["w_hh_b"].T.astype(jnp.float32)
    bf = (params["b_ih_f"] + params["b_hh_f"]).astype(jnp.float32)
    bb = (params["b_ih_b"] + params["b_hh_b"]).astype(jnp.float32)

    wih = jnp.zeros((E2p, 8 * Hp), jnp.float32)       # rows [0:E)=fwd emb, [E:2E)=reversed emb
    whh = jnp.zeros((2 * Hp, 8 * Hp), jnp.float32)    # rows [0:Hp)=h_fwd, [Hp:2Hp)=h_bwd
    bias = jnp.zeros((1, 8 * Hp), jnp.float32)
    for k in range(4):                                # PyTorch gate order i, f, g, o
        col_f = k * 2 * Hp                            # forward gate-k columns
        col_b = k * 2 * Hp + Hp                       # backward gate-k columns
        wih = wih.at[0:E, col_f:col_f + H].set(wihf_t[:, k * H:(k + 1) * H])
        wih = wih.at[E:2 * E, col_b:col_b + H].set(wihb_t[:, k * H:(k + 1) * H])
        whh = whh.at[0:H, col_f:col_f + H].set(whhf_t[:, k * H:(k + 1) * H])
        whh = whh.at[Hp:Hp + H, col_b:col_b + H].set(whhb_t[:, k * H:(k + 1) * H])
        bias = bias.at[0, col_f:col_f + H].set(bf[k * H:(k + 1) * H])
        bias = bias.at[0, col_b:col_b + H].set(bb[k * H:(k + 1) * H])

    fcw_t = params["fc_w"].T.astype(jnp.float32)      # (2H, C): rows [fwd H | bwd H]
    fcw = jnp.zeros((2 * Hp, Cp), jnp.float32)
    fcw = fcw.at[0:H, 0:C].set(fcw_t[0:H])
    fcw = fcw.at[Hp:Hp + H, 0:C].set(fcw_t[H:2 * H])
    fcb = jnp.zeros((1, Cp), jnp.float32).at[0, 0:C].set(params["fc_b"].astype(jnp.float32))

    return {
        "embedding": params["embedding"].astype(jnp.float32),
        "wih": wih.astype(compute_dtype),
        "whh": whh.astype(compute_dtype),
        "bias": bias,
        "fcw": fcw.astype(compute_dtype),
        "fcb": fcb,
        "dims": dict(E=E, E2p=E2p, H=H, Hp=Hp, C=C, Cp=Cp),
    }


# ----------------------------------------------------------------------------
# Wrapper (glue: embedding gather, padding/layout, pallas_call)
# ----------------------------------------------------------------------------
def textrnn_forward(token_ids, packed, *, seq_chunk=None, batch_shards=1):
    d = packed["dims"]
    E, E2p, Hp, C, Cp = d["E"], d["E2p"], d["Hp"], d["C"], d["Cp"]
    cdt = packed["wih"].dtype

    B, T = token_ids.shape
    Bs = _round_up(-(-B // batch_shards), 8)          # per-shard batch rows (sublane-aligned)
    Bp = Bs * batch_shards

    if seq_chunk is None:
        # Largest divisor of T whose streamed chunk (double-buffered) + gin scratch fits a
        # conservative budget (safe w.r.t. v7x's 64 MiB physical / 32 MiB scoped VMEM).
        x_bytes_t = Bs * E2p * jnp.dtype(cdt).itemsize       # per-timestep streamed x (x2 buffers)
        gin_bytes_t = Bs * 8 * Hp * 4                         # per-timestep gin scratch (single)
        budget = 16 * 1024 * 1024
        cand = [x for x in range(1, T + 1)
                if T % x == 0 and x * (2 * x_bytes_t + gin_bytes_t) <= budget]
        seq_chunk = max(cand) if cand else 1
    assert T % seq_chunk == 0, "seq_chunk must divide the sequence length"
    n_chunks = T // seq_chunk

    # Embedding lookup + layout (glue, outside the kernel): cast to compute dtype first,
    # time-major, batch padded, time-reversed copy concatenated on the feature axis for the
    # backward direction, then feature axis padded to a lane-dense multiple of 128.
    emb = jnp.take(packed["embedding"], token_ids, axis=0).astype(cdt)   # (B, T, E)
    emb = jnp.transpose(emb, (1, 0, 2))                                  # (T, B, E)
    emb = jnp.pad(emb, ((0, 0), (0, Bp - B), (0, 0)))                    # (T, Bp, E)
    xcat = jnp.concatenate([emb, emb[::-1]], axis=-1)                    # (T, Bp, 2E)
    if E2p > 2 * E:
        xcat = jnp.pad(xcat, ((0, 0), (0, 0), (0, E2p - 2 * E)))         # (T, Bp, E2p)

    out = pl.pallas_call(
        textrnn_kernel,
        out_shape=jax.ShapeDtypeStruct((Bp, Cp), jnp.float32),
        grid_spec=pltpu.PrefetchScalarGridSpec(
            num_scalar_prefetch=0,
            grid=(batch_shards, n_chunks),
            in_specs=[
                pl.BlockSpec((seq_chunk, Bs, E2p), lambda b, t: (t, b, 0)),  # streamed
                pl.BlockSpec((E2p, 8 * Hp),    lambda b, t: (0, 0)),         # resident weights
                pl.BlockSpec((2 * Hp, 8 * Hp), lambda b, t: (0, 0)),
                pl.BlockSpec((1, 8 * Hp),      lambda b, t: (0, 0)),
                pl.BlockSpec((2 * Hp, Cp),     lambda b, t: (0, 0)),
                pl.BlockSpec((1, Cp),          lambda b, t: (0, 0)),
            ],
            out_specs=pl.BlockSpec((Bs, Cp), lambda b, t: (b, 0)),
            scratch_shapes=[
                pltpu.VMEM((seq_chunk, Bs, 8 * Hp), jnp.float32),  # precomputed input gates
                pltpu.VMEM((Bs, 2 * Hp), jnp.float32),             # h = [h_fwd | h_bwd]
                pltpu.VMEM((Bs, 2 * Hp), jnp.float32),             # c = [c_fwd | c_bwd]
            ],
        ),
        compiler_params=pltpu.CompilerParams(
            dimension_semantics=("parallel", "arbitrary"),
            vmem_limit_bytes=32 * 1024 * 1024,
        ),
    )(xcat, packed["wih"], packed["whh"], packed["bias"], packed["fcw"], packed["fcb"])

    return out[:B, :C]


# ----------------------------------------------------------------------------
# Pure-JAX reference (same MXU compute dtype for an apples-to-apples check)
# ----------------------------------------------------------------------------
def textrnn_reference(token_ids, params, compute_dtype=jnp.float32):
    emb = jnp.take(params["embedding"], token_ids, axis=0)   # (B, T, E)
    B = token_ids.shape[0]
    H = params["w_hh_f"].shape[1]

    def mm(a, b):
        return jnp.dot(a.astype(compute_dtype), b.astype(compute_dtype),
                       preferred_element_type=jnp.float32)

    def run_dir(seq, wih, whh, b):
        def cell(carry, x_t):
            h, c = carry
            gates = mm(x_t, wih.T) + mm(h, whh.T) + b
            i = jax.nn.sigmoid(gates[:, 0 * H:1 * H])
            f = jax.nn.sigmoid(gates[:, 1 * H:2 * H])
            g = jnp.tanh(gates[:, 2 * H:3 * H])
            o = jax.nn.sigmoid(gates[:, 3 * H:4 * H])
            c = f * c + i * g
            h = o * jnp.tanh(c)
            return (h, c), None

        z = jnp.zeros((B, H), jnp.float32)
        (h, _), _ = lax.scan(cell, (z, z), jnp.swapaxes(seq, 0, 1))
        return h

    hf = run_dir(emb, params["w_ih_f"], params["w_hh_f"],
                 params["b_ih_f"] + params["b_hh_f"])
    hb = run_dir(emb[:, ::-1, :], params["w_ih_b"], params["w_hh_b"],
                 params["b_ih_b"] + params["b_hh_b"])
    last_hidden = jnp.concatenate([hf, hb], axis=1)
    return mm(last_hidden, params["fc_w"].T) + params["fc_b"]


# ----------------------------------------------------------------------------
# Deterministic parameter initialization (nn.Embedding / nn.LSTM / nn.Linear shapes)
# ----------------------------------------------------------------------------
def init_params(key, vocab_size, embedding_dim, hidden_dim, num_classes, padding_idx=0):
    ks = jax.random.split(key, 12)
    E, H, C = embedding_dim, hidden_dim, num_classes
    k_rnn = 1.0 / math.sqrt(H)
    k_fc = 1.0 / math.sqrt(2 * H)

    emb = jax.random.normal(ks[0], (vocab_size, E), jnp.float32)
    emb = emb.at[padding_idx].set(0.0)

    def u(k, shape, bound):
        return jax.random.uniform(k, shape, jnp.float32, -bound, bound)

    return {
        "embedding": emb,
        "w_ih_f": u(ks[1], (4 * H, E), k_rnn),
        "w_hh_f": u(ks[2], (4 * H, H), k_rnn),
        "b_ih_f": u(ks[3], (4 * H,), k_rnn),
        "b_hh_f": u(ks[4], (4 * H,), k_rnn),
        "w_ih_b": u(ks[5], (4 * H, E), k_rnn),
        "w_hh_b": u(ks[6], (4 * H, H), k_rnn),
        "b_ih_b": u(ks[7], (4 * H,), k_rnn),
        "b_hh_b": u(ks[8], (4 * H,), k_rnn),
        "fc_w": u(ks[9], (C, 2 * H), k_fc),
        "fc_b": u(ks[10], (C,), k_fc),
    }


if __name__ == "__main__":
    VOCAB, E, H, C = 100, 32, 32, 8
    B, T = 2, 8

    key = jax.random.PRNGKey(0)
    pkey, xkey = jax.random.split(key)
    params = init_params(pkey, VOCAB, E, H, C)
    token_ids = jax.random.randint(xkey, (B, T), minval=0, maxval=VOCAB, dtype=jnp.int32)

    # Performance config: bf16 MXU operands, T streamed in chunks of 4,
    # batch sharded across 2 TensorCores (parallel axis; no-op on 1-TC chips).
    packed_bf16 = pack_textrnn_params(params, compute_dtype=jnp.bfloat16)
    out_bf16 = jax.block_until_ready(
        textrnn_forward(token_ids, packed_bf16, seq_chunk=4, batch_shards=2))
    ref_bf16 = jax.block_until_ready(
        textrnn_reference(token_ids, params, compute_dtype=jnp.bfloat16))
    assert out_bf16.shape == (B, C)
    assert jnp.allclose(out_bf16, ref_bf16, rtol=2e-2, atol=2e-2), (out_bf16, ref_bf16)

    # Full-precision sanity check of the fused/padded kernel math (auto chunk selection).
    packed_f32 = pack_textrnn_params(params, compute_dtype=jnp.float32)
    out_f32 = jax.block_until_ready(
        textrnn_forward(token_ids, packed_f32, batch_shards=1))
    ref_f32 = jax.block_until_ready(
        textrnn_reference(token_ids, params, compute_dtype=jnp.float32))
    assert jnp.allclose(out_f32, ref_f32, rtol=1e-3, atol=1e-3), (out_f32, ref_f32)

    print("KERNEL_OK")
</pallas_src>

<mosaic_0001>
module attributes {stable_mosaic.version = 11 : i64} {
  func.func @textrnn_kernel(%arg0: i32, %arg1: i32, %arg2: memref<4x8x128xbf16, #tpu.memory_space<vmem>>, %arg3: memref<128x1024xbf16, #tpu.memory_space<vmem>>, %arg4: memref<256x1024xbf16, #tpu.memory_space<vmem>>, %arg5: memref<1x1024xf32, #tpu.memory_space<vmem>>, %arg6: memref<256x128xbf16, #tpu.memory_space<vmem>>, %arg7: memref<1x128xf32, #tpu.memory_space<vmem>>, %arg8: memref<8x128xf32, #tpu.memory_space<vmem>>, %arg9: memref<4x8x1024xf32, #tpu.memory_space<vmem>>, %arg10: memref<8x256xf32, #tpu.memory_space<vmem>>, %arg11: memref<8x256xf32, #tpu.memory_space<vmem>>) attributes {dimension_semantics = [#tpu.dimension_semantics<parallel>, #tpu.dimension_semantics<arbitrary>], iteration_bounds = array<i64: 2, 2>, scalar_prefetch = 0 : i64, scratch_operands = 3 : i64, tpu.core_type = #tpu.core_type<tc>, window_params = [{transform_indices = @transform_0, window_bounds = array<i64: 4, 8, 128>}, {pipeline_mode = #tpu.pipeline_mode<synchronous>, transform_indices = @transform_1, window_bounds = array<i64: 128, 1024>}, {pipeline_mode = #tpu.pipeline_mode<synchronous>, transform_indices = @transform_2, window_bounds = array<i64: 256, 1024>}, {pipeline_mode = #tpu.pipeline_mode<synchronous>, transform_indices = @transform_3, window_bounds = array<i64: 1, 1024>}, {pipeline_mode = #tpu.pipeline_mode<synchronous>, transform_indices = @transform_4, window_bounds = array<i64: 256, 128>}, {pipeline_mode = #tpu.pipeline_mode<synchronous>, transform_indices = @transform_5, window_bounds = array<i64: 1, 128>}, {transform_indices = @transform_6, window_bounds = array<i64: 8, 128>}]} {
    %c0_i32 = arith.constant 0 : i32
    %0 = arith.cmpi eq, %arg1, %c0_i32 : i32
    %1 = arith.extui %0 : i1 to i32
    %c0_i32_0 = arith.constant 0 : i32
    %2 = arith.cmpi ne, %1, %c0_i32_0 : i32
    scf.if %2 {
      %cst_47 = arith.constant 0.000000e+00 : f32
      %144 = vector.broadcast %cst_47 : f32 to vector<8x256xf32>
      %c0_48 = arith.constant 0 : index
      %c0_49 = arith.constant 0 : index
      %145 = vector.load %arg10[%c0_48, %c0_49] : memref<8x256xf32, #tpu.memory_space<vmem>>, vector<8x256xf32>
      tpu.vector_store %arg10[%c0_48, %c0_49], %144 {strides = array<i32>} : memref<8x256xf32, #tpu.memory_space<vmem>>, vector<8x256xf32>,
      %cst_50 = arith.constant 0.000000e+00 : f32
      %146 = vector.broadcast %cst_50 : f32 to vector<8x256xf32>
      %c0_51 = arith.constant 0 : index
      %c0_52 = arith.constant 0 : index
      %147 = vector.load %arg11[%c0_51, %c0_52] : memref<8x256xf32, #tpu.memory_space<vmem>>, vector<8x256xf32>
      tpu.vector_store %arg11[%c0_51, %c0_52], %146 {strides = array<i32>} : memref<8x256xf32, #tpu.memory_space<vmem>>, vector<8x256xf32>,
    } else {
    }
    %c0 = arith.constant 0 : index
    %c0_1 = arith.constant 0 : index
    %c0_2 = arith.constant 0 : index
    %3 = vector.load %arg2[%c0, %c0_1, %c0_2] : memref<4x8x128xbf16, #tpu.memory_space<vmem>>, vector<4x8x128xbf16>
    %4 = vector.shape_cast %3 : vector<4x8x128xbf16> to vector<32x128xbf16>
    %c0_3 = arith.constant 0 : index
    %c0_4 = arith.constant 0 : index
    %5 = vector.load %arg3[%c0_3, %c0_4] : memref<128x1024xbf16, #tpu.memory_space<vmem>>, vector<128x1024xbf16>
    %cst = arith.constant dense<0.000000e+00> : vector<32x1024xf32>
    %6 = tpu.matmul %4, %5, %cst {dimension_numbers = #tpu.dot_dimension_numbers<[1], [0], [0], [1], [0, 0, 1, 1], [], []>} : vector<32x128xbf16>, vector<128x1024xbf16>, vector<32x1024xf32> -> vector<32x1024xf32>
    %c0_5 = arith.constant 0 : index
    %c0_6 = arith.constant 0 : index
    %7 = vector.load %arg5[%c0_5, %c0_6] : memref<1x1024xf32, #tpu.memory_space<vmem>>, vector<1x1024xf32>
    %8 = vector.broadcast %7 : vector<1x1024xf32> to vector<32x1024xf32>
    %9 = arith.addf %6, %8 : vector<32x1024xf32>
    %10 = vector.shape_cast %9 : vector<32x1024xf32> to vector<4x8x1024xf32>
    %c0_7 = arith.constant 0 : index
    %c0_8 = arith.constant 0 : index
    %c0_9 = arith.constant 0 : index
    %11 = vector.load %arg9[%c0_7, %c0_8, %c0_9] : memref<4x8x1024xf32, #tpu.memory_space<vmem>>, vector<4x8x1024xf32>
    tpu.vector_store %arg9[%c0_7, %c0_8, %c0_9], %10 {strides = array<i32>} : memref<4x8x1024xf32, #tpu.memory_space<vmem>>, vector<4x8x1024xf32>,
    %c0_10 = arith.constant 0 : index
    %c0_11 = arith.constant 0 : index
    %12 = vector.load %arg4[%c0_10, %c0_11] : memref<256x1024xbf16, #tpu.memory_space<vmem>>, vector<256x1024xbf16>
    %c0_12 = arith.constant 0 : index
    %c0_13 = arith.constant 0 : index
    %13 = vector.load %arg10[%c0_12, %c0_13] : memref<8x256xf32, #tpu.memory_space<vmem>>, vector<8x256xf32>
    %c0_14 = arith.constant 0 : index
    %c0_15 = arith.constant 0 : index
    %14 = vector.load %arg11[%c0_14, %c0_15] : memref<8x256xf32, #tpu.memory_space<vmem>>, vector<8x256xf32>
    %c0_i32_16 = arith.constant 0 : i32
    %15 = arith.index_cast %c0_i32_16 : i32 to index
    %c0_17 = arith.constant 0 : index
    %c0_18 = arith.constant 0 : index
    %16 = vector.load %arg9[%15, %c0_17, %c0_18] : memref<4x8x1024xf32, #tpu.memory_space<vmem>>, vector<1x8x1024xf32>
    %17 = vector.shape_cast %16 : vector<1x8x1024xf32> to vector<8x1024xf32>
    %18 = arith.truncf %13 : vector<8x256xf32> to vector<8x256xbf16>
    %cst_19 = arith.constant dense<0.000000e+00> : vector<8x1024xf32>
    %19 = tpu.matmul %18, %12, %cst_19 {dimension_numbers = #tpu.dot_dimension_numbers<[1], [0], [0], [1], [0, 0, 1, 1], [], []>} : vector<8x256xbf16>, vector<256x1024xbf16>, vector<8x1024xf32> -> vector<8x1024xf32>
    %20 = arith.addf %17, %19 : vector<8x1024xf32>
    %21 = vector.extract_strided_slice %20 {offsets = [0, 0], sizes = [8, 256], strides = [1, 1]} : vector<8x1024xf32> to vector<8x256xf32>
    %22 = arith.negf %21 : vector<8x256xf32>
    %23 = math.exp %22 : vector<8x256xf32>
    %cst_20 = arith.constant 1.000000e+00 : f32
    %24 = vector.broadcast %cst_20 : f32 to vector<8x256xf32>
    %25 = arith.addf %24, %23 : vector<8x256xf32>
    %26 = arith.divf %24, %25 : vector<8x256xf32>
    %27 = vector.extract_strided_slice %20 {offsets = [0, 256], sizes = [8, 256], strides = [1, 1]} : vector<8x1024xf32> to vector<8x256xf32>
    %28 = arith.negf %27 : vector<8x256xf32>
    %29 = math.exp %28 : vector<8x256xf32>
    %cst_21 = arith.constant 1.000000e+00 : f32
    %30 = vector.broadcast %cst_21 : f32 to vector<8x256xf32>
    %31 = arith.addf %30, %29 : vector<8x256xf32>
    %32 = arith.divf %30, %31 : vector<8x256xf32>
    %33 = vector.extract_strided_slice %20 {offsets = [0, 512], sizes = [8, 256], strides = [1, 1]} : vector<8x1024xf32> to vector<8x256xf32>
    %34 = math.tanh %33 : vector<8x256xf32>
    %35 = vector.extract_strided_slice %20 {offsets = [0, 768], sizes = [8, 256], strides = [1, 1]} : vector<8x1024xf32> to vector<8x256xf32>
    %36 = arith.negf %35 : vector<8x256xf32>
    %37 = math.exp %36 : vector<8x256xf32>
    %cst_22 = arith.constant 1.000000e+00 : f32
    %38 = vector.broadcast %cst_22 : f32 to vector<8x256xf32>
    %39 = arith.addf %38, %37 : vector<8x256xf32>
    %40 = arith.divf %38, %39 : vector<8x256xf32>
    %41 = arith.mulf %32, %14 : vector<8x256xf32>
    %42 = arith.mulf %26, %34 : vector<8x256xf32>
    %43 = arith.addf %41, %42 : vector<8x256xf32>
    %44 = math.tanh %43 : vector<8x256xf32>
    %45 = arith.mulf %40, %44 : vector<8x256xf32>
    %c1_i32 = arith.constant 1 : i32
    %46 = arith.index_cast %c1_i32 : i32 to index
    %c0_23 = arith.constant 0 : index
    %c0_24 = arith.constant 0 : index
    %47 = vector.load %arg9[%46, %c0_23, %c0_24] : memref<4x8x1024xf32, #tpu.memory_space<vmem>>, vector<1x8x1024xf32>
    %48 = vector.shape_cast %47 : vector<1x8x1024xf32> to vector<8x1024xf32>
    %49 = arith.truncf %45 : vector<8x256xf32> to vector<8x256xbf16>
    %cst_25 = arith.constant dense<0.000000e+00> : vector<8x1024xf32>
    %50 = tpu.matmul %49, %12, %cst_25 {dimension_numbers = #tpu.dot_dimension_numbers<[1], [0], [0], [1], [0, 0, 1, 1], [], []>} : vector<8x256xbf16>, vector<256x1024xbf16>, vector<8x1024xf32> -> vector<8x1024xf32>
    %51 = arith.addf %48, %50 : vector<8x1024xf32>
    %52 = vector.extract_strided_slice %51 {offsets = [0, 0], sizes = [8, 256], strides = [1, 1]} : vector<8x1024xf32> to vector<8x256xf32>
    %53 = arith.negf %52 : vector<8x256xf32>
    %54 = math.exp %53 : vector<8x256xf32>
    %cst_26 = arith.constant 1.000000e+00 : f32
    %55 = vector.broadcast %cst_26 : f32 to vector<8x256xf32>
    %56 = arith.addf %55, %54 : vector<8x256xf32>
    %57 = arith.divf %55, %56 : vector<8x256xf32>
    %58 = vector.extract_strided_slice %51 {offsets = [0, 256], sizes = [8, 256], strides = [1, 1]} : vector<8x1024xf32> to vector<8x256xf32>
    %59 = arith.negf %58 : vector<8x256xf32>
    %60 = math.exp %59 : vector<8x256xf32>
    %cst_27 = arith.constant 1.000000e+00 : f32
    %61 = vector.broadcast %cst_27 : f32 to vector<8x256xf32>
    %62 = arith.addf %61, %60 : vector<8x256xf32>
    %63 = arith.divf %61, %62 : vector<8x256xf32>
    %64 = vector.extract_strided_slice %51 {offsets = [0, 512], sizes = [8, 256], strides = [1, 1]} : vector<8x1024xf32> to vector<8x256xf32>
    %65 = math.tanh %64 : vector<8x256xf32>
    %66 = vector.extract_strided_slice %51 {offsets = [0, 768], sizes = [8, 256], strides = [1, 1]} : vector<8x1024xf32> to vector<8x256xf32>
    %67 = arith.negf %66 : vector<8x256xf32>
    %68 = math.exp %67 : vector<8x256xf32>
    %cst_28 = arith.constant 1.000000e+00 : f32
    %69 = vector.broadcast %cst_28 : f32 to vector<8x256xf32>
    %70 = arith.addf %69, %68 : vector<8x256xf32>
    %71 = arith.divf %69, %70 : vector<8x256xf32>
    %72 = arith.mulf %63, %43 : vector<8x256xf32>
    %73 = arith.mulf %57, %65 : vector<8x256xf32>
    %74 = arith.addf %72, %73 : vector<8x256xf32>
    %75 = math.tanh %74 : vector<8x256xf32>
    %76 = arith.mulf %71, %75 : vector<8x256xf32>
    %c2_i32 = arith.constant 2 : i32
    %77 = arith.index_cast %c2_i32 : i32 to index
    %c0_29 = arith.constant 0 : index
    %c0_30 = arith.constant 0 : index
    %78 = vector.load %arg9[%77, %c0_29, %c0_30] : memref<4x8x1024xf32, #tpu.memory_space<vmem>>, vector<1x8x1024xf32>
    %79 = vector.shape_cast %78 : vector<1x8x1024xf32> to vector<8x1024xf32>
    %80 = arith.truncf %76 : vector<8x256xf32> to vector<8x256xbf16>
    %cst_31 = arith.constant dense<0.000000e+00> : vector<8x1024xf32>
    %81 = tpu.matmul %80, %12, %cst_31 {dimension_numbers = #tpu.dot_dimension_numbers<[1], [0], [0], [1], [0, 0, 1, 1], [], []>} : vector<8x256xbf16>, vector<256x1024xbf16>, vector<8x1024xf32> -> vector<8x1024xf32>
    %82 = arith.addf %79, %81 : vector<8x1024xf32>
    %83 = vector.extract_strided_slice %82 {offsets = [0, 0], sizes = [8, 256], strides = [1, 1]} : vector<8x1024xf32> to vector<8x256xf32>
    %84 = arith.negf %83 : vector<8x256xf32>
    %85 = math.exp %84 : vector<8x256xf32>
    %cst_32 = arith.constant 1.000000e+00 : f32
    %86 = vector.broadcast %cst_32 : f32 to vector<8x256xf32>
    %87 = arith.addf %86, %85 : vector<8x256xf32>
    %88 = arith.divf %86, %87 : vector<8x256xf32>
    %89 = vector.extract_strided_slice %82 {offsets = [0, 256], sizes = [8, 256], strides = [1, 1]} : vector<8x1024xf32> to vector<8x256xf32>
    %90 = arith.negf %89 : vector<8x256xf32>
    %91 = math.exp %90 : vector<8x256xf32>
    %cst_33 = arith.constant 1.000000e+00 : f32
    %92 = vector.broadcast %cst_33 : f32 to vector<8x256xf32>
    %93 = arith.addf %92, %91 : vector<8x256xf32>
    %94 = arith.divf %92, %93 : vector<8x256xf32>
    %95 = vector.extract_strided_slice %82 {offsets = [0, 512], sizes = [8, 256], strides = [1, 1]} : vector<8x1024xf32> to vector<8x256xf32>
    %96 = math.tanh %95 : vector<8x256xf32>
    %97 = vector.extract_strided_slice %82 {offsets = [0, 768], sizes = [8, 256], strides = [1, 1]} : vector<8x1024xf32> to vector<8x256xf32>
    %98 = arith.negf %97 : vector<8x256xf32>
    %99 = math.exp %98 : vector<8x256xf32>
    %cst_34 = arith.constant 1.000000e+00 : f32
    %100 = vector.broadcast %cst_34 : f32 to vector<8x256xf32>
    %101 = arith.addf %100, %99 : vector<8x256xf32>
    %102 = arith.divf %100, %101 : vector<8x256xf32>
    %103 = arith.mulf %94, %74 : vector<8x256xf32>
    %104 = arith.mulf %88, %96 : vector<8x256xf32>
    %105 = arith.addf %103, %104 : vector<8x256xf32>
    %106 = math.tanh %105 : vector<8x256xf32>
    %107 = arith.mulf %102, %106 : vector<8x256xf32>
    %c3_i32 = arith.constant 3 : i32
    %108 = arith.index_cast %c3_i32 : i32 to index
    %c0_35 = arith.constant 0 : index
    %c0_36 = arith.constant 0 : index
    %109 = vector.load %arg9[%108, %c0_35, %c0_36] : memref<4x8x1024xf32, #tpu.memory_space<vmem>>, vector<1x8x1024xf32>
    %110 = vector.shape_cast %109 : vector<1x8x1024xf32> to vector<8x1024xf32>
    %111 = arith.truncf %107 : vector<8x256xf32> to vector<8x256xbf16>
    %cst_37 = arith.constant dense<0.000000e+00> : vector<8x1024xf32>
    %112 = tpu.matmul %111, %12, %cst_37 {dimension_numbers = #tpu.dot_dimension_numbers<[1], [0], [0], [1], [0, 0, 1, 1], [], []>} : vector<8x256xbf16>, vector<256x1024xbf16>, vector<8x1024xf32> -> vector<8x1024xf32>
    %113 = arith.addf %110, %112 : vector<8x1024xf32>
    %114 = vector.extract_strided_slice %113 {offsets = [0, 0], sizes = [8, 256], strides = [1, 1]} : vector<8x1024xf32> to vector<8x256xf32>
    %115 = arith.negf %114 : vector<8x256xf32>
    %116 = math.exp %115 : vector<8x256xf32>
    %cst_38 = arith.constant 1.000000e+00 : f32
    %117 = vector.broadcast %cst_38 : f32 to vector<8x256xf32>
    %118 = arith.addf %117, %116 : vector<8x256xf32>
    %119 = arith.divf %117, %118 : vector<8x256xf32>
    %120 = vector.extract_strided_slice %113 {offsets = [0, 256], sizes = [8, 256], strides = [1, 1]} : vector<8x1024xf32> to vector<8x256xf32>
    %121 = arith.negf %120 : vector<8x256xf32>
    %122 = math.exp %121 : vector<8x256xf32>
    %cst_39 = arith.constant 1.000000e+00 : f32
    %123 = vector.broadcast %cst_39 : f32 to vector<8x256xf32>
    %124 = arith.addf %123, %122 : vector<8x256xf32>
    %125 = arith.divf %123, %124 : vector<8x256xf32>
    %126 = vector.extract_strided_slice %113 {offsets = [0, 512], sizes = [8, 256], strides = [1, 1]} : vector<8x1024xf32> to vector<8x256xf32>
    %127 = math.tanh %126 : vector<8x256xf32>
    %128 = vector.extract_strided_slice %113 {offsets = [0, 768], sizes = [8, 256], strides = [1, 1]} : vector<8x1024xf32> to vector<8x256xf32>
    %129 = arith.negf %128 : vector<8x256xf32>
    %130 = math.exp %129 : vector<8x256xf32>
    %cst_40 = arith.constant 1.000000e+00 : f32
    %131 = vector.broadcast %cst_40 : f32 to vector<8x256xf32>
    %132 = arith.addf %131, %130 : vector<8x256xf32>
    %133 = arith.divf %131, %132 : vector<8x256xf32>
    %134 = arith.mulf %125, %105 : vector<8x256xf32>
    %135 = arith.mulf %119, %127 : vector<8x256xf32>
    %136 = arith.addf %134, %135 : vector<8x256xf32>
    %137 = math.tanh %136 : vector<8x256xf32>
    %138 = arith.mulf %133, %137 : vector<8x256xf32>
    %c4_i32 = arith.constant 4 : i32
    %c0_41 = arith.constant 0 : index
    %c0_42 = arith.constant 0 : index
    %139 = vector.load %arg10[%c0_41, %c0_42] : memref<8x256xf32, #tpu.memory_space<vmem>>, vector<8x256xf32>
    tpu.vector_store %arg10[%c0_41, %c0_42], %138 {strides = array<i32>} : memref<8x256xf32, #tpu.memory_space<vmem>>, vector<8x256xf32>,
    %c0_43 = arith.constant 0 : index
    %c0_44 = arith.constant 0 : index
    %140 = vector.load %arg11[%c0_43, %c0_44] : memref<8x256xf32, #tpu.memory_space<vmem>>, vector<8x256xf32>
    tpu.vector_store %arg11[%c0_43, %c0_44], %136 {strides = array<i32>} : memref<8x256xf32, #tpu.memory_space<vmem>>, vector<8x256xf32>,
    %c1_i32_45 = arith.constant 1 : i32
    %141 = arith.cmpi eq, %arg1, %c1_i32_45 : i32
    %142 = arith.extui %141 : i1 to i32
    %c0_i32_46 = arith.constant 0 : i32
    %143 = arith.cmpi ne, %142, %c0_i32_46 : i32
    scf.if %143 {
      %144 = arith.truncf %138 : vector<8x256xf32> to vector<8x256xbf16>
      %c0_47 = arith.constant 0 : index
      %c0_48 = arith.constant 0 : index
      %145 = vector.load %arg6[%c0_47, %c0_48] : memref<256x128xbf16, #tpu.memory_space<vmem>>, vector<256x128xbf16>
      %cst_49 = arith.constant dense<0.000000e+00> : vector<8x128xf32>
      %146 = tpu.matmul %144, %145, %cst_49 {dimension_numbers = #tpu.dot_dimension_numbers<[1], [0], [0], [1], [0, 0, 1, 1], [], []>} : vector<8x256xbf16>, vector<256x128xbf16>, vector<8x128xf32> -> vector<8x128xf32>
      %c0_50 = arith.constant 0 : index
      %c0_51 = arith.constant 0 : index
      %147 = vector.load %arg7[%c0_50, %c0_51] : memref<1x128xf32, #tpu.memory_space<vmem>>, vector<1x128xf32>
      %148 = vector.broadcast %147 : vector<1x128xf32> to vector<8x128xf32>
      %149 = arith.addf %146, %148 : vector<8x128xf32>
      %c0_52 = arith.constant 0 : index
      %c0_53 = arith.constant 0 : index
      %150 = vector.load %arg8[%c0_52, %c0_53] : memref<8x128xf32, #tpu.memory_space<vmem>>, vector<8x128xf32>
      tpu.vector_store %arg8[%c0_52, %c0_53], %149 {strides = array<i32>} : memref<8x128xf32, #tpu.memory_space<vmem>>, vector<8x128xf32>,
    } else {
    }
    return
  }
  func.func @transform_0(%arg0: i32, %arg1: i32) -> (i32, i32, i32) {
    %c0_i32 = arith.constant 0 : i32
    %c0_i32_0 = arith.constant 0 : i32
    return %arg1, %arg0, %c0_i32 : i32, i32, i32
  }
  func.func @transform_1(%arg0: i32, %arg1: i32) -> (i32, i32) {
    %c0_i32 = arith.constant 0 : i32
    %c0_i32_0 = arith.constant 0 : i32
    %c0_i32_1 = arith.constant 0 : i32
    return %c0_i32, %c0_i32_0 : i32, i32
  }
  func.func @transform_2(%arg0: i32, %arg1: i32) -> (i32, i32) {
    %c0_i32 = arith.constant 0 : i32
    %c0_i32_0 = arith.constant 0 : i32
    %c0_i32_1 = arith.constant 0 : i32
    return %c0_i32, %c0_i32_0 : i32, i32
  }
  func.func @transform_3(%arg0: i32, %arg1: i32) -> (i32, i32) {
    %c0_i32 = arith.constant 0 : i32
    %c0_i32_0 = arith.constant 0 : i32
    %c0_i32_1 = arith.constant 0 : i32
    return %c0_i32, %c0_i32_0 : i32, i32
  }
  func.func @transform_4(%arg0: i32, %arg1: i32) -> (i32, i32) {
    %c0_i32 = arith.constant 0 : i32
    %c0_i32_0 = arith.constant 0 : i32
    %c0_i32_1 = arith.constant 0 : i32
    return %c0_i32, %c0_i32_0 : i32, i32
  }
  func.func @transform_5(%arg0: i32, %arg1: i32) -> (i32, i32) {
    %c0_i32 = arith.constant 0 : i32
    %c0_i32_0 = arith.constant 0 : i32
    %c0_i32_1 = arith.constant 0 : i32
    return %c0_i32, %c0_i32_0 : i32, i32
  }
  func.func @transform_6(%arg0: i32, %arg1: i32) -> (i32, i32) {
    %c0_i32 = arith.constant 0 : i32
    %c0_i32_0 = arith.constant 0 : i32
    return %arg0, %c0_i32 : i32, i32
  }
}

</mosaic_0001>

<bundles_post_ra>
// kernel: tpu_custom_call.1
= control target key start
LH: loop header
LB: loop body
LE: loop exit
PB: predicated region body
PF: predicated region fallthrough
CT: control target
= control target key end

     0   :  { %s6641_s0 = inlined_call_operand.hbm [shape: bf16[8,16,128], index: 0, kind: input, shape index: {}]   ;;  %s6642_s1 = inlined_call_operand.hbm [shape: bf16[128,1024], index: 1, kind: input, shape index: {}]   ;;  %s6643_s2 = inlined_call_operand.hbm [shape: bf16[256,1024], index: 2, kind: input, shape index: {}]   ;;  %s6644_s3 = inlined_call_operand.hbm [shape: f32[1,1024], index: 3, kind: input, shape index: {}]   ;;  %s6645_s4 = inlined_call_operand.hbm [shape: bf16[256,128], index: 4, kind: input, shape index: {}]   ;;  %s6646_s5 = inlined_call_operand.vmem [shape: f32[1,128], index: 5, kind: input, shape index: {}]   ;;  %s6647_s6 = inlined_call_operand.hbm [shape: f32[16,128], index: 6, kind: output, shape index: {}]  }
   0x1   :  { %6907 = sst [smem:[#allocation185_spill]] %s6642_s1 }
   0x2   :  { %6908 = sst [smem:[#allocation186_spill]] %s6643_s2 }
   0x3   :  { %6909 = sst [smem:[#allocation187_spill]] %s6644_s3 }
   0x4   :  { %6910 = sst [smem:[#allocation188_spill]] %s6645_s4 }
   0x5   :  { %6911 = sst [smem:[#allocation189_spill]] %s6646_s5 }
   0x6   :  { %6912 = sst [smem:[#allocation190_spill]] %s6647_s6 }
   0x7   :  { %11 = vsyncpa [#allocation6], 0 }
   0x8   :  { %13 = vsyncpa [#allocation6 + $0x1], 0 }
   0x9   :  { %14 = vsyncpa [#allocation9], 0 }
   0xa   :  { %15 = vsyncpa [#allocation12], 0 }
   0xb   :  { %16 = vsyncpa [#allocation7], 0 }
   0xc   :  { %18 = vsyncpa [#allocation7 + $0x1], 0  ;;  %s5157_s21 = smov 0   ;;  %s5159_s22 = smov 0  }
   0xd   :  { %s5161_s23 = smov 0   ;;  %s5163_s24 = smov 0  }
   0xe   :  { %s5165_s25 = smov 0   ;;  %s5167_s26 = smov 0  }
   0xf   :  { %s5169_s27 = smov 0   ;;  %s5171_s28 = smov 0  }
  0x10   :  { %s5173_s29 = smov 0   ;;  %s5175_s30 = smov 0  }
  0x11   :  { %s5177_s7 = smov 0  }
  0x12 LB: > { %6913 = sst [smem:[#allocation19_spill]] %s5070_s21  ;;  %s3452_s8 = sadd.s32 4294967295, %s5110_s7   ;;  %s5110_s7 = sphi %s5177_s7, %s24_s7   ;;  %s5106_s30 = sphi %s5175_s30, %s7418_s30   ;;  %s5102_s29 = sphi %s5173_s29, %s7410_s29   ;;  %s5098_s28 = sphi %s5171_s28, %s7417_s28   ;;  %s5094_s27 = sphi %s5169_s27, %s7409_s27   ;;  %s5090_s26 = sphi %s5167_s26, %s7416_s26   ;;  %s5086_s25 = sphi %s5165_s25, %s7415_s25   ;;  %s5082_s24 = sphi %s5163_s24, %s7414_s24   ;;  %s5078_s23 = sphi %s5161_s23, %s7413_s23   ;;  %s5074_s22 = sphi %s5159_s22, %s7412_s22   ;;  %s5070_s21 = sphi %s5157_s21, %s7411_s21  }
  0x13   : > { %6914 = sst [smem:[#allocation20_spill]] %s5098_s28  ;;  %s3453_s9 = sadd.s32 4294967294, %s5110_s7  }
  0x14   : > { %6915 = sst [smem:[#allocation21_spill]] %s5102_s29  ;;  %p58_p0 = scmp.ne.s32.totalorder %s5086_s25, %s5082_s24 }
  0x15   : > { %p5213_p1 = scmp.eq.s32.totalorder %s3452_s8, 0  ;;  %p186_p2 = scmp.ne.s32.totalorder %s5078_s23, %s5074_s22 }
  0x16   : > { %p187_p4 = scmp.eq.s32.totalorder %s3452_s8, 3  ;;  %p192_p5 = scmp.ne.s32.totalorder %s5074_s22, %s5070_s21 }
  0x17   : > { %p5222_p3 = por %p5213_p1, %p58_p0  ;;  %p193_p6 = scmp.eq.s32.totalorder %s3453_s9, 3 }
  0x18   : > { %p5228_p7 = por %p187_p4, %p186_p2  ;;  %p3454_p8 = scmp.ge.s32.totalorder %s5110_s7, 1 }
  0x19   : > { %p5233_p9 = por %p193_p6, %p192_p5  ;;  %p200_p10 = scmp.lt.s32.totalorder %s5110_s7, 5 }
  0x1a   : > { %s6918_s13 = scalar_select %p5228_p7, 1, 0 }
  0x1b   : > { %s6920_s14 = scalar_select %p5233_p9, 1, 0 }
  0x1c   : > { %6919 = sst [smem:[#allocation22_spill]] %s6918_s13  ;;  %p5241_p11 = pnand %p3454_p8, %p200_p10 }
  0x1d   : > { %6921 = sst [smem:[#allocation23_spill]] %s6920_s14  ;;  %s5112_s19 = smov [#allocation8]  }
  0x1e   : > { %s6922_s1 = sld [smem:[#allocation185_spill]]  ;;  %p4572_p12 = pneg %p5241_p11 }
  0x1f   : > { %s213_s20 = sshll.u32 %s5112_s19, 4  ;;  %s6925_s3 = sld [smem:[#allocation187_spill]]  ;;  %s214_s20 = int_to_ptr.vmem [resolvable:$true] %s213_s20 }
  0x20   : > { %p5249_p13 = pnand %p4572_p12, %p5213_p1  ;;  %s5113_s16 = smov 512  }
  0x21   : > { %s5114_s11 = smov 32   ;;  %s6926_s2 = sld [smem:[#allocation186_spill]] }
  0x22   : > { %s6927_s4 = sld [smem:[#allocation188_spill]]  ;;  %s5117_s21 = smov [#allocation13]  }
  0x23   : > { %s253_s14 = sshll.u32 %s5117_s21, 4  ;;  %s36_s8 = sadd.s32 1, %s5106_s30  ;;  %s254_s14 = int_to_ptr.vmem [resolvable:$true] %s253_s14 }
  0x24   : > { %s211_s17 = sshll.u32 %s6922_s1, 4  ;;  %s5115_s1 = smov [#allocation11]   ;;  %s212_s17 = int_to_ptr.hbm [resolvable:$true] %s211_s17 }
  0x25   : > { %s240_s15 = sshll.u32 %s6925_s3, 4  ;;  %s242_s19 = sshll.u32 %s5115_s1, 4  ;;  %s241_s15 = int_to_ptr.hbm [resolvable:$true] %s240_s15  ;;  %s243_s19 = int_to_ptr.vmem [resolvable:$true] %s242_s19 }
  0x26   : > { %4575 = dma.hbm_to_vmem [thread:$0]  (!%p5249_p13), %s212_s17, 8192, %s214_s20, [#allocation9], %s5113_s16, %s5113_s16, %s5114_s11  }
  0x27   : > { %s225_s6 = sshll.u32 %s6926_s2, 4  ;;  %s5116_s17 = smov [#allocation10]   ;;  %s226_s6 = int_to_ptr.hbm [resolvable:$true] %s225_s6 }
  0x28   : > { %4581 = dma.hbm_to_vmem [thread:$0]  (!%p5249_p13), %s241_s15, 128, %s243_s19, [#allocation12]  }
  0x29   : > { %s251_s3 = sshll.u32 %s6927_s4, 4  ;;  %s227_s1 = sshll.u32 %s5116_s17, 4  ;;  %s252_s3 = int_to_ptr.hbm [resolvable:$true] %s251_s3  ;;  %s228_s1 = int_to_ptr.vmem [resolvable:$true] %s227_s1 }
  0x2a   : > { %4578 = dma.hbm_to_vmem [thread:$0]  (!%p5249_p13), %s226_s6, 16384, %s228_s1, [#allocation9], %s5113_s16, %s5113_s16, %s5114_s11  }
  0x2b   : > { %s6651_s20 = smov 64   ;;  %s6652_s15 = smov 4  }
  0x2c   : > { %4584 = dma.hbm_to_vmem [thread:$0]  (!%p5249_p13), %s252_s3, 2048, %s254_s14, [#allocation12], %s6651_s20, %s6651_s20, %s6652_s15  }
  0x2d   : > { %s33_s19 = sadd.s32 1, %s5102_s29  ;;  %s45_s9 = sadd.s32 1, %s5090_s26 }
  0x2e   : > { %p34_p0 = scmp.ge.s32.totalorder %s33_s19, 2  ;;  %p52_p2 = scmp.ne.s32.totalorder %s5090_s26, %s5086_s25 }
  0x2f   : > { %p53_p4 = scmp.eq.s32.totalorder %s5110_s7, 0  ;;  %p4597_p8 = scmp.lt.s32.totalorder %s5110_s7, 4 }
  0x30   : > { %s7420_s19 = smov (%p34_p0, %s33_s19), 0  ;;  %s7422_s8 = smov (!%p34_p0, %s36_s8), %s5106_s30 }
  0x31   : > { %6928 = sst [smem:[#allocation24_spill]] %s7420_s19  ;;  %s40_s6 = ssub.s32 %s5102_s29, %s7420_s19 }
  0x32   : > { %p5284_p5 = por %p53_p4, %p52_p2  ;;  %p38_p6 = scmp.ge.s32.totalorder %s7422_s8, 2 }
  0x33   : > { %s270_s3 = sand.u32 1, %s5090_s26   ;;  %s4341_s24 = sshll.u32 %s5102_s29, 3 }
  0x34   : > { %s7424_s8 = smov (%p38_p6, %s7422_s8), 0  ;;  %s3460_s16 = sshll.u32 %s270_s3, 4 }
  0x35   : > { %s41_s17 = ssub.s32 %s5106_s30, %s7424_s8  ;;  %s279_s21 = sadd.s32 %s5106_s30, %s4341_s24 }
  0x36   : > { %s42_s1 = sor.u32 %s41_s17, %s40_s6  ;;  %p174_p10 = scmp.eq.s32.totalorder %s41_s17, 0 }
  0x37   : > { %p43_p12 = scmp.eq.s32.totalorder %s42_s1, 0  ;;  %s6930_s14 = sadd.s32 1, %s5078_s23 }
  0x38   : > { %s5299_s20 = scalar_select %p174_p10, %s5078_s23, %s6930_s14  }
  0x39   : > { %s5302_s15 = scalar_select %p43_p12, %s5090_s26, %s45_s9  }
  0x3a   : > { %s3463_s2 = sshll.u32 %s279_s21, 2  ;;  %s274_s4 = scalar_lea.vmem [#allocation5], %s3460_s16 }
  0x3b   : > { %s284_s19 = sshll.u32 %s274_s4, 4  ;;  %s281_s28 = scalar_lea.hbm %s6641_s0, %s3463_s2  ;;  %s285_s19 = int_to_ptr.vmem [resolvable:$true] %s284_s19 }
  0x3c   : > { %s282_s5 = sshll.u32 %s281_s28, 4  ;;  %p4586_p13 = pnand %p4597_p8, %p5284_p5  ;;  %s283_s5 = int_to_ptr.hbm [resolvable:$true] %s282_s5 }
  0x3d   : > { %s271_s6 = scalar_lea.sflag [#allocation6], %s270_s3  ;;  %s5120_s24 = smov 128  }
  0x3e   : > { %s6931_s17 = smov 4   ;;  %s6932_s1 = smov 64  }
  0x3f   : > { %4588 = dma.hbm_to_vmem [thread:$0]  (!%p4586_p13), %s283_s5, 256, %s285_s19, %s271_s6, %s5120_s24, %s6932_s1, %s6931_s17  }
  0x40   : > { %296 = sbr.rel (%p5241_p11) target bundleno = 1338 (0x53a), region = 44 }
  0x45   : > { %s298_s4 = sand.u32 1, %s5086_s25  }
  0x46   : > { %s5316_s9 = sshll.u32 %s298_s4, 4  ;;  %s299_s2 = scalar_lea.sflag [#allocation6], %s298_s4 }
  0x47   : > { %s302_s28 = scalar_lea.vmem [#allocation5], %s5316_s9 }
  0x48   : > { %5053 = dma.done.wait (%p5222_p3), %s299_s2, 256  }
  0x49   : > { %5055 = vsyncadd (%p5222_p3), %s299_s2, 4294967040 }
  0x4a   : > { %5057 = dma.done.wait (%p5213_p1), [#allocation9], 24576  }
  0x4b   : > { %5059 = vsyncadd (%p5213_p1), [#allocation9], 4294942720 }
  0x4c   : > { %5061 = dma.done.wait (%p5213_p1), [#allocation12], 2176  }
  0x4d   : > { %5063 = vsyncadd (%p5213_p1), [#allocation12], 4294965120  ;;  %s349_s5 = sand.u32 1, %s5074_s22   ;;  %p3471_p3 = scmp.ne.s32.totalorder %s5094_s27, 0 }
  0x4e   : > { %s5334_s29 = sshll.u32 %s349_s5, 3 }
  0x4f   : > { %s351_s12 = scalar_lea.vmem [#allocation14], %s5334_s29  ;;  %356 = sbr.rel (%p3471_p3) target bundleno = 89 (0x59), region = 68 }
  0x54   : > { %v5121_v0 = vmov 0.0  }
  0x55   : > { %357 = vst [vmem:[#allocation3] sm:$0xff] %v5121_v0 }
  0x56   : > { %358 = vst [vmem:[#allocation3 + $0x8] sm:$0xff] %v5121_v0 }
  0x57   : > { %359 = vst [vmem:[#allocation4 + $0x8] sm:$0xff] %v5121_v0 }
  0x58   : > { %360 = vst [vmem:[#allocation4] sm:$0xff] %v5121_v0 }
  0x59 PF: > { %v3706_v1 = vld [vmem:[#allocation8 + $0x1c0] sm:$0xf]  ;;  %v4400_v3 = vld [vmem:[#allocation8 + $0x1c4] sm:$0xf]  ;;  %v3714_v6 = vld [vmem:[#allocation8 + $0x1c8] sm:$0xf] }
  0x5a   : > { %v4404_v2 = vld [vmem:[#allocation8 + $0x1dc] sm:$0xf0]  ;;  %v3708_v5 = vld [vmem:[#allocation8 + $0x1e0] sm:$0xf0]  ;;  %v4405_v7 = vld [vmem:[#allocation8 + $0x1e4] sm:$0xf0] }
  0x5b   : > { %v3707_v4 = vor.u32 %v4404_v2, %v3706_v1  ;;  %v3711_v8 = vor.u32 %v4400_v3, %v3708_v5  ;;  %v3715_v9 = vor.u32 %v4405_v7, %v3714_v6  ;;  %v4401_v10 = vld [vmem:[#allocation8 + $0x1cc] sm:$0xf]  ;;  %v3674_v12 = vld [vmem:[#allocation8 + $0x180] sm:$0xf]  ;;  %v4392_v15 = vld [vmem:[#allocation8 + $0x184] sm:$0xf] }
  0x5c   : > { %v3716_v11 = vld [vmem:[#allocation8 + $0x1e8] sm:$0xf0]  ;;  %v4396_v14 = vld [vmem:[#allocation8 + $0x19c] sm:$0xf0]  ;;  %v3676_v16 = vld [vmem:[#allocation8 + $0x1a0] sm:$0xf0] }
  0x5d   : > { %779 = vmatpush.bf16.msra.mxu0 %v3707_v4  ;;  %v3719_v13 = vor.u32 %v4401_v10, %v3716_v11  ;;  %798 = vmatpush.bf16.msra.mxu1 %v3711_v8  ;;  %v3675_v17 = vor.u32 %v4396_v14, %v3674_v12  ;;  %v3679_v18 = vor.u32 %v4392_v15, %v3676_v16  ;;  %v3682_v19 = vld [vmem:[#allocation8 + $0x188] sm:$0xf]  ;;  %v4393_v21 = vld [vmem:[#allocation8 + $0x18c] sm:$0xf]  ;;  %v3642_v24 = vld [vmem:[#allocation8 + $0x140] sm:$0xf] }
  0x5e   : > { %817 = vmatpush.bf16.msra.mxu2 %v3715_v9  ;;  %v4397_v20 = vld [vmem:[#allocation8 + $0x1a4] sm:$0xf0]  ;;  %v3684_v23 = vld [vmem:[#allocation8 + $0x1a8] sm:$0xf0]  ;;  %v4388_v25 = vld [vmem:[#allocation8 + $0x15c] sm:$0xf0] }
  0x5f   : > { %836 = vmatpush.bf16.msra.mxu3 %v3719_v13  ;;  %v3683_v22 = vor.u32 %v4397_v20, %v3682_v19  ;;  %v3687_v26 = vor.u32 %v4393_v21, %v3684_v23  ;;  %v4384_v27 = vld [vmem:[#allocation8 + $0x144] sm:$0xf]  ;;  %v3650_v29 = vld [vmem:[#allocation8 + $0x148] sm:$0xf]  ;;  %v3643_v30 = vor.u32 %v4388_v25, %v3642_v24  ;;  %v4385_v32 = vld [vmem:[#allocation8 + $0x14c] sm:$0xf] }
  0x60   : > { %v3644_v28 = vld [vmem:[#allocation8 + $0x160] sm:$0xf0]  ;;  %v4389_v31 = vld [vmem:[#allocation8 + $0x164] sm:$0xf0]  ;;  %v3652_v33 = vld [vmem:[#allocation8 + $0x168] sm:$0xf0] }
  0x61   : > { %780 = vmatpush.bf16.msra.mxu0 %v3675_v17  ;;  %799 = vmatpush.bf16.msra.mxu1 %v3679_v18  ;;  %v3647_v34 = vor.u32 %v4384_v27, %v3644_v28  ;;  %v3651_v35 = vor.u32 %v4389_v31, %v3650_v29  ;;  %v3610_v36 = vld [vmem:[#allocation8 + $0x100] sm:$0xf]  ;;  %v4376_v38 = vld [vmem:[#allocation8 + $0x104] sm:$0xf]  ;;  %v3655_v39 = vor.u32 %v4385_v32, %v3652_v33  ;;  %v3618_v41 = vld [vmem:[#allocation8 + $0x108] sm:$0xf] }
  0x62   : > { %818 = vmatpush.bf16.msra.mxu2 %v3683_v22  ;;  %v4380_v37 = vld [vmem:[#allocation8 + $0x11c] sm:$0xf0]  ;;  %v3612_v40 = vld [vmem:[#allocation8 + $0x120] sm:$0xf0]  ;;  %v4381_v42 = vld [vmem:[#allocation8 + $0x124] sm:$0xf0] }
  0x63   : > { %837 = vmatpush.bf16.msra.mxu3 %v3687_v26  ;;  %v4377_v43 = vld [vmem:[#allocation8 + $0x10c] sm:$0xf]  ;;  %v3611_v45 = vor.u32 %v4380_v37, %v3610_v36  ;;  %v3615_v46 = vor.u32 %v4376_v38, %v3612_v40  ;;  %v3619_v47 = vor.u32 %v4381_v42, %v3618_v41  ;;  %v3578_v48 = vld [vmem:[#allocation8 + $0xc0] sm:$0xf]  ;;  %v4368_v50 = vld [vmem:[#allocation8 + $0xc4] sm:$0xf] }
  0x64   : > { %v3620_v44 = vld [vmem:[#allocation8 + $0x128] sm:$0xf0]  ;;  %v4372_v49 = vld [vmem:[#allocation8 + $0xdc] sm:$0xf0]  ;;  %v3580_v52 = vld [vmem:[#allocation8 + $0xe0] sm:$0xf0] }
  0x65   : > { %781 = vmatpush.bf16.msra.mxu0 %v3643_v30  ;;  %800 = vmatpush.bf16.msra.mxu1 %v3647_v34  ;;  %v3623_v51 = vor.u32 %v4377_v43, %v3620_v44  ;;  %v3586_v53 = vld [vmem:[#allocation8 + $0xc8] sm:$0xf]  ;;  %v4369_v55 = vld [vmem:[#allocation8 + $0xcc] sm:$0xf]  ;;  %v3579_v57 = vor.u32 %v4372_v49, %v3578_v48  ;;  %v3583_v58 = vor.u32 %v4368_v50, %v3580_v52  ;;  %v3546_v60 = vld [vmem:[#allocation8 + $0x80] sm:$0xf] }
  0x66   : > { %819 = vmatpush.bf16.msra.mxu2 %v3651_v35  ;;  %v4373_v54 = vld [vmem:[#allocation8 + $0xe4] sm:$0xf0]  ;;  %v3588_v56 = vld [vmem:[#allocation8 + $0xe8] sm:$0xf0]  ;;  %v4364_v61 = vld [vmem:[#allocation8 + $0x9c] sm:$0xf0] }
  0x67   : > { %838 = vmatpush.bf16.msra.mxu3 %v3655_v39  ;;  %v3587_v59 = vor.u32 %v4373_v54, %v3586_v53  ;;  %v4360_v62 = vld [vmem:[#allocation8 + $0x84] sm:$0xf]  ;;  %v3591_v63 = vor.u32 %v4369_v55, %v3588_v56  ;;  %v3554_v1 = vld [vmem:[#allocation8 + $0x88] sm:$0xf]  ;;  %v4361_v3 = vld [vmem:[#allocation8 + $0x8c] sm:$0xf]  ;;  %v3547_v5 = vor.u32 %v4364_v61, %v3546_v60 }
  0x68   : > { %v3548_v0 = vld [vmem:[#allocation8 + $0xa0] sm:$0xf0]  ;;  %v4365_v2 = vld [vmem:[#allocation8 + $0xa4] sm:$0xf0]  ;;  %v3556_v4 = vld [vmem:[#allocation8 + $0xa8] sm:$0xf0] }
  0x69   : > { %782 = vmatpush.bf16.msra.mxu0 %v3611_v45  ;;  %801 = vmatpush.bf16.msra.mxu1 %v3615_v46  ;;  %v3551_v6 = vor.u32 %v4360_v62, %v3548_v0  ;;  %v3555_v7 = vor.u32 %v4365_v2, %v3554_v1  ;;  %v3514_v8 = vld [vmem:[#allocation8 + $0x40] sm:$0xf]  ;;  %v4352_v10 = vld [vmem:[#allocation8 + $0x44] sm:$0xf]  ;;  %v3559_v11 = vor.u32 %v4361_v3, %v3556_v4  ;;  %v3522_v13 = vld [vmem:[#allocation8 + $0x48] sm:$0xf] }
  0x6a   : > { %820 = vmatpush.bf16.msra.mxu2 %v3619_v47  ;;  %v4356_v9 = vld [vmem:[#allocation8 + $0x5c] sm:$0xf0]  ;;  %v3516_v12 = vld [vmem:[#allocation8 + $0x60] sm:$0xf0]  ;;  %v4357_v14 = vld [vmem:[#allocation8 + $0x64] sm:$0xf0] }
  0x6b   : > { %839 = vmatpush.bf16.msra.mxu3 %v3623_v51  ;;  %v4353_v15 = vld [vmem:[#allocation8 + $0x4c] sm:$0xf]  ;;  %v3515_v17 = vor.u32 %v4356_v9, %v3514_v8  ;;  %v3482_v18 = vld [vmem:[#allocation8] sm:$0xf]  ;;  %v3519_v20 = vor.u32 %v4352_v10, %v3516_v12  ;;  %v3523_v21 = vor.u32 %v4357_v14, %v3522_v13  ;;  %v4344_v22 = vld [vmem:[#allocation8 + $0x4] sm:$0xf] }
  0x6c   : > { %v3524_v16 = vld [vmem:[#allocation8 + $0x68] sm:$0xf0]  ;;  %v4348_v19 = vld [vmem:[#allocation8 + $0x1c] sm:$0xf0]  ;;  %v3484_v23 = vld [vmem:[#allocation8 + $0x20] sm:$0xf0] }
  0x6d   : > { %783 = vmatpush.bf16.msra.mxu0 %v3579_v57  ;;  %802 = vmatpush.bf16.msra.mxu1 %v3583_v58  ;;  %v3490_v24 = vld [vmem:[#allocation8 + $0x8] sm:$0xf]  ;;  %v3527_v25 = vor.u32 %v4353_v15, %v3524_v16  ;;  %v4345_v27 = vld [vmem:[#allocation8 + $0xc] sm:$0xf]  ;;  %v3722_v29 = vld [vmem:[#allocation8 + $0x1d0] sm:$0xf]  ;;  %v3483_v32 = vor.u32 %v4348_v19, %v3482_v18  ;;  %v3487_v36 = vor.u32 %v4344_v22, %v3484_v23 }
  0x6e   : > { %821 = vmatpush.bf16.msra.mxu2 %v3587_v59  ;;  %v4349_v26 = vld [vmem:[#allocation8 + $0x24] sm:$0xf0]  ;;  %v3492_v28 = vld [vmem:[#allocation8 + $0x28] sm:$0xf0]  ;;  %v4406_v30 = vld [vmem:[#allocation8 + $0x1ec] sm:$0xf0] }
  0x6f   : > { %840 = vmatpush.bf16.msra.mxu3 %v3591_v63  ;;  %v4402_v31 = vld [vmem:[#allocation8 + $0x1d4] sm:$0xf]  ;;  %v3730_v34 = vld [vmem:[#allocation8 + $0x1d8] sm:$0xf]  ;;  %v3491_v37 = vor.u32 %v4349_v26, %v3490_v24  ;;  %v4403_v38 = vld [vmem:[#allocation8 + $0x1dc] sm:$0xf]  ;;  %v3495_v40 = vor.u32 %v4345_v27, %v3492_v28  ;;  %v3723_v41 = vor.u32 %v4406_v30, %v3722_v29 }
  0x70   : > { %v3724_v33 = vld [vmem:[#allocation8 + $0x1f0] sm:$0xf0]  ;;  %v4407_v35 = vld [vmem:[#allocation8 + $0x1f4] sm:$0xf0]  ;;  %v3732_v39 = vld [vmem:[#allocation8 + $0x1f8] sm:$0xf0] }
  0x71   : > { %784 = vmatpush.bf16.msra.mxu0 %v3547_v5  ;;  %803 = vmatpush.bf16.msra.mxu1 %v3551_v6  ;;  %v5340_v42 = vld [vmem:[%s302_s28] sm:$0xff]  ;;  %v3727_v43 = vor.u32 %v4402_v31, %v3724_v33  ;;  %v3731_v44 = vor.u32 %v4407_v35, %v3730_v34  ;;  %v3735_v48 = vor.u32 %v4403_v38, %v3732_v39  ;;  %v3698_v50 = vld [vmem:[#allocation8 + $0x198] sm:$0xf]  ;;  %v4395_v52 = vld [vmem:[#allocation8 + $0x19c] sm:$0xf]  ;;  %p4272_p1 = scmp.ne.s32.totalorder %s5094_s27, 1 }
  0x72   : > { %822 = vmatpush.bf16.msra.mxu2 %v3555_v7  ;;  %v3690_v45 = vld [vmem:[#allocation8 + $0x190] sm:$0xf]  ;;  %v4394_v47 = vld [vmem:[#allocation8 + $0x194] sm:$0xf]  ;;  %v4399_v51 = vld [vmem:[#allocation8 + $0x1b4] sm:$0xf0] }
  0x73   : > { %841 = vmatpush.bf16.msra.mxu3 %v3559_v11  ;;  %v4398_v46 = vld [vmem:[#allocation8 + $0x1ac] sm:$0xf0]  ;;  %v3692_v49 = vld [vmem:[#allocation8 + $0x1b0] sm:$0xf0]  ;;  %v3700_v53 = vld [vmem:[#allocation8 + $0x1b8] sm:$0xf0]  ;;  %v3699_v56 = vor.u32 %v4399_v51, %v3698_v50 }
  0x74   : > { %v3691_v54 = vor.u32 %v4398_v46, %v3690_v45  ;;  %v3695_v55 = vor.u32 %v4394_v47, %v3692_v49  ;;  %v3658_v57 = vld [vmem:[#allocation8 + $0x150] sm:$0xf]  ;;  %v4386_v59 = vld [vmem:[#allocation8 + $0x154] sm:$0xf]  ;;  %v3703_v60 = vor.u32 %v4395_v52, %v3700_v53  ;;  %v3666_v62 = vld [vmem:[#allocation8 + $0x158] sm:$0xf] }
  0x75   : > { %785 = vmatpush.bf16.msra.mxu0 %v3515_v17  ;;  %804 = vmatpush.bf16.msra.mxu1 %v3519_v20  ;;  %v4390_v58 = vld [vmem:[#allocation8 + $0x16c] sm:$0xf0]  ;;  %v3660_v61 = vld [vmem:[#allocation8 + $0x170] sm:$0xf0]  ;;  %v4391_v63 = vld [vmem:[#allocation8 + $0x174] sm:$0xf0] }
  0x76   : > { %823 = vmatpush.bf16.msra.mxu2 %v3523_v21  ;;  %v4387_v0 = vld [vmem:[#allocation8 + $0x15c] sm:$0xf]  ;;  %v3659_v2 = vor.u32 %v4390_v58, %v3658_v57  ;;  %v3663_v3 = vor.u32 %v4386_v59, %v3660_v61  ;;  %v3667_v4 = vor.u32 %v4391_v63, %v3666_v62  ;;  %v3626_v5 = vld [vmem:[#allocation8 + $0x110] sm:$0xf]  ;;  %v4378_v7 = vld [vmem:[#allocation8 + $0x114] sm:$0xf] }
  0x77   : > { %842 = vmatpush.bf16.msra.mxu3 %v3527_v25  ;;  %v3668_v1 = vld [vmem:[#allocation8 + $0x178] sm:$0xf0]  ;;  %v4382_v6 = vld [vmem:[#allocation8 + $0x12c] sm:$0xf0]  ;;  %v3628_v9 = vld [vmem:[#allocation8 + $0x130] sm:$0xf0] }
  0x78   : > { %v3671_v8 = vor.u32 %v4387_v0, %v3668_v1  ;;  %v3634_v10 = vld [vmem:[#allocation8 + $0x118] sm:$0xf]  ;;  %v4379_v12 = vld [vmem:[#allocation8 + $0x11c] sm:$0xf]  ;;  %v3627_v14 = vor.u32 %v4382_v6, %v3626_v5  ;;  %v3631_v15 = vor.u32 %v4378_v7, %v3628_v9  ;;  %v3594_v17 = vld [vmem:[#allocation8 + $0xd0] sm:$0xf] }
  0x79   : > { %786 = vmatpush.bf16.msra.mxu0 %v3483_v32  ;;  %805 = vmatpush.bf16.msra.mxu1 %v3487_v36  ;;  %v4383_v11 = vld [vmem:[#allocation8 + $0x134] sm:$0xf0]  ;;  %v3636_v13 = vld [vmem:[#allocation8 + $0x138] sm:$0xf0]  ;;  %v4374_v18 = vld [vmem:[#allocation8 + $0xec] sm:$0xf0] }
  0x7a   : > { %824 = vmatpush.bf16.msra.mxu2 %v3491_v37  ;;  %v3635_v16 = vor.u32 %v4383_v11, %v3634_v10  ;;  %v4370_v19 = vld [vmem:[#allocation8 + $0xd4] sm:$0xf]  ;;  %v3639_v20 = vor.u32 %v4379_v12, %v3636_v13  ;;  %v3602_v22 = vld [vmem:[#allocation8 + $0xd8] sm:$0xf]  ;;  %v4371_v24 = vld [vmem:[#allocation8 + $0xdc] sm:$0xf]  ;;  %v3595_v26 = vor.u32 %v4374_v18, %v3594_v17 }
  0x7b   : > { %843 = vmatpush.bf16.msra.mxu3 %v3495_v40  ;;  %v3596_v21 = vld [vmem:[#allocation8 + $0xf0] sm:$0xf0]  ;;  %v4375_v23 = vld [vmem:[#allocation8 + $0xf4] sm:$0xf0]  ;;  %v3604_v25 = vld [vmem:[#allocation8 + $0xf8] sm:$0xf0] }
  0x7c   : > { %787 = vmatmul.bf16.vlgmr.msra.gmra.mxu0 %v5340_v42  ;;  %806 = vmatmul.bf16.vlgmr.msra.gmra.mxu1 %v5340_v42  ;;  %v5348_v27 = vld [vmem:[%s302_s28 + $0x8] sm:$0xff]  ;;  %v3599_v28 = vor.u32 %v4370_v19, %v3596_v21  ;;  %v3603_v29 = vor.u32 %v4375_v23, %v3602_v22  ;;  %v3562_v30 = vld [vmem:[#allocation8 + $0x90] sm:$0xf]  ;;  %v4362_v32 = vld [vmem:[#allocation8 + $0x94] sm:$0xf]  ;;  %v3607_v33 = vor.u32 %v4371_v24, %v3604_v25  ;;  %s7402_s13 = sld [smem:[#allocation189_spill]] (!%p4272_p1) }
  0x7d   : > { %855 = vmatpush.bf16.msrb.mxu0 %v3723_v41  ;;  %874 = vmatpush.bf16.msrb.mxu1 %v3727_v43  ;;  %v4366_v31 = vld [vmem:[#allocation8 + $0xac] sm:$0xf0]  ;;  %v3564_v34 = vld [vmem:[#allocation8 + $0xb0] sm:$0xf0]  ;;  %v3570_v35 = vld [vmem:[#allocation8 + $0x98] sm:$0xf] }
  0x7e   : > { %893 = vmatpush.bf16.msrb.mxu2 %v3731_v44  ;;  %844 = vmatmul.bf16.vlgmr.msra.gmra.mxu3 %v5340_v42  ;;  %v4367_v36 = vld [vmem:[#allocation8 + $0xb4] sm:$0xf0]  ;;  %v4363_v37 = vld [vmem:[#allocation8 + $0x9c] sm:$0xf]  ;;  %v3563_v39 = vor.u32 %v4366_v31, %v3562_v30  ;;  %v3567_v40 = vor.u32 %v4362_v32, %v3564_v34  ;;  %v3530_v43 = vld [vmem:[#allocation8 + $0x50] sm:$0xf] }
  0x7f   : > { %912 = vmatpush.bf16.msrb.mxu3 %v3735_v48  ;;  %825 = vmatmul.bf16.vlgmr.msra.gmra.mxu2 %v5340_v42  ;;  %v3572_v38 = vld [vmem:[#allocation8 + $0xb8] sm:$0xf0]  ;;  %v3571_v41 = vor.u32 %v4367_v36, %v3570_v35  ;;  %v4358_v44 = vld [vmem:[#allocation8 + $0x6c] sm:$0xf0]  ;;  %v4354_v45 = vld [vmem:[#allocation8 + $0x54] sm:$0xf] }
  0x80   : > { %v3575_v46 = vor.u32 %v4363_v37, %v3572_v38  ;;  %v3532_v47 = vld [vmem:[#allocation8 + $0x70] sm:$0xf0]  ;;  %v3538_v48 = vld [vmem:[#allocation8 + $0x58] sm:$0xf]  ;;  %v4355_v50 = vld [vmem:[#allocation8 + $0x5c] sm:$0xf]  ;;  %v3531_v52 = vor.u32 %v4358_v44, %v3530_v43 }
  0x81   : > { %856 = vmatpush.bf16.msrb.mxu0 %v3691_v54  ;;  %875 = vmatpush.bf16.msrb.mxu1 %v3695_v55  ;;  %v4359_v49 = vld [vmem:[#allocation8 + $0x74] sm:$0xf0]  ;;  %v3540_v51 = vld [vmem:[#allocation8 + $0x78] sm:$0xf0]  ;;  %v3498_v53 = vld [vmem:[#allocation8 + $0x10] sm:$0xf]  ;;  %v3535_v55 = vor.u32 %v4354_v45, %v3532_v47 }
  0x82   : > { %894 = vmatpush.bf16.msrb.mxu2 %v3699_v56  ;;  %v4350_v54 = vld [vmem:[#allocation8 + $0x2c] sm:$0xf0]  ;;  %v3539_v56 = vor.u32 %v4359_v49, %v3538_v48  ;;  %v4346_v57 = vld [vmem:[#allocation8 + $0x14] sm:$0xf]  ;;  %v3506_v59 = vld [vmem:[#allocation8 + $0x18] sm:$0xf] }
  0x83   : > { %913 = vmatpush.bf16.msrb.mxu3 %v3703_v60  ;;  %v3500_v58 = vld [vmem:[#allocation8 + $0x30] sm:$0xf0]  ;;  %v3543_v60 = vor.u32 %v4355_v50, %v3540_v51  ;;  %v4351_v61 = vld [vmem:[#allocation8 + $0x34] sm:$0xf0]  ;;  %v4347_v62 = vld [vmem:[#allocation8 + $0x1c] sm:$0xf] }
  0x84   : > { %v3508_v63 = vld [vmem:[#allocation8 + $0x38] sm:$0xf0]  ;;  %v3962_v0 = vld [vmem:[#allocation10 + $0x1c0] sm:$0xf]  ;;  %v4464_v5 = vld [vmem:[#allocation10 + $0x1c4] sm:$0xf]  ;;  %v3503_v7 = vor.u32 %v4346_v57, %v3500_v58 }
  0x85   : > { %857 = vmatpush.bf16.msrb.mxu0 %v3659_v2  ;;  %876 = vmatpush.bf16.msrb.mxu1 %v3663_v3  ;;  %v4468_v1 = vld [vmem:[#allocation10 + $0x1dc] sm:$0xf0]  ;;  %v3499_v3 = vor.u32 %v4350_v54, %v3498_v53  ;;  %v3964_v6 = vld [vmem:[#allocation10 + $0x1e0] sm:$0xf0]  ;;  %v3511_v11 = vor.u32 %v4347_v62, %v3508_v63 }
  0x86   : > { %895 = vmatpush.bf16.msrb.mxu2 %v3667_v4  ;;  %v4218_v2 = vld [vmem:[#allocation10 + $0x3c0] sm:$0xf]  ;;  %v4528_v9 = vld [vmem:[#allocation10 + $0x3c4] sm:$0xf]  ;;  %v5354_v12 = vor.u32 %v4468_v1, %v3962_v0 }
  0x87   : > { %914 = vmatpush.bf16.msrb.mxu3 %v3671_v8  ;;  %v4532_v4 = vld [vmem:[#allocation10 + $0x3dc] sm:$0xf0]  ;;  %v3507_v8 = vor.u32 %v4351_v61, %v3506_v59  ;;  %v4220_v10 = vld [vmem:[#allocation10 + $0x3e0] sm:$0xf0] }
  0x88   : > { %v5356_v13 = vor.u32 %v4532_v4, %v4218_v2  ;;  %v4186_v17 = vld [vmem:[#allocation10 + $0x380] sm:$0xf]  ;;  %v5360_v18 = vor.u32 %v4528_v9, %v4220_v10  ;;  %v3932_v21 = vld [vmem:[#allocation10 + $0x1a0] sm:$0xf0] }
  0x89   : > { %858 = vmatpush.bf16.msrb.mxu0 %v3627_v14  ;;  %877 = vmatpush.bf16.msrb.mxu1 %v3631_v15  ;;  %v5358_v14 = vor.u32 %v4464_v5, %v3964_v6  ;;  %v3930_v15 = vld [vmem:[#allocation10 + $0x180] sm:$0xf]  ;;  %v4520_v22 = vld [vmem:[#allocation10 + $0x384] sm:$0xf] }
  0x8a   : > { %896 = vmatpush.bf16.msrb.mxu2 %v3635_v16  ;;  %6933 = vst [vmem:[#allocation25_spill] sm:$0xff] %v5356_v13  ;;  %v4460_v16 = vld [vmem:[#allocation10 + $0x19c] sm:$0xf0]  ;;  %v4188_v23 = vld [vmem:[#allocation10 + $0x3a0] sm:$0xf0] }
  0x8b   : > { %915 = vmatpush.bf16.msrb.mxu3 %v3639_v20  ;;  %6934 = vst [vmem:[#allocation26_spill] sm:$0xff] %v5360_v18  ;;  %v4524_v19 = vld [vmem:[#allocation10 + $0x39c] sm:$0xf0]  ;;  %v4456_v20 = vld [vmem:[#allocation10 + $0x184] sm:$0xf]  ;;  %v5363_v24 = vor.u32 %v4460_v16, %v3930_v15  ;;  %v5372_v31 = vor.u32 %v4520_v22, %v4188_v23 }
  0x8c   : > { %792 = vmatmul.bf16.gmra.mxu0 %v5348_v27  ;;  %811 = vmatmul.bf16.gmra.mxu1 %v5348_v27  ;;  %v5367_v25 = vor.u32 %v4524_v19, %v4186_v17  ;;  %v4154_v30 = vld [vmem:[#allocation10 + $0x340] sm:$0xf]  ;;  %v3900_v34 = vld [vmem:[#allocation10 + $0x160] sm:$0xf0] }
  0x8d   : > { %859 = vmatpush.bf16.msrb.mxu0 %v3595_v26  ;;  %878 = vmatpush.bf16.msrb.mxu1 %v3599_v28  ;;  %6935 = vst [vmem:[#allocation27_spill] sm:$0xff] %v5363_v24  ;;  %v5369_v26 = vor.u32 %v4456_v20, %v3932_v21  ;;  %v3898_v28 = vld [vmem:[#allocation10 + $0x140] sm:$0xf]  ;;  %v4512_v35 = vld [vmem:[#allocation10 + $0x344] sm:$0xf] }
  0x8e   : > { %897 = vmatpush.bf16.msrb.mxu2 %v3603_v29  ;;  %849 = vmatmul.bf16.gmra.mxu3 %v5348_v27  ;;  %6936 = vst [vmem:[#allocation28_spill] sm:$0xff] %v5367_v25  ;;  %v4452_v29 = vld [vmem:[#allocation10 + $0x15c] sm:$0xf0]  ;;  %v4156_v36 = vld [vmem:[#allocation10 + $0x360] sm:$0xf0] }
  0x8f   : > { %916 = vmatpush.bf16.msrb.mxu3 %v3607_v33  ;;  %830 = vmatmul.bf16.gmra.mxu2 %v5348_v27  ;;  %6937 = vst [vmem:[#allocation29_spill] sm:$0xff] %v5369_v26  ;;  %v4516_v32 = vld [vmem:[#allocation10 + $0x35c] sm:$0xf0]  ;;  %v4448_v33 = vld [vmem:[#allocation10 + $0x144] sm:$0xf]  ;;  %v5375_v37 = vor.u32 %v4452_v29, %v3898_v28  ;;  %v5385_v44 = vor.u32 %v4512_v35, %v4156_v36 }
  0x90   : > { %6938 = vst [vmem:[#allocation30_spill] sm:$0xff] %v5372_v31  ;;  %v5379_v38 = vor.u32 %v4516_v32, %v4154_v30  ;;  %v4122_v43 = vld [vmem:[#allocation10 + $0x300] sm:$0xf]  ;;  %v3868_v47 = vld [vmem:[#allocation10 + $0x120] sm:$0xf0] }
  0x91   : > { %860 = vmatpush.bf16.msrb.mxu0 %v3563_v39  ;;  %879 = vmatpush.bf16.msrb.mxu1 %v3567_v40  ;;  %6939 = vst [vmem:[#allocation31_spill] sm:$0xff] %v5375_v37  ;;  %v5381_v39 = vor.u32 %v4448_v33, %v3900_v34  ;;  %v3866_v40 = vld [vmem:[#allocation10 + $0x100] sm:$0xf]  ;;  %v4504_v48 = vld [vmem:[#allocation10 + $0x304] sm:$0xf] }
  0x92   : > { %898 = vmatpush.bf16.msrb.mxu2 %v3571_v41  ;;  %6940 = vst [vmem:[#allocation32_spill] sm:$0xff] %v5379_v38  ;;  %v4444_v41 = vld [vmem:[#allocation10 + $0x11c] sm:$0xf0]  ;;  %v4124_v49 = vld [vmem:[#allocation10 + $0x320] sm:$0xf0] }
  0x93   : > { %917 = vmatpush.bf16.msrb.mxu3 %v3575_v46  ;;  %6941 = vst [vmem:[#allocation33_spill] sm:$0xff] %v5381_v39  ;;  %v4508_v45 = vld [vmem:[#allocation10 + $0x31c] sm:$0xf0]  ;;  %v4440_v46 = vld [vmem:[#allocation10 + $0x104] sm:$0xf]  ;;  %v5391_v50 = vor.u32 %v4444_v41, %v3866_v40 }
  0x94   : > { %6942 = vst [vmem:[#allocation34_spill] sm:$0xff] %v5385_v44  ;;  %v5395_v51 = vor.u32 %v4508_v45, %v4122_v43  ;;  %v3834_v53 = vld [vmem:[#allocation10 + $0xc0] sm:$0xf]  ;;  %v4432_v57 = vld [vmem:[#allocation10 + $0xc4] sm:$0xf] }
  0x95   : > { %861 = vmatpush.bf16.msrb.mxu0 %v3531_v52  ;;  %880 = vmatpush.bf16.msrb.mxu1 %v3535_v55  ;;  %6943 = vst [vmem:[#allocation35_spill] sm:$0xff] %v5391_v50  ;;  %v5397_v52 = vor.u32 %v4440_v46, %v3868_v47  ;;  %v4436_v54 = vld [vmem:[#allocation10 + $0xdc] sm:$0xf0]  ;;  %v3836_v58 = vld [vmem:[#allocation10 + $0xe0] sm:$0xf0] }
  0x96   : > { %899 = vmatpush.bf16.msrb.mxu2 %v3539_v56  ;;  %6944 = vst [vmem:[#allocation36_spill] sm:$0xff] %v5395_v51  ;;  %v4090_v55 = vld [vmem:[#allocation10 + $0x2c0] sm:$0xf]  ;;  %v5400_v56 = vor.u32 %v4504_v48, %v4124_v49  ;;  %v4496_v59 = vld [vmem:[#allocation10 + $0x2c4] sm:$0xf]  ;;  %v5403_v61 = vor.u32 %v4436_v54, %v3834_v53  ;;  %v5409_v63 = vor.u32 %v4432_v57, %v3836_v58 }
  0x97   : > { %918 = vmatpush.bf16.msrb.mxu3 %v3543_v60  ;;  %6945 = vst [vmem:[#allocation37_spill] sm:$0xff] %v5397_v52  ;;  %v4092_v60 = vld [vmem:[#allocation10 + $0x2e0] sm:$0xf0]  ;;  %v3802_v0 = vld [vmem:[#allocation10 + $0x80] sm:$0xf] }
  0x98   : > { %6946 = vst [vmem:[#allocation38_spill] sm:$0xff] %v5400_v56  ;;  %v4428_v1 = vld [vmem:[#allocation10 + $0x9c] sm:$0xf0]  ;;  %v4424_v5 = vld [vmem:[#allocation10 + $0x84] sm:$0xf] }
  0x99   : > { %862 = vmatpush.bf16.msrb.mxu0 %v3499_v3  ;;  %881 = vmatpush.bf16.msrb.mxu1 %v3503_v7  ;;  %6947 = vst [vmem:[#allocation39_spill] sm:$0xff] %v5403_v61  ;;  %v4058_v2 = vld [vmem:[#allocation10 + $0x280] sm:$0xf]  ;;  %v5412_v3 = vor.u32 %v4496_v59, %v4092_v60  ;;  %v3804_v6 = vld [vmem:[#allocation10 + $0xa0] sm:$0xf0]  ;;  %v5415_v9 = vor.u32 %v4428_v1, %v3802_v0 }
  0x9a   : > { %900 = vmatpush.bf16.msrb.mxu2 %v3507_v8  ;;  %6949 = vst [vmem:[#allocation41_spill] sm:$0xff] %v5409_v63  ;;  %v4492_v4 = vld [vmem:[#allocation10 + $0x29c] sm:$0xf0]  ;;  %v4488_v7 = vld [vmem:[#allocation10 + $0x284] sm:$0xf] }
  0x9b   : > { %919 = vmatpush.bf16.msrb.mxu3 %v3511_v11  ;;  %6950 = vst [vmem:[#allocation42_spill] sm:$0xff] %v5412_v3  ;;  %v4060_v8 = vld [vmem:[#allocation10 + $0x2a0] sm:$0xf0]  ;;  %v5419_v10 = vor.u32 %v4492_v4, %v4058_v2  ;;  %v5421_v11 = vor.u32 %v4424_v5, %v3804_v6  ;;  %v3770_v15 = vld [vmem:[#allocation10 + $0x40] sm:$0xf] }
  0x9c   : > { %863 = vmatmul.bf16.vlgmr.msrb.gmra.mxu0 %v5340_v42  ;;  %882 = vmatmul.bf16.vlgmr.msrb.gmra.mxu1 %v5340_v42  ;;  %6951 = vst [vmem:[#allocation43_spill] sm:$0xff] %v5415_v9  ;;  %v4420_v16 = vld [vmem:[#allocation10 + $0x5c] sm:$0xf0]  ;;  %v5424_v19 = vor.u32 %v4488_v7, %v4060_v8  ;;  %v4416_v21 = vld [vmem:[#allocation10 + $0x44] sm:$0xf] }
  0x9d   : > { %1745 = vmatpush.bf16.msra.mxu0 %v5354_v12  ;;  %1758 = vmatpush.bf16.msra.mxu1 %v5356_v13  ;;  %6952 = vst [vmem:[#allocation44_spill] sm:$0xff] %v5419_v10  ;;  %v4026_v17 = vld [vmem:[#allocation10 + $0x240] sm:$0xf]  ;;  %v3772_v22 = vld [vmem:[#allocation10 + $0x60] sm:$0xf0]  ;;  %v5427_v29 = vor.u32 %v4420_v16, %v3770_v15 }
  0x9e   : > { %1771 = vmatpush.bf16.msra.mxu2 %v5358_v14  ;;  %920 = vmatmul.bf16.vlgmr.msrb.gmra.mxu3 %v5340_v42  ;;  %6953 = vst [vmem:[#allocation45_spill] sm:$0xff] %v5421_v11  ;;  %v4484_v20 = vld [vmem:[#allocation10 + $0x25c] sm:$0xf0]  ;;  %v4480_v23 = vld [vmem:[#allocation10 + $0x244] sm:$0xf]  ;;  %v5433_v34 = vor.u32 %v4416_v21, %v3772_v22 }
  0x9f   : > { %1784 = vmatpush.bf16.msra.mxu3 %v5360_v18  ;;  %901 = vmatmul.bf16.vlgmr.msrb.gmra.mxu2 %v5340_v42  ;;  %v4500_v42 = vld [vmem:[#allocation10 + $0x2dc] sm:$0xf0]  ;;  %6954 = vst [vmem:[#allocation46_spill] sm:$0xff] %v5424_v19  ;;  %v4028_v28 = vld [vmem:[#allocation10 + $0x260] sm:$0xf0]  ;;  %v5431_v33 = vor.u32 %v4484_v20, %v4026_v17 }
  0xa0   : > { %v5407_v62 = vor.u32 %v4500_v42, %v4090_v55  ;;  %6955 = vst [vmem:[#allocation47_spill] sm:$0xff] %v5427_v29  ;;  %v3738_v30 = vld [vmem:[#allocation10] sm:$0xf]  ;;  %v4408_v40 = vld [vmem:[#allocation10 + $0x4] sm:$0xf]  ;;  %v5437_v41 = vor.u32 %v4480_v23, %v4028_v28 }
  0xa1   : > { %1746 = vmatpush.bf16.msra.mxu0 %v5363_v24  ;;  %1759 = vmatpush.bf16.msra.mxu1 %v5367_v25  ;;  %v4412_v32 = vld [vmem:[#allocation10 + $0x1c] sm:$0xf0]  ;;  %6956 = vst [vmem:[#allocation48_spill] sm:$0xff] %v5431_v33  ;;  %v3740_v43 = vld [vmem:[#allocation10 + $0x20] sm:$0xf0] }
  0xa2   : > { %1772 = vmatpush.bf16.msra.mxu2 %v5369_v26  ;;  %6948 = vst [vmem:[#allocation40_spill] sm:$0xff] %v5407_v62  ;;  %v3994_v35 = vld [vmem:[#allocation10 + $0x200] sm:$0xf]  ;;  %v4472_v45 = vld [vmem:[#allocation10 + $0x204] sm:$0xf]  ;;  %v5443_v53 = vor.u32 %v4412_v32, %v3738_v30  ;;  %v5449_v58 = vor.u32 %v4408_v40, %v3740_v43  ;;  %v1092_v32 = vld [vmem:[#allocation3 + $0x8] sm:$0xff] }
  0xa3   : > { %1785 = vmatpush.bf16.msra.mxu3 %v5372_v31  ;;  %6957 = vst [vmem:[#allocation49_spill] sm:$0xff] %v5433_v34  ;;  %v4476_v36 = vld [vmem:[#allocation10 + $0x21c] sm:$0xf0]  ;;  %v3996_v46 = vld [vmem:[#allocation10 + $0x220] sm:$0xf0] }
  0xa4   : > { %6958 = vst [vmem:[#allocation50_spill] sm:$0xff] %v5437_v41  ;;  %v3970_v47 = vld [vmem:[#allocation10 + $0x1c8] sm:$0xf]  ;;  %v4465_v55 = vld [vmem:[#allocation10 + $0x1cc] sm:$0xf]  ;;  %v5447_v57 = vor.u32 %v4476_v36, %v3994_v35  ;;  %v1091_v28 = vld [vmem:[#allocation3] sm:$0xff] }
  0xa5   : > { %1747 = vmatpush.bf16.msra.mxu0 %v5375_v37  ;;  %1760 = vmatpush.bf16.msra.mxu1 %v5379_v38  ;;  %v4469_v48 = vld [vmem:[#allocation10 + $0x1e4] sm:$0xf0]  ;;  %6959 = vst [vmem:[#allocation51_spill] sm:$0xff] %v5443_v53  ;;  %v3972_v42 = vld [vmem:[#allocation10 + $0x1e8] sm:$0xf0]  ;;  %v5479_v43 = vpack.c.bf16 %v1091_v28, %v1091_v28 }
  0xa6   : > { %1773 = vmatpush.bf16.msra.mxu2 %v5381_v39  ;;  %v4226_v49 = vld [vmem:[#allocation10 + $0x3c8] sm:$0xf]  ;;  %6960 = vst [vmem:[#allocation52_spill] sm:$0xff] %v5447_v57  ;;  %v4529_v59 = vld [vmem:[#allocation10 + $0x3cc] sm:$0xf]  ;;  %v5454_v0 = vor.u32 %v4469_v48, %v3970_v47  ;;  %v5458_v2 = vor.u32 %v4465_v55, %v3972_v42  ;;  %v5483_v48 = vpack.c.bf16 %v1092_v32, %v1092_v32 }
  0xa7   : > { %1786 = vmatpush.bf16.msra.mxu3 %v5385_v44  ;;  %v4533_v54 = vld [vmem:[#allocation10 + $0x3e4] sm:$0xf0]  ;;  %6961 = vst [vmem:[#allocation53_spill] sm:$0xff] %v5449_v58  ;;  %v4228_v60 = vld [vmem:[#allocation10 + $0x3e8] sm:$0xf0] }
  0xa8   : > { %6963 = vst [vmem:[#allocation55_spill] sm:$0xff] %v5454_v0  ;;  %v5456_v1 = vor.u32 %v4533_v54, %v4226_v49  ;;  %v3938_v4 = vld [vmem:[#allocation10 + $0x188] sm:$0xf]  ;;  %v5461_v7 = vor.u32 %v4529_v59, %v4228_v60  ;;  %v4457_v15 = vld [vmem:[#allocation10 + $0x18c] sm:$0xf] }
  0xa9   : > { %1748 = vmatpush.bf16.msra.mxu0 %v5391_v50  ;;  %1761 = vmatpush.bf16.msra.mxu1 %v5395_v51  ;;  %6965 = vst [vmem:[#allocation57_spill] sm:$0xff] %v5458_v2  ;;  %v4461_v5 = vld [vmem:[#allocation10 + $0x1a4] sm:$0xf0]  ;;  %v3940_v16 = vld [vmem:[#allocation10 + $0x1a8] sm:$0xf0] }
  0xaa   : > { %1774 = vmatpush.bf16.msra.mxu2 %v5397_v52  ;;  %6964 = vst [vmem:[#allocation56_spill] sm:$0xff] %v5456_v1  ;;  %v4194_v6 = vld [vmem:[#allocation10 + $0x388] sm:$0xf]  ;;  %v4521_v17 = vld [vmem:[#allocation10 + $0x38c] sm:$0xf]  ;;  %v5467_v21 = vor.u32 %v4461_v5, %v3938_v4  ;;  %v5473_v23 = vor.u32 %v4457_v15, %v3940_v16 }
  0xab   : > { %1787 = vmatpush.bf16.msra.mxu3 %v5400_v56  ;;  %6966 = vst [vmem:[#allocation58_spill] sm:$0xff] %v5461_v7  ;;  %v4525_v8 = vld [vmem:[#allocation10 + $0x3a4] sm:$0xf0]  ;;  %v4196_v20 = vld [vmem:[#allocation10 + $0x3a8] sm:$0xf0] }
  0xac   : > { %868 = vmatmul.bf16.gmra.mxu0 %v5348_v27  ;;  %887 = vmatmul.bf16.gmra.mxu1 %v5348_v27  ;;  %6967 = vst [vmem:[#allocation59_spill] sm:$0xff] %v5467_v21  ;;  %v5471_v22 = vor.u32 %v4525_v8, %v4194_v6  ;;  %v5476_v30 = vor.u32 %v4521_v17, %v4196_v20  ;;  %v3906_v35 = vld [vmem:[#allocation10 + $0x148] sm:$0xf]  ;;  %v3908_v47 = vld [vmem:[#allocation10 + $0x168] sm:$0xf0] }
  0xad   : > { %1749 = vmatpush.bf16.msra.mxu0 %v5403_v61  ;;  %1762 = vmatpush.bf16.msra.mxu1 %v5407_v62  ;;  %6969 = vst [vmem:[#allocation61_spill] sm:$0xff] %v5473_v23  ;;  %v4453_v36 = vld [vmem:[#allocation10 + $0x164] sm:$0xf0]  ;;  %v4513_v49 = vld [vmem:[#allocation10 + $0x34c] sm:$0xf] }
  0xae   : > { %1775 = vmatpush.bf16.msra.mxu2 %v5409_v63  ;;  %925 = vmatmul.bf16.gmra.mxu3 %v5348_v27  ;;  %6968 = vst [vmem:[#allocation60_spill] sm:$0xff] %v5471_v22  ;;  %v4162_v40 = vld [vmem:[#allocation10 + $0x348] sm:$0xf]  ;;  %v4164_v54 = vld [vmem:[#allocation10 + $0x368] sm:$0xf0]  ;;  %v5486_v55 = vor.u32 %v4453_v36, %v3906_v35 }
  0xaf   : > { %1788 = vmatpush.bf16.msra.mxu3 %v5412_v3  ;;  %906 = vmatmul.bf16.gmra.mxu2 %v5348_v27  ;;  %v5452_v27 = vor.u32 %v4472_v45, %v3996_v46  ;;  %6970 = vst [vmem:[#allocation62_spill] sm:$0xff] %v5476_v30  ;;  %v4517_v45 = vld [vmem:[#allocation10 + $0x364] sm:$0xf0]  ;;  %v4449_v46 = vld [vmem:[#allocation10 + $0x14c] sm:$0xf]  ;;  %v5493_v6 = vor.u32 %v4513_v49, %v4164_v54 }
  0xb0   : > { %6971 = vst [vmem:[#allocation63_spill] sm:$0xff] %v5486_v55  ;;  %v5488_v42 = vor.u32 %v4517_v45, %v4162_v40  ;;  %v5490_v59 = vor.u32 %v4449_v46, %v3908_v47  ;;  %v3874_v60 = vld [vmem:[#allocation10 + $0x108] sm:$0xf]  ;;  %v4441_v15 = vld [vmem:[#allocation10 + $0x10c] sm:$0xf] }
  0xb1   : > { %1750 = vmatpush.bf16.msra.mxu0 %v5415_v9  ;;  %1763 = vmatpush.bf16.msra.mxu1 %v5419_v10  ;;  %6962 = vst [vmem:[#allocation54_spill] sm:$0xff] %v5452_v27  ;;  %v4445_v4 = vld [vmem:[#allocation10 + $0x124] sm:$0xf0]  ;;  %v3876_v16 = vld [vmem:[#allocation10 + $0x128] sm:$0xf0] }
  0xb2   : > { %1776 = vmatpush.bf16.msra.mxu2 %v5421_v11  ;;  %6972 = vst [vmem:[#allocation64_spill] sm:$0xff] %v5488_v42  ;;  %v4130_v5 = vld [vmem:[#allocation10 + $0x308] sm:$0xf]  ;;  %v4505_v17 = vld [vmem:[#allocation10 + $0x30c] sm:$0xf]  ;;  %v5499_v28 = vor.u32 %v4445_v4, %v3874_v60  ;;  %v5505_v35 = vor.u32 %v4441_v15, %v3876_v16 }
  0xb3   : > { %1789 = vmatpush.bf16.msra.mxu3 %v5424_v19  ;;  %6973 = vst [vmem:[#allocation65_spill] sm:$0xff] %v5490_v59  ;;  %v4509_v8 = vld [vmem:[#allocation10 + $0x324] sm:$0xf0]  ;;  %v4132_v20 = vld [vmem:[#allocation10 + $0x328] sm:$0xf0] }
  0xb4   : > { %6974 = vst [vmem:[#allocation66_spill] sm:$0xff] %v5493_v6  ;;  %v5503_v32 = vor.u32 %v4509_v8, %v4130_v5  ;;  %v3842_v36 = vld [vmem:[#allocation10 + $0xc8] sm:$0xf]  ;;  %v5508_v46 = vor.u32 %v4505_v17, %v4132_v20  ;;  %v4433_v49 = vld [vmem:[#allocation10 + $0xcc] sm:$0xf] }
  0xb5   : > { %1751 = vmatpush.bf16.msra.mxu0 %v5427_v29  ;;  %1764 = vmatpush.bf16.msra.mxu1 %v5431_v33  ;;  %6975 = vst [vmem:[#allocation67_spill] sm:$0xff] %v5499_v28  ;;  %v4437_v40 = vld [vmem:[#allocation10 + $0xe4] sm:$0xf0]  ;;  %v3844_v54 = vld [vmem:[#allocation10 + $0xe8] sm:$0xf0] }
  0xb6   : > { %1777 = vmatpush.bf16.msra.mxu2 %v5433_v34  ;;  %6976 = vst [vmem:[#allocation68_spill] sm:$0xff] %v5503_v32  ;;  %v4098_v45 = vld [vmem:[#allocation10 + $0x2c8] sm:$0xf]  ;;  %v4497_v60 = vld [vmem:[#allocation10 + $0x2cc] sm:$0xf]  ;;  %v5517_v8 = vor.u32 %v4433_v49, %v3844_v54 }
  0xb7   : > { %1790 = vmatpush.bf16.msra.mxu3 %v5437_v41  ;;  %6977 = vst [vmem:[#allocation69_spill] sm:$0xff] %v5505_v35  ;;  %v4501_v47 = vld [vmem:[#allocation10 + $0x2e4] sm:$0xf0]  ;;  %v4100_v4 = vld [vmem:[#allocation10 + $0x2e8] sm:$0xf0] }
  0xb8   : > { %6978 = vst [vmem:[#allocation70_spill] sm:$0xff] %v5508_v46  ;;  %v5515_v5 = vor.u32 %v4501_v47, %v4098_v45  ;;  %v3810_v15 = vld [vmem:[#allocation10 + $0x88] sm:$0xf]  ;;  %v5520_v20 = vor.u32 %v4497_v60, %v4100_v4 }
  0xb9   : > { %1752 = vmatpush.bf16.msra.mxu0 %v5443_v53  ;;  %1765 = vmatpush.bf16.msra.mxu1 %v5447_v57  ;;  %6981 = vst [vmem:[#allocation73_spill] sm:$0xff] %v5517_v8  ;;  %v4429_v16 = vld [vmem:[#allocation10 + $0xa4] sm:$0xf0] }
  0xba   : > { %1778 = vmatpush.bf16.msra.mxu2 %v5449_v58  ;;  %6980 = vst [vmem:[#allocation72_spill] sm:$0xff] %v5515_v5  ;;  %v4066_v17 = vld [vmem:[#allocation10 + $0x288] sm:$0xf] }
  0xbb   : > { %1791 = vmatpush.bf16.msra.mxu3 %v5452_v27  ;;  %6982 = vst [vmem:[#allocation74_spill] sm:$0xff] %v5520_v20  ;;  %v3778_v49 = vld [vmem:[#allocation10 + $0x48] sm:$0xf] }
  0xbc   : > { %1753 = vmatmul.bf16.vlgmr.msra.gmra.mxu0 %v5479_v43  ;;  %1766 = vmatmul.bf16.vlgmr.msra.gmra.mxu1 %v5483_v48  ;;  %v4421_v54 = vld [vmem:[#allocation10 + $0x64] sm:$0xf0] }
  0xbd   : > { %1797 = vmatpush.bf16.msrb.mxu0 %v5454_v0  ;;  %1810 = vmatpush.bf16.msrb.mxu1 %v5456_v1  ;;  %v4034_v60 = vld [vmem:[#allocation10 + $0x248] sm:$0xf] }
  0xbe   : > { %1823 = vmatpush.bf16.msrb.mxu2 %v5458_v2  ;;  %1792 = vmatmul.bf16.vlgmr.msra.gmra.mxu3 %v5483_v48 }
  0xbf   : > { %1836 = vmatpush.bf16.msrb.mxu3 %v5461_v7  ;;  %1779 = vmatmul.bf16.vlgmr.msra.gmra.mxu2 %v5479_v43  ;;  %v4202_v7 = vld [vmem:[#allocation10 + $0x390] sm:$0xf] }
  0xc1   : > { %1798 = vmatpush.bf16.msrb.mxu0 %v5467_v21  ;;  %1811 = vmatpush.bf16.msrb.mxu1 %v5471_v22  ;;  %v4234_v22 = vld [vmem:[#allocation10 + $0x3d0] sm:$0xf] }
  0xc2   : > { %1824 = vmatpush.bf16.msrb.mxu2 %v5473_v23  ;;  %v3946_v23 = vld [vmem:[#allocation10 + $0x190] sm:$0xf] }
  0xc3   : > { %1837 = vmatpush.bf16.msrb.mxu3 %v5476_v30  ;;  %v3978_v30 = vld [vmem:[#allocation10 + $0x1d0] sm:$0xf] }
  0xc5   : > { %1799 = vmatpush.bf16.msrb.mxu0 %v5486_v55  ;;  %1812 = vmatpush.bf16.msrb.mxu1 %v5488_v42  ;;  %v5511_v42 = vor.u32 %v4437_v40, %v3842_v36  ;;  %v4489_v36 = vld [vmem:[#allocation10 + $0x28c] sm:$0xf]  ;;  %v4470_v55 = vld [vmem:[#allocation10 + $0x1ec] sm:$0xf0] }
  0xc6   : > { %1825 = vmatpush.bf16.msrb.mxu2 %v5490_v59  ;;  %v4425_v59 = vld [vmem:[#allocation10 + $0x8c] sm:$0xf] }
  0xc7   : > { %1838 = vmatpush.bf16.msrb.mxu3 %v5493_v6  ;;  %6979 = vst [vmem:[#allocation71_spill] sm:$0xff] %v5511_v42  ;;  %v4493_v6 = vld [vmem:[#allocation10 + $0x2a4] sm:$0xf0]  ;;  %v4068_v40 = vld [vmem:[#allocation10 + $0x2a8] sm:$0xf0] }
  0xc8   : > { %v5527_v45 = vor.u32 %v4493_v6, %v4066_v17  ;;  %v5532_v4 = vor.u32 %v4489_v36, %v4068_v40  ;;  %v3746_v6 = vld [vmem:[#allocation10 + $0x8] sm:$0xf] }
  0xc9   : > { %1800 = vmatpush.bf16.msrb.mxu0 %v5499_v28  ;;  %1813 = vmatpush.bf16.msrb.mxu1 %v5503_v32  ;;  %v3812_v28 = vld [vmem:[#allocation10 + $0xa8] sm:$0xf0]  ;;  %v5523_v32 = vor.u32 %v4429_v16, %v3810_v15  ;;  %v4413_v17 = vld [vmem:[#allocation10 + $0x24] sm:$0xf0] }
  0xca   : > { %1826 = vmatpush.bf16.msrb.mxu2 %v5505_v35  ;;  %6984 = vst [vmem:[#allocation76_spill] sm:$0xff] %v5527_v45  ;;  %v5529_v47 = vor.u32 %v4425_v59, %v3812_v28  ;;  %v4417_v35 = vld [vmem:[#allocation10 + $0x4c] sm:$0xf]  ;;  %v4002_v36 = vld [vmem:[#allocation10 + $0x208] sm:$0xf] }
  0xcb   : > { %1839 = vmatpush.bf16.msrb.mxu3 %v5508_v46  ;;  %6983 = vst [vmem:[#allocation75_spill] sm:$0xff] %v5523_v32  ;;  %v4485_v46 = vld [vmem:[#allocation10 + $0x264] sm:$0xf0]  ;;  %v4481_v15 = vld [vmem:[#allocation10 + $0x24c] sm:$0xf] }
  0xcc   : > { %6985 = vst [vmem:[#allocation77_spill] sm:$0xff] %v5529_v47  ;;  %v4036_v16 = vld [vmem:[#allocation10 + $0x268] sm:$0xf0]  ;;  %v5539_v59 = vor.u32 %v4485_v46, %v4034_v60  ;;  %v4477_v40 = vld [vmem:[#allocation10 + $0x224] sm:$0xf0] }
  0xcd   : > { %1801 = vmatpush.bf16.msrb.mxu0 %v5511_v42  ;;  %1814 = vmatpush.bf16.msrb.mxu1 %v5515_v5  ;;  %6986 = vst [vmem:[#allocation78_spill] sm:$0xff] %v5532_v4  ;;  %v3780_v42 = vld [vmem:[#allocation10 + $0x68] sm:$0xf0]  ;;  %v5535_v5 = vor.u32 %v4421_v54, %v3778_v49  ;;  %v4534_v46 = vld [vmem:[#allocation10 + $0x3ec] sm:$0xf0]  ;;  %v5551_v60 = vor.u32 %v4477_v40, %v4002_v36 }
  0xce   : > { %1827 = vmatpush.bf16.msrb.mxu2 %v5517_v8  ;;  %6988 = vst [vmem:[#allocation80_spill] sm:$0xff] %v5539_v59  ;;  %v5541_v28 = vor.u32 %v4417_v35, %v3780_v42  ;;  %v5544_v8 = vor.u32 %v4481_v15, %v4036_v16  ;;  %v4473_v49 = vld [vmem:[#allocation10 + $0x20c] sm:$0xf]  ;;  %v4466_v42 = vld [vmem:[#allocation10 + $0x1d4] sm:$0xf] }
  0xcf   : > { %1840 = vmatpush.bf16.msrb.mxu3 %v5520_v20  ;;  %6987 = vst [vmem:[#allocation79_spill] sm:$0xff] %v5535_v5  ;;  %v4409_v20 = vld [vmem:[#allocation10 + $0xc] sm:$0xf]  ;;  %v3980_v35 = vld [vmem:[#allocation10 + $0x1f0] sm:$0xf0] }
  0xd0   : > { %6989 = vst [vmem:[#allocation81_spill] sm:$0xff] %v5541_v28  ;;  %v4004_v54 = vld [vmem:[#allocation10 + $0x228] sm:$0xf0]  ;;  %v4530_v16 = vld [vmem:[#allocation10 + $0x3d4] sm:$0xf] }
  0xd1   : > { %1802 = vmatpush.bf16.msrb.mxu0 %v5523_v32  ;;  %1815 = vmatpush.bf16.msrb.mxu1 %v5527_v45  ;;  %6990 = vst [vmem:[#allocation82_spill] sm:$0xff] %v5544_v8  ;;  %v3748_v32 = vld [vmem:[#allocation10 + $0x28] sm:$0xf0]  ;;  %v5547_v45 = vor.u32 %v4413_v17, %v3746_v6  ;;  %v5560_v6 = vor.u32 %v4534_v46, %v4234_v22  ;;  %v3948_v40 = vld [vmem:[#allocation10 + $0x1b0] sm:$0xf0] }
  0xd2   : > { %1828 = vmatpush.bf16.msrb.mxu2 %v5529_v47  ;;  %6992 = vst [vmem:[#allocation84_spill] sm:$0xff] %v5551_v60  ;;  %v5553_v15 = vor.u32 %v4409_v20, %v3748_v32  ;;  %v5556_v47 = vor.u32 %v4473_v49, %v4004_v54  ;;  %v5562_v17 = vor.u32 %v4466_v42, %v3980_v35  ;;  %v4526_v32 = vld [vmem:[#allocation10 + $0x3ac] sm:$0xf0]  ;;  %v4458_v20 = vld [vmem:[#allocation10 + $0x194] sm:$0xf] }
  0xd3   : > { %1841 = vmatpush.bf16.msrb.mxu3 %v5532_v4  ;;  %6991 = vst [vmem:[#allocation83_spill] sm:$0xff] %v5547_v45  ;;  %v4236_v4 = vld [vmem:[#allocation10 + $0x3f0] sm:$0xf0]  ;;  %v5577_v49 = vor.u32 %v4458_v20, %v3948_v40  ;;  %v3914_v54 = vld [vmem:[#allocation10 + $0x150] sm:$0xf] }
  0xd4   : > { %6993 = vst [vmem:[#allocation85_spill] sm:$0xff] %v5553_v15  ;;  %v5565_v36 = vor.u32 %v4530_v16, %v4236_v4  ;;  %v5575_v4 = vor.u32 %v4526_v32, %v4202_v7  ;;  %v4454_v46 = vld [vmem:[#allocation10 + $0x16c] sm:$0xf0]  ;;  %v4514_v7 = vld [vmem:[#allocation10 + $0x354] sm:$0xf] }
  0xd5   : > { %1803 = vmatpush.bf16.msrb.mxu0 %v5535_v5  ;;  %1816 = vmatpush.bf16.msrb.mxu1 %v5539_v59  ;;  %6994 = vst [vmem:[#allocation86_spill] sm:$0xff] %v5556_v47  ;;  %v5558_v5 = vor.u32 %v4470_v55, %v3978_v30  ;;  %v4462_v59 = vld [vmem:[#allocation10 + $0x1ac] sm:$0xf0]  ;;  %v4522_v30 = vld [vmem:[#allocation10 + $0x394] sm:$0xf]  ;;  %v5587_v20 = vor.u32 %v4454_v46, %v3914_v54 }
  0xd6   : > { %1829 = vmatpush.bf16.msrb.mxu2 %v5541_v28  ;;  %6996 = vst [vmem:[#allocation88_spill] sm:$0xff] %v5560_v6  ;;  %v4204_v55 = vld [vmem:[#allocation10 + $0x3b0] sm:$0xf0]  ;;  %v5571_v22 = vor.u32 %v4462_v59, %v3946_v23  ;;  %v4170_v42 = vld [vmem:[#allocation10 + $0x350] sm:$0xf] }
  0xd7   : > { %1842 = vmatpush.bf16.msrb.mxu3 %v5544_v8  ;;  %6995 = vst [vmem:[#allocation87_spill] sm:$0xff] %v5558_v5  ;;  %v5581_v35 = vor.u32 %v4522_v30, %v4204_v55  ;;  %v4518_v16 = vld [vmem:[#allocation10 + $0x36c] sm:$0xf0]  ;;  %v4450_v23 = vld [vmem:[#allocation10 + $0x154] sm:$0xf] }
  0xd8   : > { %6997 = vst [vmem:[#allocation89_spill] sm:$0xff] %v5562_v17  ;;  %v3916_v59 = vld [vmem:[#allocation10 + $0x170] sm:$0xf0]  ;;  %v5591_v40 = vor.u32 %v4518_v16, %v4170_v42  ;;  %v3882_v55 = vld [vmem:[#allocation10 + $0x110] sm:$0xf] }
  0xd9   : > { %1804 = vmatpush.bf16.msrb.mxu0 %v5547_v45  ;;  %6998 = vst [vmem:[#allocation90_spill] sm:$0xff] %v5565_v36  ;;  %1817 = vmatpush.bf16.msrb.mxu1 %v5551_v60  ;;  %v4172_v32 = vld [vmem:[#allocation10 + $0x370] sm:$0xf0]  ;;  %v5593_v30 = vor.u32 %v4450_v23, %v3916_v59  ;;  %v3850_v23 = vld [vmem:[#allocation10 + $0xd0] sm:$0xf] }
  0xda   : > { %1830 = vmatpush.bf16.msrb.mxu2 %v5553_v15  ;;  %6999 = vst [vmem:[#allocation91_spill] sm:$0xff] %v5571_v22  ;;  %v4506_v54 = vld [vmem:[#allocation10 + $0x314] sm:$0xf]  ;;  %v4438_v59 = vld [vmem:[#allocation10 + $0xec] sm:$0xf0] }
  0xdb   : > { %1843 = vmatpush.bf16.msrb.mxu3 %v5556_v47  ;;  %7000 = vst [vmem:[#allocation92_spill] sm:$0xff] %v5575_v4  ;;  %v4442_v47 = vld [vmem:[#allocation10 + $0x114] sm:$0xf]  ;;  %v3986_v60 = vld [vmem:[#allocation10 + $0x1d8] sm:$0xf] }
  0xdc   : > { %7001 = vst [vmem:[#allocation93_spill] sm:$0xff] %v5577_v49  ;;  %1805 = vmatmul.bf16.vlgmr.msrb.gmra.mxu0 %v5479_v43  ;;  %1818 = vmatmul.bf16.vlgmr.msrb.gmra.mxu1 %v5483_v48  ;;  %v4140_v46 = vld [vmem:[#allocation10 + $0x330] sm:$0xf0]  ;;  %v4471_v15 = vld [vmem:[#allocation10 + $0x1f4] sm:$0xf0] }
  0xdd   : > { %1849 = vmatpush.bf16.msra.mxu0 %v5558_v5  ;;  %1862 = vmatpush.bf16.msra.mxu1 %v5560_v6  ;;  %7002 = vst [vmem:[#allocation94_spill] sm:$0xff] %v5581_v35  ;;  %v4138_v6 = vld [vmem:[#allocation10 + $0x310] sm:$0xf]  ;;  %v4242_v8 = vld [vmem:[#allocation10 + $0x3d8] sm:$0xf] }
  0xde   : > { %1875 = vmatpush.bf16.msra.mxu2 %v5562_v17  ;;  %1844 = vmatmul.bf16.vlgmr.msrb.gmra.mxu3 %v5483_v48  ;;  %7003 = vst [vmem:[#allocation95_spill] sm:$0xff] %v5587_v20  ;;  %v5596_v17 = vor.u32 %v4514_v7, %v4172_v32  ;;  %v4510_v5 = vld [vmem:[#allocation10 + $0x32c] sm:$0xf0]  ;;  %v5608_v32 = vor.u32 %v4506_v54, %v4140_v46  ;;  %v3954_v45 = vld [vmem:[#allocation10 + $0x198] sm:$0xf] }
  0xdf   : > { %1888 = vmatpush.bf16.msra.mxu3 %v5565_v36  ;;  %1831 = vmatmul.bf16.vlgmr.msrb.gmra.mxu2 %v5479_v43  ;;  %7004 = vst [vmem:[#allocation96_spill] sm:$0xff] %v5591_v40  ;;  %v4446_v36 = vld [vmem:[#allocation10 + $0x12c] sm:$0xf0]  ;;  %v5603_v42 = vor.u32 %v4510_v5, %v4138_v6  ;;  %v4210_v28 = vld [vmem:[#allocation10 + $0x398] sm:$0xf] }
  0xe0   : > { %7005 = vst [vmem:[#allocation97_spill] sm:$0xff] %v5593_v30  ;;  %v4106_v7 = vld [vmem:[#allocation10 + $0x2d0] sm:$0xf] }
  0xe1   : > { %1850 = vmatpush.bf16.msra.mxu0 %v5571_v22  ;;  %1863 = vmatpush.bf16.msra.mxu1 %v5575_v4  ;;  %7006 = vst [vmem:[#allocation98_spill] sm:$0xff] %v5596_v17  ;;  %v3884_v22 = vld [vmem:[#allocation10 + $0x130] sm:$0xf0]  ;;  %v5599_v4 = vor.u32 %v4446_v36, %v3882_v55  ;;  %v3818_v6 = vld [vmem:[#allocation10 + $0x90] sm:$0xf] }
  0xe2   : > { %1876 = vmatpush.bf16.msra.mxu2 %v5577_v49  ;;  %7008 = vst [vmem:[#allocation100_spill] sm:$0xff] %v5603_v42  ;;  %v5605_v16 = vor.u32 %v4442_v47, %v3884_v22  ;;  %v4434_v49 = vld [vmem:[#allocation10 + $0xd4] sm:$0xf]  ;;  %v4430_v22 = vld [vmem:[#allocation10 + $0xac] sm:$0xf0] }
  0xe3   : > { %1889 = vmatpush.bf16.msra.mxu3 %v5581_v35  ;;  %7007 = vst [vmem:[#allocation99_spill] sm:$0xff] %v5599_v4  ;;  %v4502_v35 = vld [vmem:[#allocation10 + $0x2ec] sm:$0xf0]  ;;  %v4498_v36 = vld [vmem:[#allocation10 + $0x2d4] sm:$0xf] }
  0xe4   : > { %7009 = vst [vmem:[#allocation101_spill] sm:$0xff] %v5605_v16  ;;  %v4108_v55 = vld [vmem:[#allocation10 + $0x2f0] sm:$0xf0]  ;;  %v5615_v5 = vor.u32 %v4502_v35, %v4106_v7  ;;  %v4074_v54 = vld [vmem:[#allocation10 + $0x290] sm:$0xf] }
  0xe5   : > { %1851 = vmatpush.bf16.msra.mxu0 %v5587_v20  ;;  %1864 = vmatpush.bf16.msra.mxu1 %v5591_v40  ;;  %7010 = vst [vmem:[#allocation102_spill] sm:$0xff] %v5608_v32  ;;  %v3852_v20 = vld [vmem:[#allocation10 + $0xf0] sm:$0xf0]  ;;  %v5611_v40 = vor.u32 %v4438_v59, %v3850_v23  ;;  %v5620_v46 = vor.u32 %v4498_v36, %v4108_v55  ;;  %v4422_v7 = vld [vmem:[#allocation10 + $0x6c] sm:$0xf0] }
  0xe6   : > { %1877 = vmatpush.bf16.msra.mxu2 %v5593_v30  ;;  %7012 = vst [vmem:[#allocation104_spill] sm:$0xff] %v5615_v5  ;;  %v5617_v47 = vor.u32 %v4434_v49, %v3852_v20  ;;  %v4426_v30 = vld [vmem:[#allocation10 + $0x94] sm:$0xf]  ;;  %v3786_v20 = vld [vmem:[#allocation10 + $0x50] sm:$0xf] }
  0xe7   : > { %1890 = vmatpush.bf16.msra.mxu3 %v5596_v17  ;;  %7011 = vst [vmem:[#allocation103_spill] sm:$0xff] %v5611_v40  ;;  %v4494_v17 = vld [vmem:[#allocation10 + $0x2ac] sm:$0xf0]  ;;  %v4490_v23 = vld [vmem:[#allocation10 + $0x294] sm:$0xf] }
  0xe8   : > { %7013 = vst [vmem:[#allocation105_spill] sm:$0xff] %v5617_v47  ;;  %v4076_v59 = vld [vmem:[#allocation10 + $0x2b0] sm:$0xf0]  ;;  %v5627_v49 = vor.u32 %v4494_v17, %v4074_v54  ;;  %v4042_v36 = vld [vmem:[#allocation10 + $0x250] sm:$0xf] }
  0xe9   : > { %1852 = vmatpush.bf16.msra.mxu0 %v5599_v4  ;;  %1865 = vmatpush.bf16.msra.mxu1 %v5603_v42  ;;  %7014 = vst [vmem:[#allocation106_spill] sm:$0xff] %v5620_v46  ;;  %v3820_v4 = vld [vmem:[#allocation10 + $0xb0] sm:$0xf0]  ;;  %v5623_v42 = vor.u32 %v4430_v22, %v3818_v6  ;;  %v5632_v55 = vor.u32 %v4490_v23, %v4076_v59  ;;  %v3754_v17 = vld [vmem:[#allocation10 + $0x10] sm:$0xf] }
  0xea   : > { %1878 = vmatpush.bf16.msra.mxu2 %v5605_v16  ;;  %7016 = vst [vmem:[#allocation108_spill] sm:$0xff] %v5627_v49  ;;  %v5629_v35 = vor.u32 %v4426_v30, %v3820_v4  ;;  %v4418_v16 = vld [vmem:[#allocation10 + $0x54] sm:$0xf]  ;;  %v4414_v54 = vld [vmem:[#allocation10 + $0x2c] sm:$0xf0] }
  0xeb   : > { %1891 = vmatpush.bf16.msra.mxu3 %v5608_v32  ;;  %7015 = vst [vmem:[#allocation107_spill] sm:$0xff] %v5623_v42  ;;  %v4486_v32 = vld [vmem:[#allocation10 + $0x26c] sm:$0xf0]  ;;  %v4482_v6 = vld [vmem:[#allocation10 + $0x254] sm:$0xf] }
  0xec   : > { %7017 = vst [vmem:[#allocation109_spill] sm:$0xff] %v5629_v35  ;;  %v4044_v22 = vld [vmem:[#allocation10 + $0x270] sm:$0xf0]  ;;  %v5639_v4 = vor.u32 %v4486_v32, %v4042_v36  ;;  %v4010_v23 = vld [vmem:[#allocation10 + $0x210] sm:$0xf] }
  0xed   : > { %1853 = vmatpush.bf16.msra.mxu0 %v5611_v40  ;;  %1866 = vmatpush.bf16.msra.mxu1 %v5615_v5  ;;  %7018 = vst [vmem:[#allocation110_spill] sm:$0xff] %v5632_v55  ;;  %v3788_v40 = vld [vmem:[#allocation10 + $0x70] sm:$0xf0]  ;;  %v5635_v5 = vor.u32 %v4422_v7, %v3786_v20  ;;  %v4478_v59 = vld [vmem:[#allocation10 + $0x22c] sm:$0xf0] }
  0xee   : > { %1879 = vmatpush.bf16.msra.mxu2 %v5617_v47  ;;  %7020 = vst [vmem:[#allocation112_spill] sm:$0xff] %v5639_v4  ;;  %v5641_v30 = vor.u32 %v4418_v16, %v3788_v40  ;;  %v5644_v47 = vor.u32 %v4482_v6, %v4044_v22  ;;  %v4474_v20 = vld [vmem:[#allocation10 + $0x214] sm:$0xf]  ;;  %v4535_v32 = vld [vmem:[#allocation10 + $0x3f4] sm:$0xf0]  ;;  %v5651_v36 = vor.u32 %v4478_v59, %v4010_v23 }
  0xef   : > { %1892 = vmatpush.bf16.msra.mxu3 %v5620_v46  ;;  %7019 = vst [vmem:[#allocation111_spill] sm:$0xff] %v5635_v5  ;;  %v4410_v46 = vld [vmem:[#allocation10 + $0x14] sm:$0xf]  ;;  %v4467_v40 = vld [vmem:[#allocation10 + $0x1dc] sm:$0xf] }
  0xf0   : > { %7021 = vst [vmem:[#allocation113_spill] sm:$0xff] %v5641_v30  ;;  %v4012_v7 = vld [vmem:[#allocation10 + $0x230] sm:$0xf0]  ;;  %v3988_v16 = vld [vmem:[#allocation10 + $0x1f8] sm:$0xf0] }
  0xf1   : > { %1854 = vmatpush.bf16.msra.mxu0 %v5623_v42  ;;  %1867 = vmatpush.bf16.msra.mxu1 %v5627_v49  ;;  %7022 = vst [vmem:[#allocation114_spill] sm:$0xff] %v5644_v47  ;;  %v3756_v42 = vld [vmem:[#allocation10 + $0x30] sm:$0xf0]  ;;  %v5647_v49 = vor.u32 %v4414_v54, %v3754_v17  ;;  %v4531_v22 = vld [vmem:[#allocation10 + $0x3dc] sm:$0xf]  ;;  %v5660_v17 = vor.u32 %v4535_v32, %v4242_v8 }
  0xf2   : > { %1880 = vmatpush.bf16.msra.mxu2 %v5629_v35  ;;  %7024 = vst [vmem:[#allocation116_spill] sm:$0xff] %v5651_v36  ;;  %v5653_v6 = vor.u32 %v4410_v46, %v3756_v42  ;;  %v5656_v35 = vor.u32 %v4474_v20, %v4012_v7  ;;  %v5662_v54 = vor.u32 %v4467_v40, %v3988_v16  ;;  %v4527_v42 = vld [vmem:[#allocation10 + $0x3b4] sm:$0xf0]  ;;  %v4459_v46 = vld [vmem:[#allocation10 + $0x19c] sm:$0xf] }
  0xf3   : > { %1893 = vmatpush.bf16.msra.mxu3 %v5632_v55  ;;  %7023 = vst [vmem:[#allocation115_spill] sm:$0xff] %v5647_v49  ;;  %v4244_v55 = vld [vmem:[#allocation10 + $0x3f8] sm:$0xf0]  ;;  %v3922_v7 = vld [vmem:[#allocation10 + $0x158] sm:$0xf] }
  0xf4   : > { %7025 = vst [vmem:[#allocation117_spill] sm:$0xff] %v5653_v6  ;;  %v5665_v23 = vor.u32 %v4531_v22, %v4244_v55  ;;  %v3956_v59 = vld [vmem:[#allocation10 + $0x1b8] sm:$0xf0]  ;;  %v5675_v55 = vor.u32 %v4527_v42, %v4210_v28  ;;  %v4455_v32 = vld [vmem:[#allocation10 + $0x174] sm:$0xf0] }
  0xf5   : > { %1855 = vmatpush.bf16.msra.mxu0 %v5635_v5  ;;  %1868 = vmatpush.bf16.msra.mxu1 %v5639_v4  ;;  %7026 = vst [vmem:[#allocation118_spill] sm:$0xff] %v5656_v35  ;;  %v5658_v5 = vor.u32 %v4471_v15, %v3986_v60  ;;  %v4463_v4 = vld [vmem:[#allocation10 + $0x1b4] sm:$0xf0]  ;;  %v4523_v60 = vld [vmem:[#allocation10 + $0x39c] sm:$0xf]  ;;  %v5677_v20 = vor.u32 %v4459_v46, %v3956_v59 }
  0xf6   : > { %1881 = vmatpush.bf16.msra.mxu2 %v5641_v30  ;;  %7028 = vst [vmem:[#allocation120_spill] sm:$0xff] %v5660_v17  ;;  %v4212_v15 = vld [vmem:[#allocation10 + $0x3b8] sm:$0xf0]  ;;  %v5671_v8 = vor.u32 %v4463_v4, %v3954_v45  ;;  %v4178_v40 = vld [vmem:[#allocation10 + $0x358] sm:$0xf]  ;;  %v5687_v46 = vor.u32 %v4455_v32, %v3922_v7 }
  0xf7   : > { %1894 = vmatpush.bf16.msra.mxu3 %v5644_v47  ;;  %7027 = vst [vmem:[#allocation119_spill] sm:$0xff] %v5658_v5  ;;  %v5681_v16 = vor.u32 %v4523_v60, %v4212_v15  ;;  %v4519_v22 = vld [vmem:[#allocation10 + $0x374] sm:$0xf0]  ;;  %v4451_v45 = vld [vmem:[#allocation10 + $0x15c] sm:$0xf] }
  0xf8   : > { %7029 = vst [vmem:[#allocation121_spill] sm:$0xff] %v5662_v54  ;;  %v3924_v4 = vld [vmem:[#allocation10 + $0x178] sm:$0xf0]  ;;  %v5691_v59 = vor.u32 %v4519_v22, %v4178_v40  ;;  %v4511_v7 = vld [vmem:[#allocation10 + $0x334] sm:$0xf0] }
  0xf9   : > { %1856 = vmatpush.bf16.msra.mxu0 %v5647_v49  ;;  %7030 = vst [vmem:[#allocation122_spill] sm:$0xff] %v5665_v23  ;;  %1869 = vmatpush.bf16.msra.mxu1 %v5651_v36  ;;  %v4515_v28 = vld [vmem:[#allocation10 + $0x35c] sm:$0xf]  ;;  %v5693_v60 = vor.u32 %v4451_v45, %v3924_v4  ;;  %v5695_v15 = vpop.f32.mrf.mxu0  ;;  %v3858_v4 = vld [vmem:[#allocation10 + $0xd8] sm:$0xf] }
  0xfa   : > { %1882 = vmatpush.bf16.msra.mxu2 %v5653_v6  ;;  %7031 = vst [vmem:[#allocation123_spill] sm:$0xff] %v5671_v8  ;;  %v4180_v42 = vld [vmem:[#allocation10 + $0x378] sm:$0xf0]  ;;  %v4487_v49 = vld [vmem:[#allocation10 + $0x274] sm:$0xf0] }
  0xfb   : > { %1895 = vmatpush.bf16.msra.mxu3 %v5656_v35  ;;  %7032 = vst [vmem:[#allocation124_spill] sm:$0xff] %v5675_v55  ;;  %v4146_v35 = vld [vmem:[#allocation10 + $0x318] sm:$0xf]  ;;  %v5698_v36 = vor.u32 %v4515_v28, %v4180_v42  ;;  %v4443_v32 = vld [vmem:[#allocation10 + $0x11c] sm:$0xf] }
  0xfc   : > { %7033 = vst [vmem:[#allocation125_spill] sm:$0xff] %v5677_v20  ;;  %1857 = vmatmul.bf16.vlgmr.msra.gmra.mxu0 %v5479_v43  ;;  %1870 = vmatmul.bf16.vlgmr.msra.gmra.mxu1 %v5483_v48  ;;  %v4507_v47 = vld [vmem:[#allocation10 + $0x31c] sm:$0xf]  ;;  %v5707_v22 = vor.u32 %v4511_v7, %v4146_v35  ;;  %v4439_v28 = vld [vmem:[#allocation10 + $0xf4] sm:$0xf0] }
  0xfd   : > { %1901 = vmatpush.bf16.msrb.mxu0 %v5658_v5  ;;  %1914 = vmatpush.bf16.msrb.mxu1 %v5660_v17  ;;  %7034 = vst [vmem:[#allocation126_spill] sm:$0xff] %v5681_v16  ;;  %v4447_v17 = vld [vmem:[#allocation10 + $0x134] sm:$0xf0]  ;;  %v4435_v5 = vld [vmem:[#allocation10 + $0xdc] sm:$0xf] }
  0xfe   : > { %1927 = vmatpush.bf16.msrb.mxu2 %v5662_v54  ;;  %1896 = vmatmul.bf16.vlgmr.msra.gmra.mxu3 %v5483_v48  ;;  %7035 = vst [vmem:[#allocation127_spill] sm:$0xff] %v5687_v46  ;;  %v4114_v42 = vld [vmem:[#allocation10 + $0x2d8] sm:$0xf]  ;;  %v4419_v30 = vld [vmem:[#allocation10 + $0x5c] sm:$0xf] }
  0xff   : > { %1940 = vmatpush.bf16.msrb.mxu3 %v5665_v23  ;;  %1883 = vmatmul.bf16.vlgmr.msra.gmra.mxu2 %v5479_v43  ;;  %7036 = vst [vmem:[#allocation128_spill] sm:$0xff] %v5691_v59  ;;  %v3890_v23 = vld [vmem:[#allocation10 + $0x118] sm:$0xf] }
 0x100   : > { %7037 = vst [vmem:[#allocation129_spill] sm:$0xff] %v5693_v60  ;;  %v5703_v40 = vor.u32 %v4447_v17, %v3890_v23  ;;  %v4503_v54 = vld [vmem:[#allocation10 + $0x2f4] sm:$0xf0]  ;;  %v4499_v17 = vld [vmem:[#allocation10 + $0x2dc] sm:$0xf] }
 0x101   : > { %1902 = vmatpush.bf16.msrb.mxu0 %v5671_v8  ;;  %1915 = vmatpush.bf16.msrb.mxu1 %v5675_v55  ;;  %7038 = vst [vmem:[#allocation130_spill] sm:$0xff] %v5698_v36  ;;  %v5700_v8 = vpop.f32.mrf.mxu1  ;;  %v3892_v55 = vld [vmem:[#allocation10 + $0x138] sm:$0xf0] }
 0x102   : > { %1928 = vmatpush.bf16.msrb.mxu2 %v5677_v20  ;;  %v4148_v20 = vld [vmem:[#allocation10 + $0x338] sm:$0xf0]  ;;  %7039 = vst [vmem:[#allocation131_spill] sm:$0xff] %v5703_v40  ;;  %v5709_v45 = vor.u32 %v4443_v32, %v3892_v55  ;;  %v5717_v35 = vpop.f32.mrf.mxu2  ;;  %v5721_v55 = vor.u32 %v4503_v54, %v4114_v42  ;;  %v3826_v32 = vld [vmem:[#allocation10 + $0x98] sm:$0xf] }
 0x103   : > { %1941 = vmatpush.bf16.msrb.mxu3 %v5681_v16  ;;  %7040 = vst [vmem:[#allocation132_spill] sm:$0xff] %v5707_v22  ;;  %v5712_v16 = vor.u32 %v4507_v47, %v4148_v20  ;;  %v4116_v23 = vld [vmem:[#allocation10 + $0x2f8] sm:$0xf0]  ;;  %v5725_v47 = vpop.f32.mrf.mxu3  ;;  %v5727_v20 = vpop.f32.mrf.mxu0 }
 0x104   : > { %7041 = vst [vmem:[#allocation133_spill] sm:$0xff] %v5709_v45  ;;  %v4491_v54 = vld [vmem:[#allocation10 + $0x29c] sm:$0xf] }
 0x105   : > { %1903 = vmatpush.bf16.msrb.mxu0 %v5687_v46  ;;  %1916 = vmatpush.bf16.msrb.mxu1 %v5691_v59  ;;  %7042 = vst [vmem:[#allocation134_spill] sm:$0xff] %v5712_v16  ;;  %v3860_v46 = vld [vmem:[#allocation10 + $0xf8] sm:$0xf0]  ;;  %v5715_v59 = vor.u32 %v4439_v28, %v3858_v4  ;;  %v5730_v4 = vor.u32 %v4499_v17, %v4116_v23  ;;  %v3794_v23 = vld [vmem:[#allocation10 + $0x58] sm:$0xf] }
 0x106   : > { %1929 = vmatpush.bf16.msrb.mxu2 %v5693_v60  ;;  %7044 = vst [vmem:[#allocation136_spill] sm:$0xff] %v5717_v35  ;;  %v5723_v7 = vor.u32 %v4435_v5, %v3860_v46  ;;  %v4082_v60 = vld [vmem:[#allocation10 + $0x298] sm:$0xf]  ;;  %v4084_v42 = vld [vmem:[#allocation10 + $0x2b8] sm:$0xf0]  ;;  %v5734_v5 = vld [vmem:[#allocation11] sm:$0xff] }
 0x107   : > { %1942 = vmatpush.bf16.msrb.mxu3 %v5698_v36  ;;  %7043 = vst [vmem:[#allocation135_spill] sm:$0xff] %v5715_v59  ;;  %v4431_v36 = vld [vmem:[#allocation10 + $0xb4] sm:$0xf0]  ;;  %v5746_v6 = vor.u32 %v4491_v54, %v4084_v42 }
 0x108   : > { %7045 = vst [vmem:[#allocation137_spill] sm:$0xff] %v5721_v55  ;;  %v5737_v46 = vor.u32 %v4431_v36, %v3826_v32  ;;  %v4483_v36 = vld [vmem:[#allocation10 + $0x25c] sm:$0xf]  ;;  %v4018_v35 = vld [vmem:[#allocation10 + $0x218] sm:$0xf] }
 0x109   : > { %1904 = vmatpush.bf16.msrb.mxu0 %v5703_v40  ;;  %1917 = vmatpush.bf16.msrb.mxu1 %v5707_v22  ;;  %7046 = vst [vmem:[#allocation138_spill] sm:$0xff] %v5723_v7  ;;  %v5732_v28 = vpop.f32.mrf.mxu1  ;;  %v4495_v22 = vld [vmem:[#allocation10 + $0x2b4] sm:$0xf0]  ;;  %v4427_v40 = vld [vmem:[#allocation10 + $0x9c] sm:$0xf] }
 0x10a   : > { %1930 = vmatpush.bf16.msrb.mxu2 %v5709_v45  ;;  %7047 = vst [vmem:[#allocation139_spill] sm:$0xff] %v5725_v47  ;;  %v3828_v45 = vld [vmem:[#allocation10 + $0xb8] sm:$0xf0]  ;;  %v4415_v47 = vld [vmem:[#allocation10 + $0x34] sm:$0xf0] }
 0x10b   : > { %7048 = vst [vmem:[#allocation140_spill] sm:$0xff] %v5727_v20  ;;  %1943 = vmatpush.bf16.msrb.mxu3 %v5712_v16  ;;  %v5741_v20 = vor.u32 %v4495_v22, %v4082_v60  ;;  %v5743_v17 = vor.u32 %v4427_v40, %v3828_v45  ;;  %v4050_v16 = vld [vmem:[#allocation10 + $0x258] sm:$0xf]  ;;  %v4052_v32 = vld [vmem:[#allocation10 + $0x278] sm:$0xf0]  ;;  %v5752_v60 = vperm.slane %v5734_v5, 1  ;;  %v5757_v22 = vpop.f32.mrf.mxu2  ;;  %v5765_v42 = vpop.f32.mrf.mxu3 }
 0x10c   : > { %7049 = vst [vmem:[#allocation141_spill] sm:$0xff] %v5730_v4  ;;  %v5761_v45 = vor.u32 %v4487_v49, %v4050_v16  ;;  %v3764_v49 = vld [vmem:[#allocation10 + $0x38] sm:$0xf0] }
 0x10d   : > { %7050 = vst [vmem:[#allocation142_spill] sm:$0xff] %v5732_v28  ;;  %1905 = vmatpush.bf16.msrb.mxu0 %v5715_v59  ;;  %1918 = vmatpush.bf16.msrb.mxu1 %v5721_v55  ;;  %v4423_v28 = vld [vmem:[#allocation10 + $0x74] sm:$0xf0]  ;;  %v3796_v59 = vld [vmem:[#allocation10 + $0x78] sm:$0xf0]  ;;  %v5749_v55 = vperm.slane %v5734_v5, 0 }
 0x10e   : > { %7051 = vst [vmem:[#allocation143_spill] sm:$0xff] %v5737_v46  ;;  %1931 = vmatpush.bf16.msrb.mxu2 %v5723_v7  ;;  %v5755_v40 = vor.u32 %v4423_v28, %v3794_v23  ;;  %v5763_v54 = vor.u32 %v4419_v30, %v3796_v59  ;;  %v3762_v7 = vld [vmem:[#allocation10 + $0x18] sm:$0xf]  ;;  %v5768_v28 = vor.u32 %v4483_v36, %v4052_v32  ;;  %v4475_v16 = vld [vmem:[#allocation10 + $0x21c] sm:$0xf] }
 0x10f   : > { %7052 = vst [vmem:[#allocation144_spill] sm:$0xff] %v5741_v20  ;;  %1944 = vmatpush.bf16.msrb.mxu3 %v5730_v4  ;;  %v793_v4 = vpop.f32.mrf.mxu0  ;;  %v4020_v59 = vld [vmem:[#allocation10 + $0x238] sm:$0xf0] }
 0x110   : > { %7053 = vst [vmem:[#allocation145_spill] sm:$0xff] %v5743_v17  ;;  %v5771_v23 = vadd.f32 %v793_v4, %v5749_v55  ;;  %v5786_v32 = vor.u32 %v4475_v16, %v4020_v59 }
 0x111   : > { %7054 = vst [vmem:[#allocation146_spill] sm:$0xff] %v5746_v6  ;;  %1906 = vmatpush.bf16.msrb.mxu0 %v5737_v46  ;;  %1919 = vmatpush.bf16.msrb.mxu1 %v5741_v20  ;;  %v4479_v20 = vld [vmem:[#allocation10 + $0x234] sm:$0xf0] }
 0x112   : > { %7055 = vst [vmem:[#allocation147_spill] sm:$0xff] %v5749_v55  ;;  %1932 = vmatpush.bf16.msrb.mxu2 %v5743_v17  ;;  %v4411_v17 = vld [vmem:[#allocation10 + $0x1c] sm:$0xf]  ;;  %v5781_v36 = vor.u32 %v4479_v20, %v4018_v35 }
 0x113   : > { %7056 = vst [vmem:[#allocation148_spill] sm:$0xff] %v5752_v60  ;;  %1945 = vmatpush.bf16.msrb.mxu3 %v5746_v6  ;;  %v5783_v4 = vor.u32 %v4411_v17, %v3764_v49 }
 0x114   : > { %7057 = vst [vmem:[#allocation149_spill] sm:$0xff] %v5755_v40 }
 0x115   : > { %7058 = vst [vmem:[#allocation150_spill] sm:$0xff] %v5757_v22  ;;  %v812_v22 = vpop.f32.mrf.mxu1  ;;  %1907 = vmatpush.bf16.msrb.mxu0 %v5755_v40  ;;  %1920 = vmatpush.bf16.msrb.mxu1 %v5761_v45 }
 0x116   : > { %7059 = vst [vmem:[#allocation151_spill] sm:$0xff] %v5761_v45  ;;  %v5774_v30 = vadd.f32 %v812_v22, %v5752_v60  ;;  %1933 = vmatpush.bf16.msrb.mxu2 %v5763_v54  ;;  %v5789_v22 = vperm.slane %v5734_v5, 2 }
 0x117   : > { %7060 = vst [vmem:[#allocation152_spill] sm:$0xff] %v5763_v54  ;;  %1946 = vmatpush.bf16.msrb.mxu3 %v5768_v28  ;;  %v5800_v20 = vpop.f32.mrf.mxu0 }
 0x118   : > { %7061 = vst [vmem:[#allocation153_spill] sm:$0xff] %v5765_v42  ;;  %v5777_v42 = vor.u32 %v4415_v47, %v3762_v7  ;;  %v831_v7 = vpop.f32.mrf.mxu2  ;;  %v850_v47 = vpop.f32.mrf.mxu3 }
 0x119   : > { %7062 = vst [vmem:[#allocation154_spill] sm:$0xff] %v5768_v28  ;;  %1921 = vmatpush.bf16.msrb.mxu1 %v5781_v36  ;;  %v5798_v35 = vadd.f32 %v831_v7, %v5789_v22 }
 0x11a   : > { %7063 = vst [vmem:[#allocation155_spill] sm:$0xff] %v5771_v23  ;;  %1908 = vmatpush.bf16.msrb.mxu0 %v5777_v42  ;;  %1934 = vmatpush.bf16.msrb.mxu2 %v5783_v4 }
 0x11b   : > { %7064 = vst [vmem:[#allocation156_spill] sm:$0xff] %v5774_v30  ;;  %v5792_v30 = vperm.slane %v5734_v5, 3  ;;  %1947 = vmatpush.bf16.msrb.mxu3 %v5786_v32 }
 0x11c   : > { %7065 = vst [vmem:[#allocation157_spill] sm:$0xff] %v5777_v42  ;;  %1922 = vmatmul.bf16.vlgmr.msrb.gmra.mxu1 %v5483_v48 }
 0x11d   : > { %7066 = vst [vmem:[#allocation158_spill] sm:$0xff] %v5781_v36  ;;  %v5804_v17 = vadd.f32 %v850_v47, %v5792_v30  ;;  %v5806_v49 = vpop.f32.mrf.mxu1  ;;  %1909 = vmatmul.bf16.vlgmr.msrb.gmra.mxu0 %v5479_v43  ;;  %1935 = vmatmul.bf16.vlgmr.msrb.gmra.mxu2 %v5479_v43 }
 0x11e   : > { %7067 = vst [vmem:[#allocation159_spill] sm:$0xff] %v5783_v4  ;;  %2098 = vmatpush.bf16.msra.mxu0 %v5354_v12  ;;  %2124 = vmatpush.bf16.msra.mxu2 %v5358_v14 }
 0x11f   : > { %7068 = vst [vmem:[#allocation160_spill] sm:$0xff] %v5786_v32  ;;  %1948 = vmatmul.bf16.vlgmr.msrb.gmra.mxu3 %v5483_v48  ;;  %2111 = vmatpush.bf16.msra.mxu1 %v5356_v13  ;;  %v5825_v43 = vpop.f32.mrf.mxu0 }
 0x120   : > { %7069 = vst [vmem:[#allocation161_spill] sm:$0xff] %v5789_v22  ;;  %2137 = vmatpush.bf16.msra.mxu3 %v5360_v18  ;;  %v5818_v16 = vpop.f32.mrf.mxu2  ;;  %v5820_v59 = vpop.f32.mrf.mxu3 }
 0x121   : > { %7070 = vst [vmem:[#allocation162_spill] sm:$0xff] %v5792_v30 }
 0x122   : > { %7071 = vst [vmem:[#allocation163_spill] sm:$0xff] %v5798_v35  ;;  %2099 = vmatpush.bf16.msra.mxu0 %v5363_v24  ;;  %2125 = vmatpush.bf16.msra.mxu2 %v5369_v26 }
 0x123   : > { %7072 = vst [vmem:[#allocation164_spill] sm:$0xff] %v5800_v20  ;;  %2112 = vmatpush.bf16.msra.mxu1 %v5367_v25 }
 0x124   : > { %7073 = vst [vmem:[#allocation165_spill] sm:$0xff] %v5804_v17  ;;  %2138 = vmatpush.bf16.msra.mxu3 %v5372_v31  ;;  %v5859_v17 = vperm.slane %v5734_v5, 5 }
 0x125   : > { %7074 = vst [vmem:[#allocation166_spill] sm:$0xff] %v5806_v49  ;;  %v5828_v48 = vpop.f32.mrf.mxu1  ;;  %v5852_v49 = vperm.slane %v5734_v5, 4 }
 0x126   : > { %7075 = vst [vmem:[#allocation167_spill] sm:$0xff] %v5818_v16  ;;  %2100 = vmatpush.bf16.msra.mxu0 %v5375_v37  ;;  %2126 = vmatpush.bf16.msra.mxu2 %v5381_v39 }
 0x127   : > { %7076 = vst [vmem:[#allocation168_spill] sm:$0xff] %v5820_v59  ;;  %2113 = vmatpush.bf16.msra.mxu1 %v5379_v38  ;;  %v5841_v59 = vpop.f32.mrf.mxu0 }
 0x128   : > { %2139 = vmatpush.bf16.msra.mxu3 %v5385_v44  ;;  %v5835_v7 = vpop.f32.mrf.mxu2  ;;  %v5839_v47 = vpop.f32.mrf.mxu3  ;;  %7077 = vst [vmem:[#allocation169_spill] sm:$0xff] %v5841_v59 }
 0x129   : > { %7079 = vst [vmem:[#allocation171_spill] sm:$0xff] %v5852_v49 }
 0x12a   : > { %2101 = vmatpush.bf16.msra.mxu0 %v5391_v50  ;;  %2127 = vmatpush.bf16.msra.mxu2 %v5397_v52  ;;  %7081 = vst [vmem:[#allocation173_spill] sm:$0xff] %v5859_v17 }
 0x12b   : > { %2114 = vmatpush.bf16.msra.mxu1 %v5395_v51 }
 0x12c   : > { %2140 = vmatpush.bf16.msra.mxu3 %v5400_v56 }
 0x12d   : > { %v5844_v16 = vpop.f32.mrf.mxu1 }
 0x12e   : > { %2102 = vmatpush.bf16.msra.mxu0 %v5403_v61  ;;  %2128 = vmatpush.bf16.msra.mxu2 %v5409_v63  ;;  %7078 = vst [vmem:[#allocation170_spill] sm:$0xff] %v5844_v16 }
 0x12f   : > { %2115 = vmatpush.bf16.msra.mxu1 %v5407_v62  ;;  %v869_v23 = vpop.f32.mrf.mxu0 }
 0x130   : > { %2141 = vmatpush.bf16.msra.mxu3 %v5412_v3  ;;  %v5854_v20 = vpop.f32.mrf.mxu2  ;;  %v5861_v35 = vpop.f32.mrf.mxu3  ;;  %v5865_v16 = vadd.f32 %v869_v23, %v5852_v49  ;;  %v5881_v23 = vperm.slane %v5734_v5, 7 }
 0x131   : > { %7080 = vst [vmem:[#allocation172_spill] sm:$0xff] %v5854_v20 }
 0x132   : > { %2103 = vmatpush.bf16.msra.mxu0 %v5415_v9  ;;  %2129 = vmatpush.bf16.msra.mxu2 %v5421_v11  ;;  %7082 = vst [vmem:[#allocation174_spill] sm:$0xff] %v5861_v35  ;;  %v5877_v35 = vperm.slane %v5734_v5, 6 }
 0x133   : > { %2116 = vmatpush.bf16.msra.mxu1 %v5419_v10  ;;  %7083 = vst [vmem:[#allocation175_spill] sm:$0xff] %v5865_v16 }
 0x134   : > { %2142 = vmatpush.bf16.msra.mxu3 %v5424_v19  ;;  %7085 = vst [vmem:[#allocation177_spill] sm:$0xff] %v5877_v35 }
 0x135   : > { %v888_v59 = vpop.f32.mrf.mxu1  ;;  %7086 = vst [vmem:[#allocation178_spill] sm:$0xff] %v5881_v23 }
 0x136   : > { %2104 = vmatpush.bf16.msra.mxu0 %v5427_v29  ;;  %2130 = vmatpush.bf16.msra.mxu2 %v5433_v34  ;;  %v5868_v10 = vadd.f32 %v888_v59, %v5859_v17 }
 0x137   : > { %2117 = vmatpush.bf16.msra.mxu1 %v5431_v33  ;;  %v5888_v20 = vpop.f32.mrf.mxu0  ;;  %v7092_v33 = vld [vmem:[#allocation61_spill] sm:$0xff] }
 0x138   : > { %7084 = vst [vmem:[#allocation176_spill] sm:$0xff] %v5868_v10  ;;  %2143 = vmatpush.bf16.msra.mxu3 %v5437_v41  ;;  %v907_v59 = vpop.f32.mrf.mxu2  ;;  %v926_v16 = vpop.f32.mrf.mxu3  ;;  %v7089_v41 = vld [vmem:[#allocation58_spill] sm:$0xff] }
 0x139   : > { %v5886_v10 = vadd.f32 %v907_v59, %v5877_v35  ;;  %7088 = vst [vmem:[#allocation180_spill] sm:$0xff] %v5888_v20  ;;  %v7095_v59 = vld [vmem:[#allocation62_spill] sm:$0xff] }
 0x13a   : > { %2105 = vmatpush.bf16.msra.mxu0 %v5443_v53  ;;  %2131 = vmatpush.bf16.msra.mxu2 %v5449_v58  ;;  %v7108_v53 = vld [vmem:[#allocation75_spill] sm:$0xff] }
 0x13b   : > { %2118 = vmatpush.bf16.msra.mxu1 %v5447_v57  ;;  %7087 = vst [vmem:[#allocation179_spill] sm:$0xff] %v5886_v10  ;;  %v5893_v57 = vadd.f32 %v926_v16, %v5881_v23  ;;  %v7096_v10 = vld [vmem:[#allocation65_spill] sm:$0xff] }
 0x13c   : > { %2144 = vmatpush.bf16.msra.mxu3 %v5452_v27  ;;  %v7093_v27 = vld [vmem:[#allocation60_spill] sm:$0xff] }
 0x13d   : > { %7090 = vst [vmem:[#allocation181_spill] sm:$0xff] %v5893_v57  ;;  %v5895_v5 = vpop.f32.mrf.mxu1  ;;  %v7100_v57 = vld [vmem:[#allocation67_spill] sm:$0xff] }
 0x13e   : > { %2150 = vmatpush.bf16.msrb.mxu0 %v5454_v0  ;;  %2176 = vmatpush.bf16.msrb.mxu2 %v5458_v2  ;;  %7091 = vst [vmem:[#allocation182_spill] sm:$0xff] %v5895_v5  ;;  %v7101_v5 = vld [vmem:[#allocation66_spill] sm:$0xff]  ;;  %v7102_v2 = vld [vmem:[#allocation69_spill] sm:$0xff] }
 0x13f   : > { %2163 = vmatpush.bf16.msrb.mxu1 %v5456_v1  ;;  %v7094_v1 = vld [vmem:[#allocation63_spill] sm:$0xff]  ;;  %v1754_v16 = vpop.f32.mrf.mxu0 }
 0x140   : > { %2189 = vmatpush.bf16.msrb.mxu3 %v7089_v41  ;;  %v5902_v20 = vpop.f32.mrf.mxu2  ;;  %v5905_v41 = vpop.f32.mrf.mxu3 }
 0x141   : > { %7097 = vst [vmem:[#allocation183_spill] sm:$0xff] %v5902_v20  ;;  %v7104_v20 = vld [vmem:[#allocation71_spill] sm:$0xff] }
 0x142   : > { %2151 = vmatpush.bf16.msrb.mxu0 %v5467_v21  ;;  %2177 = vmatpush.bf16.msrb.mxu2 %v7092_v33  ;;  %v7098_v21 = vld [vmem:[#allocation64_spill] sm:$0xff]  ;;  %7099 = vst [vmem:[#allocation184_spill] sm:$0xff] %v5905_v41  ;;  %v7106_v41 = vld [vmem:[#allocation73_spill] sm:$0xff] }
 0x143   : > { %2164 = vmatpush.bf16.msrb.mxu1 %v7093_v27  ;;  %v789_v27 = vadd.f32 %v5695_v15, %v5749_v55  ;;  %v7111_v55 = vld [vmem:[#allocation76_spill] sm:$0xff] }
 0x144   : > { %2190 = vmatpush.bf16.msrb.mxu3 %v7095_v59 }
 0x145   : > { %v1767_v33 = vpop.f32.mrf.mxu1 }
 0x146   : > { %2152 = vmatpush.bf16.msrb.mxu0 %v7094_v1  ;;  %2178 = vmatpush.bf16.msrb.mxu2 %v7096_v10  ;;  %v1768_v59 = vadd.f32 %v1767_v33, %v1754_v16  ;;  %v7103_v1 = vld [vmem:[#allocation68_spill] sm:$0xff]  ;;  %v808_v33 = vadd.f32 %v5700_v8, %v5752_v60  ;;  %v7117_v8 = vld [vmem:[#allocation82_spill] sm:$0xff] }
 0x147   : > { %2165 = vmatpush.bf16.msrb.mxu1 %v7098_v21  ;;  %v7105_v21 = vld [vmem:[#allocation70_spill] sm:$0xff]  ;;  %v1756_v58 = vpop.f32.mrf.mxu0 }
 0x148   : > { %2191 = vmatpush.bf16.msrb.mxu3 %v7101_v5  ;;  %v1953_v10 = vadd.f32 %v1768_v59, %v789_v27  ;;  %v1780_v0 = vpop.f32.mrf.mxu2  ;;  %v1793_v5 = vpop.f32.mrf.mxu3  ;;  %v7110_v59 = vld [vmem:[#allocation77_spill] sm:$0xff] }
 0x149   : > { %v1794_v15 = vadd.f32 %v1793_v5, %v1780_v0  ;;  %v7118_v0 = vld [vmem:[#allocation85_spill] sm:$0xff]  ;;  %v7119_v5 = vld [vmem:[#allocation84_spill] sm:$0xff] }
 0x14a   : > { %2153 = vmatpush.bf16.msrb.mxu0 %v7100_v57  ;;  %2179 = vmatpush.bf16.msrb.mxu2 %v7102_v2  ;;  %v7107_v57 = vld [vmem:[#allocation72_spill] sm:$0xff]  ;;  %v7109_v2 = vld [vmem:[#allocation74_spill] sm:$0xff] }
 0x14b   : > { %2166 = vmatpush.bf16.msrb.mxu1 %v7103_v1  ;;  %v1954_v16 = vadd.f32 %v1794_v15, %v808_v33  ;;  %v7113_v1 = vld [vmem:[#allocation78_spill] sm:$0xff]  ;;  %v4248_v15 = vmul.f32 -1.442695, %v1953_v10 }
 0x14c   : > { %2192 = vmatpush.bf16.msrb.mxu3 %v7105_v21  ;;  %v7112_v21 = vld [vmem:[#allocation79_spill] sm:$0xff]  ;;  %v7120_v33 = vld [vmem:[#allocation86_spill] sm:$0xff] }
 0x14d   : > { %v1769_v27 = vpop.f32.mrf.mxu1  ;;  %4701 = vpow2.f32 %v4248_v15 }
 0x14e   : > { %2154 = vmatpush.bf16.msrb.mxu0 %v7104_v20  ;;  %2180 = vmatpush.bf16.msrb.mxu2 %v7106_v41  ;;  %v7116_v41 = vld [vmem:[#allocation83_spill] sm:$0xff] }
 0x14f   : > { %2167 = vmatpush.bf16.msrb.mxu1 %v7107_v57  ;;  %v7114_v57 = vld [vmem:[#allocation81_spill] sm:$0xff] }
 0x150   : > { %2193 = vmatpush.bf16.msrb.mxu3 %v7109_v2  ;;  %v1782_v58 = vpop.f32.mrf.mxu2  ;;  %v1795_v2 = vpop.f32.mrf.mxu3 }
 0x152   : > { %2155 = vmatpush.bf16.msrb.mxu0 %v7108_v53  ;;  %2181 = vmatpush.bf16.msrb.mxu2 %v7110_v59  ;;  %v7115_v53 = vld [vmem:[#allocation80_spill] sm:$0xff] }
 0x153   : > { %2168 = vmatpush.bf16.msrb.mxu1 %v7111_v55 }
 0x154   : > { %2194 = vmatpush.bf16.msrb.mxu3 %v7113_v1  ;;  %v7121_v1 = vld [vmem:[#allocation136_spill] sm:$0xff] }
 0x155   : > { %v827_v58 = vadd.f32 %v7121_v1, %v5789_v22 }
 0x156   : > { %2156 = vmatpush.bf16.msrb.mxu0 %v7112_v21  ;;  %2182 = vmatpush.bf16.msrb.mxu2 %v7114_v57 }
 0x157   : > { %2169 = vmatpush.bf16.msrb.mxu1 %v7115_v53  ;;  %v4249_v53 = vmul.f32 -1.442695, %v1954_v16 }
 0x158   : > { %2195 = vmatpush.bf16.msrb.mxu3 %v7117_v8 }
 0x159   : > { %v1806_v27 = vpop.f32.mrf.mxu0  ;;  %v1819_v60 = vpop.f32.mrf.mxu1  ;;  %4703 = vpow2.f32 %v4249_v53 }
 0x15a   : > { %2157 = vmatpush.bf16.msrb.mxu0 %v7116_v41  ;;  %2183 = vmatpush.bf16.msrb.mxu2 %v7118_v0  ;;  %v1820_v55 = vadd.f32 %v1819_v60, %v1806_v27  ;;  %v4702_v41 = vpop.eup %4701 }
 0x15b   : > { %2170 = vmatpush.bf16.msrb.mxu1 %v7119_v5  ;;  %v7122_v5 = vld [vmem:[#allocation139_spill] sm:$0xff]  ;;  %v5936_v15 = vadd.f32 1.0, %v4702_v41 }
 0x15c   : > { %2196 = vmatpush.bf16.msrb.mxu3 %v7120_v33  ;;  %v1955_v2 = vadd.f32 %v1820_v55, %v827_v58  ;;  %v846_v33 = vadd.f32 %v7122_v5, %v5792_v30 }
 0x15d   : > { %v1980_v62 = vand.u32 2147483648, %v5936_v15  ;;  %vm1974_vm4 = vweird.f32 %v5936_v15 }
 0x15e   : > { %v4250_v57 = vmul.f32 -1.442695, %v1955_v2 }
 0x15f   : > { %v4704_v19 = vpop.eup %4703 }
 0x160   : > { %4705 = vpow2.f32 %v4250_v57  ;;  %v5939_v57 = vadd.f32 1.0, %v4704_v19 }
 0x161   : > { %v1845_v0 = vpop.f32.mrf.mxu3  ;;  %v1808_v21 = vpop.f32.mrf.mxu0  ;;  %4707 = vrcp.f32 %v5936_v15 }
 0x162   : > { %v1832_v8 = vpop.f32.mrf.mxu2  ;;  %v1821_v59 = vpop.f32.mrf.mxu1  ;;  %vm1989_vm12 = vweird.f32 %v5939_v57 }
 0x163   : > { %v1846_v10 = vadd.f32 %v1845_v0, %v1832_v8 }
 0x165   : > { %v1956_v20 = vadd.f32 %v1846_v10, %v846_v33 }
 0x166   : > { %v4706_v60 = vpop.eup %4705 }
 0x167   : > { %v4251_v1 = vmul.f32 -1.442695, %v1956_v20  ;;  %v2005_v55 = vadd.f32 1.0, %v4706_v60  ;;  %v4708_v21 = vpop.eup %4707 }
 0x168   : > { %v1970_v8 = vmul.f32 %v4708_v21, %v5936_v15  ;;  %vm1975_vm2 = vweird.f32 %v4708_v21 }
 0x169   : > { %4709 = vpow2.f32 %v4251_v1  ;;  %v1847_v16 = vpop.f32.mrf.mxu3  ;;  %vm2012_vm1 = vweird.f32 %v2005_v55  ;;  %v2016_v29 = vand.u32 2147483647, %v2005_v55  ;;  %vm5966_vm5 = vmor %vm1974_vm4, %vm1975_vm2 }
 0x16a   : > { %v1834_v53 = vpop.f32.mrf.mxu2  ;;  %4711 = vrcp.f32 %v2005_v55  ;;  %v1971_v33 = vsub.f32 1.0, %v1970_v8  ;;  %v865_v16 = vadd.f32 %v5825_v43, %v5852_v49  ;;  %v1978_v43 = vand.u32 2147483647, %v5936_v15 }
 0x16b   : > { %4713 = vrcp.f32 %v5939_v57  ;;  %vm2017_vm6 = vcmp.eq.f32.partialorder %v2016_v29, 8.507059e+37 }
 0x16c   : > { %v1972_v53 = vmul.f32 %v4708_v21, %v1971_v33  ;;  %vm1979_vm8 = vcmp.eq.f32.partialorder %v1978_v43, 8.507059e+37  ;;  %v1993_v43 = vand.u32 2147483647, %v5939_v57 }
 0x16e   : > { %v1973_v34 = vadd.f32 %v4708_v21, %v1972_v53  ;;  %vm1994_vm15 = vcmp.eq.f32.partialorder %v1993_v43, 8.507059e+37 }
 0x16f   : > { %v4710_v27 = vpop.eup %4709 }
 0x170   : > { %v5942_v59 = vadd.f32 1.0, %v4710_v27  ;;  %v4712_v41 = vpop.eup %4711 }
 0x171   : > { %v2008_v20 = vmul.f32 %v4712_v41, %v2005_v55  ;;  %v5946_v5 = vpop.eup %4713  ;;  %vm2013_vm0 = vweird.f32 %v4712_v41 }
 0x172   : > { %4715 = vrcp.f32 %v5942_v59  ;;  %v1985_v2 = vmul.f32 %v5946_v5, %v5939_v57  ;;  %vm5956_vm3 = vmor %vm2012_vm1, %vm2013_vm0  ;;  %vm1990_vm9 = vweird.f32 %v5946_v5  ;;  %vm2027_vm10 = vweird.f32 %v5942_v59 }
 0x173   : > { %v2009_v0 = vsub.f32 1.0, %v2008_v20  ;;  %vm1991_vm13 = vmor %vm1989_vm12, %vm1990_vm9 }
 0x174   : > { %v1986_v8 = vsub.f32 1.0, %v1985_v2 }
 0x175   : > { %v2010_v58 = vmul.f32 %v4712_v41, %v2009_v0  ;;  %v2018_v0 = vand.u32 2147483648, %v2005_v55 }
 0x177   : > { %v2011_v30 = vadd.f32 %v4712_v41, %v2010_v58 }
 0x178   : > { %v5948_v19 = vpop.eup %4715 }
 0x179   : > { %v1858_v10 = vpop.f32.mrf.mxu0  ;;  %v2023_v1 = vmul.f32 %v5948_v19, %v5942_v59  ;;  %v1871_v60 = vpop.f32.mrf.mxu1  ;;  %v2015_v58 = vsel %vm5956_vm3, %v4712_v41, %v2011_v30  ;;  %vm2028_vm7 = vweird.f32 %v5948_v19  ;;  %v1093_v30 = vld [vmem:[#allocation4 + $0x8] sm:$0xff]  ;;  %v1981_v41 = vor.u32 1.1754944e-38, %v1980_v62 }
 0x17a   : > { %v1872_v27 = vadd.f32 %v1871_v60, %v1858_v10  ;;  %v2019_v10 = vor.u32 1.1754944e-38, %v2018_v0  ;;  %v1987_v60 = vmul.f32 %v5946_v5, %v1986_v8  ;;  %v2033_v0 = vand.u32 2147483648, %v5942_v59  ;;  %vm5982_vm11 = vmor %vm2027_vm10, %vm2028_vm7 }
 0x17b   : > { %v2024_v20 = vsub.f32 1.0, %v2023_v1 }
 0x17c   : > { %v1957_v22 = vadd.f32 %v1872_v27, %v865_v16  ;;  %v1977_v16 = vsel %vm5966_vm5, %v4708_v21, %v1973_v34  ;;  %v2020_v27 = vsel %vm2017_vm6, %v2019_v10, %v2015_v58  ;;  %v1988_v29 = vadd.f32 %v5946_v5, %v1987_v60 }
 0x17d   : > { %v2025_v33 = vmul.f32 %v5948_v19, %v2024_v20  ;;  %v1982_v34 = vsel %vm1979_vm8, %v1981_v41, %v1977_v16  ;;  %v2031_v21 = vand.u32 2147483647, %v5942_v59  ;;  %v2077_v62 = vmul.f32 %v2020_v27, %v1093_v30 }
 0x17e   : > { %4717 = vtanh.f32 %v1957_v22  ;;  %v884_v22 = vadd.f32 %v5828_v48, %v5859_v17  ;;  %v1995_v58 = vand.u32 2147483648, %v5939_v57  ;;  %v2034_v55 = vor.u32 1.1754944e-38, %v2033_v0 }
 0x17f   : > { %v2026_v20 = vadd.f32 %v5948_v19, %v2025_v33  ;;  %v1992_v60 = vsel %vm1991_vm13, %v5946_v5, %v1988_v29  ;;  %vm2032_vm14 = vcmp.eq.f32.partialorder %v2031_v21, 8.507059e+37  ;;  %v903_v0 = vadd.f32 %v5835_v7, %v5877_v35 }
 0x180   : > { %v1996_v16 = vor.u32 1.1754944e-38, %v1995_v58 }
 0x181   : > { %v1897_v1 = vpop.f32.mrf.mxu3  ;;  %v1860_v53 = vpop.f32.mrf.mxu0  ;;  %v2030_v10 = vsel %vm5982_vm11, %v5948_v19, %v2026_v20 }
 0x182   : > { %v1884_v2 = vpop.f32.mrf.mxu2  ;;  %v1873_v3 = vpop.f32.mrf.mxu1 }
 0x183   : > { %v1898_v15 = vadd.f32 %v1897_v1, %v1884_v2  ;;  %v1997_v3 = vsel %vm1994_vm15, %v1996_v16, %v1992_v60  ;;  %v922_v2 = vadd.f32 %v5839_v47, %v5881_v23 }
 0x184   : > { %v4718_v48 = vpop.eup %4717 }
 0x185   : > { %v1958_v8 = vadd.f32 %v1898_v15, %v884_v22  ;;  %v2079_v33 = vmul.f32 %v4718_v48, %v1982_v34  ;;  %v1094_v22 = vld [vmem:[#allocation4] sm:$0xff]  ;;  %v2035_v15 = vsel %vm2032_vm14, %v2034_v55, %v2030_v10 }
 0x186   : > { %v2078_v30 = vmul.f32 %v2035_v15, %v1094_v22 }
 0x187   : > { %4719 = vtanh.f32 %v1958_v8  ;;  %v5992_v1 = vadd.f32 %v2079_v33, %v2077_v62 }
 0x189   : > { %v1899_v53 = vpop.f32.mrf.mxu3 }
 0x18a   : > { %v1886_v59 = vpop.f32.mrf.mxu2 }
 0x18d   : > { %v4720_v57 = vpop.eup %4719 }
 0x18e   : > { %v2080_v41 = vmul.f32 %v4720_v57, %v1997_v3 }
 0x190   : > { %v5997_v19 = vadd.f32 %v2080_v41, %v2078_v30 }
 0x199   : > { %v1923_v20 = vpop.f32.mrf.mxu1 }
 0x19a   : > { %v1910_v27 = vpop.f32.mrf.mxu0 }
 0x19b   : > { %v1924_v8 = vadd.f32 %v1923_v20, %v1910_v27 }
 0x19d   : > { %v1959_v48 = vadd.f32 %v1924_v8, %v903_v0 }
 0x19f   : > { %v4252_v5 = vmul.f32 -1.442695, %v1959_v48 }
 0x1a0   : > { %v1936_v34 = vpop.f32.mrf.mxu2 }
 0x1a1   : > { %4721 = vpow2.f32 %v4252_v5  ;;  %v1925_v33 = vpop.f32.mrf.mxu1 }
 0x1a2   : > { %v1949_v29 = vpop.f32.mrf.mxu3  ;;  %v1912_v21 = vpop.f32.mrf.mxu0 }
 0x1a3   : > { %v1950_v62 = vadd.f32 %v1949_v29, %v1936_v34 }
 0x1a5   : > { %v1960_v58 = vadd.f32 %v1950_v62, %v922_v2 }
 0x1a7   : > { %v4253_v43 = vmul.f32 -1.442695, %v1960_v58  ;;  %v4722_v10 = vpop.eup %4721 }
 0x1a8   : > { %v2045_v55 = vadd.f32 1.0, %v4722_v10  ;;  %v1938_v59 = vpop.f32.mrf.mxu2  ;;  %v7129_v10 = vld [vmem:[#allocation87_spill] sm:$0xff] }
 0x1a9   : > { %4723 = vpow2.f32 %v4253_v43 }
 0x1aa   : > { %v1951_v60 = vpop.f32.mrf.mxu3  ;;  %4725 = vrcp.f32 %v2045_v55  ;;  %v2058_v57 = vand.u32 2147483648, %v2045_v55  ;;  %v2056_v3 = vand.u32 2147483647, %v2045_v55  ;;  %vm2052_vm1 = vweird.f32 %v2045_v55 }
 0x1ac   : > { %v2059_v27 = vor.u32 1.1754944e-38, %v2058_v57  ;;  %vm2057_vm3 = vcmp.eq.f32.partialorder %v2056_v3, 8.507059e+37  ;;  %v7134_v57 = vld [vmem:[#allocation90_spill] sm:$0xff]  ;;  %v7136_v3 = vld [vmem:[#allocation97_spill] sm:$0xff] }
 0x1af   : > { %v4724_v7 = vpop.eup %4723 }
 0x1b0   : > { %v2046_v53 = vadd.f32 1.0, %v4724_v7  ;;  %v4726_v22 = vpop.eup %4725 }
 0x1b1   : > { %v2048_v16 = vmul.f32 %v4726_v22, %v2045_v55  ;;  %vm2053_vm0 = vweird.f32 %v4726_v22  ;;  %v7130_v55 = vld [vmem:[#allocation89_spill] sm:$0xff] }
 0x1b2   : > { %4727 = vrcp.f32 %v2046_v53  ;;  %vm2054_vm2 = vmor %vm2052_vm1, %vm2053_vm0  ;;  %v2073_v29 = vand.u32 2147483648, %v2046_v53  ;;  %v2071_v2 = vand.u32 2147483647, %v2046_v53  ;;  %vm2067_vm5 = vweird.f32 %v2046_v53 }
 0x1b3   : > { %v2049_v15 = vsub.f32 1.0, %v2048_v16  ;;  %4729 = vtanh.f32 %v5992_v1  ;;  %v7131_v16 = vld [vmem:[#allocation91_spill] sm:$0xff] }
 0x1b4   : > { %4731 = vtanh.f32 %v5997_v19  ;;  %v2074_v58 = vor.u32 1.1754944e-38, %v2073_v29  ;;  %vm2072_vm7 = vcmp.eq.f32.partialorder %v2071_v2, 8.507059e+37  ;;  %v7146_v29 = vld [vmem:[#allocation102_spill] sm:$0xff]  ;;  %v7148_v2 = vld [vmem:[#allocation109_spill] sm:$0xff] }
 0x1b5   : > { %v2050_v47 = vmul.f32 %v4726_v22, %v2049_v15  ;;  %v7133_v15 = vld [vmem:[#allocation88_spill] sm:$0xff] }
 0x1b7   : > { %v2051_v41 = vadd.f32 %v4726_v22, %v2050_v47  ;;  %v7135_v47 = vld [vmem:[#allocation95_spill] sm:$0xff] }
 0x1b8   : > { %v4728_v30 = vpop.eup %4727 }
 0x1b9   : > { %v2063_v20 = vmul.f32 %v4728_v30, %v2046_v53  ;;  %v2055_v0 = vsel %vm2054_vm2, %v4726_v22, %v2051_v41  ;;  %v4730_v8 = vpop.eup %4729  ;;  %vm2068_vm4 = vweird.f32 %v4728_v30  ;;  %v7132_v53 = vld [vmem:[#allocation93_spill] sm:$0xff]  ;;  %v7138_v41 = vld [vmem:[#allocation94_spill] sm:$0xff] }
 0x1ba   : > { %v2060_v48 = vsel %vm2057_vm3, %v2059_v27, %v2055_v0  ;;  %vm2069_vm6 = vmor %vm2067_vm5, %vm2068_vm4  ;;  %v4732_v59 = vpop.eup %4731  ;;  %v7139_v27 = vld [vmem:[#allocation99_spill] sm:$0xff]  ;;  %v7141_v0 = vld [vmem:[#allocation96_spill] sm:$0xff] }
 0x1bb   : > { %v2064_v5 = vsub.f32 1.0, %v2063_v20  ;;  %v2085_v34 = vmul.f32 %v4730_v8, %v2060_v48  ;;  %v7140_v20 = vld [vmem:[#allocation101_spill] sm:$0xff]  ;;  %v7142_v8 = vld [vmem:[#allocation98_spill] sm:$0xff]  ;;  %v7143_v48 = vld [vmem:[#allocation103_spill] sm:$0xff] }
 0x1bd   : > { %v2065_v21 = vmul.f32 %v4728_v30, %v2064_v5  ;;  %v6005_v62 = vpack.c.bf16 %v2085_v34, %v2085_v34  ;;  %v7144_v5 = vld [vmem:[#allocation105_spill] sm:$0xff]  ;;  %v7145_v34 = vld [vmem:[#allocation100_spill] sm:$0xff] }
 0x1bf   : > { %v2066_v33 = vadd.f32 %v4728_v30, %v2065_v21  ;;  %2106 = vmatmul.bf16.vlgmr.msra.gmra.mxu0 %v6005_v62  ;;  %2132 = vmatmul.bf16.vlgmr.msra.gmra.mxu2 %v6005_v62  ;;  %v7147_v21 = vld [vmem:[#allocation107_spill] sm:$0xff] }
 0x1c0   : > { %2202 = vmatpush.bf16.msra.mxu0 %v7129_v10  ;;  %2228 = vmatpush.bf16.msra.mxu2 %v7130_v55 }
 0x1c1   : > { %v2070_v43 = vsel %vm2069_vm6, %v4728_v30, %v2066_v33  ;;  %v7137_v30 = vld [vmem:[#allocation92_spill] sm:$0xff] }
 0x1c2   : > { %v2075_v60 = vsel %vm2072_vm7, %v2074_v58, %v2070_v43  ;;  %v7149_v33 = vld [vmem:[#allocation104_spill] sm:$0xff]  ;;  %v7150_v58 = vld [vmem:[#allocation106_spill] sm:$0xff]  ;;  %v7151_v43 = vld [vmem:[#allocation111_spill] sm:$0xff] }
 0x1c3   : > { %v2086_v7 = vmul.f32 %v4732_v59, %v2075_v60  ;;  %v7152_v59 = vld [vmem:[#allocation113_spill] sm:$0xff]  ;;  %v7153_v60 = vld [vmem:[#allocation108_spill] sm:$0xff] }
 0x1c4   : > { %2203 = vmatpush.bf16.msra.mxu0 %v7131_v16  ;;  %2229 = vmatpush.bf16.msra.mxu2 %v7132_v53 }
 0x1c5   : > { %v6011_v22 = vpack.c.bf16 %v2086_v7, %v2086_v7  ;;  %v7154_v7 = vld [vmem:[#allocation110_spill] sm:$0xff] }
 0x1c7   : > { %2119 = vmatmul.bf16.vlgmr.msra.gmra.mxu1 %v6011_v22  ;;  %2145 = vmatmul.bf16.vlgmr.msra.gmra.mxu3 %v6011_v22 }
 0x1c8   : > { %2215 = vmatpush.bf16.msra.mxu1 %v7133_v15  ;;  %2241 = vmatpush.bf16.msra.mxu3 %v7134_v57 }
 0x1c9   : > { %2204 = vmatpush.bf16.msra.mxu0 %v7135_v47  ;;  %2230 = vmatpush.bf16.msra.mxu2 %v7136_v3 }
 0x1cc   : > { %2216 = vmatpush.bf16.msra.mxu1 %v7137_v30  ;;  %2242 = vmatpush.bf16.msra.mxu3 %v7138_v41 }
 0x1cd   : > { %2205 = vmatpush.bf16.msra.mxu0 %v7139_v27  ;;  %2231 = vmatpush.bf16.msra.mxu2 %v7140_v20 }
 0x1cf   : > { %2158 = vmatmul.bf16.vlgmr.msrb.gmra.mxu0 %v6005_v62  ;;  %2184 = vmatmul.bf16.vlgmr.msrb.gmra.mxu2 %v6005_v62 }
 0x1d0   : > { %2217 = vmatpush.bf16.msra.mxu1 %v7141_v0  ;;  %2243 = vmatpush.bf16.msra.mxu3 %v7142_v8 }
 0x1d1   : > { %2206 = vmatpush.bf16.msra.mxu0 %v7143_v48  ;;  %2232 = vmatpush.bf16.msra.mxu2 %v7144_v5  ;;  %v7159_v5 = vld [vmem:[#allocation112_spill] sm:$0xff] }
 0x1d4   : > { %2218 = vmatpush.bf16.msra.mxu1 %v7145_v34  ;;  %2244 = vmatpush.bf16.msra.mxu3 %v7146_v29  ;;  %v7155_v29 = vld [vmem:[#allocation115_spill] sm:$0xff]  ;;  %v7158_v34 = vld [vmem:[#allocation121_spill] sm:$0xff] }
 0x1d5   : > { %2207 = vmatpush.bf16.msra.mxu0 %v7147_v21  ;;  %2233 = vmatpush.bf16.msra.mxu2 %v7148_v2  ;;  %v7156_v21 = vld [vmem:[#allocation117_spill] sm:$0xff]  ;;  %v7157_v2 = vld [vmem:[#allocation119_spill] sm:$0xff] }
 0x1d7   : > { %2171 = vmatmul.bf16.vlgmr.msrb.gmra.mxu1 %v6011_v22  ;;  %2197 = vmatmul.bf16.vlgmr.msrb.gmra.mxu3 %v6011_v22 }
 0x1d8   : > { %2219 = vmatpush.bf16.msra.mxu1 %v7149_v33  ;;  %2245 = vmatpush.bf16.msra.mxu3 %v7150_v58  ;;  %v7160_v33 = vld [vmem:[#allocation114_spill] sm:$0xff] }
 0x1d9   : > { %2208 = vmatpush.bf16.msra.mxu0 %v7151_v43  ;;  %2234 = vmatpush.bf16.msra.mxu2 %v7152_v59  ;;  %v7161_v59 = vld [vmem:[#allocation123_spill] sm:$0xff]  ;;  %v7178_v43 = vld [vmem:[#allocation134_spill] sm:$0xff] }
 0x1dc   : > { %2220 = vmatpush.bf16.msra.mxu1 %v7153_v60  ;;  %2246 = vmatpush.bf16.msra.mxu3 %v7154_v7  ;;  %v7162_v60 = vld [vmem:[#allocation125_spill] sm:$0xff]  ;;  %v7163_v7 = vld [vmem:[#allocation116_spill] sm:$0xff] }
 0x1dd   : > { %2209 = vmatpush.bf16.msra.mxu0 %v7155_v29  ;;  %2235 = vmatpush.bf16.msra.mxu2 %v7156_v21  ;;  %v7164_v29 = vld [vmem:[#allocation118_spill] sm:$0xff]  ;;  %v7165_v21 = vld [vmem:[#allocation120_spill] sm:$0xff] }
 0x1e0   : > { %2221 = vmatpush.bf16.msra.mxu1 %v7159_v5  ;;  %2247 = vmatpush.bf16.msra.mxu3 %v7160_v33  ;;  %v7168_v5 = vld [vmem:[#allocation129_spill] sm:$0xff]  ;;  %v7169_v33 = vld [vmem:[#allocation124_spill] sm:$0xff] }
 0x1e1   : > { %2254 = vmatpush.bf16.msrb.mxu0 %v7157_v2  ;;  %2280 = vmatpush.bf16.msrb.mxu2 %v7158_v34  ;;  %v7166_v2 = vld [vmem:[#allocation122_spill] sm:$0xff]  ;;  %v7167_v34 = vld [vmem:[#allocation127_spill] sm:$0xff] }
 0x1e2   : > { %2210 = vmatmul.bf16.vlgmr.msra.gmra.mxu0 %v6005_v62  ;;  %2236 = vmatmul.bf16.vlgmr.msra.gmra.mxu2 %v6005_v62 }
 0x1e4   : > { %2222 = vmatpush.bf16.msra.mxu1 %v7163_v7  ;;  %2248 = vmatpush.bf16.msra.mxu3 %v7164_v29  ;;  %v7172_v7 = vld [vmem:[#allocation133_spill] sm:$0xff]  ;;  %v7173_v29 = vld [vmem:[#allocation128_spill] sm:$0xff] }
 0x1e5   : > { %2255 = vmatpush.bf16.msrb.mxu0 %v7161_v59  ;;  %2281 = vmatpush.bf16.msrb.mxu2 %v7162_v60  ;;  %v7170_v59 = vld [vmem:[#allocation126_spill] sm:$0xff]  ;;  %v7171_v60 = vld [vmem:[#allocation131_spill] sm:$0xff] }
 0x1e7   : > { %2223 = vmatmul.bf16.vlgmr.msra.gmra.mxu1 %v6011_v22  ;;  %2249 = vmatmul.bf16.vlgmr.msra.gmra.mxu3 %v6011_v22 }
 0x1e8   : > { %2267 = vmatpush.bf16.msrb.mxu1 %v7165_v21  ;;  %2293 = vmatpush.bf16.msrb.mxu3 %v7166_v2  ;;  %v7174_v21 = vld [vmem:[#allocation130_spill] sm:$0xff]  ;;  %v7175_v2 = vld [vmem:[#allocation135_spill] sm:$0xff] }
 0x1e9   : > { %2256 = vmatpush.bf16.msrb.mxu0 %v7167_v34  ;;  %2282 = vmatpush.bf16.msrb.mxu2 %v7168_v5  ;;  %v7176_v34 = vld [vmem:[#allocation138_spill] sm:$0xff]  ;;  %v7177_v5 = vld [vmem:[#allocation132_spill] sm:$0xff] }
 0x1ec   : > { %2268 = vmatpush.bf16.msrb.mxu1 %v7169_v33  ;;  %2294 = vmatpush.bf16.msrb.mxu3 %v7170_v59  ;;  %v7179_v33 = vld [vmem:[#allocation145_spill] sm:$0xff] }
 0x1ed   : > { %2257 = vmatpush.bf16.msrb.mxu0 %v7171_v60  ;;  %2283 = vmatpush.bf16.msrb.mxu2 %v7172_v7  ;;  %v7180_v59 = vld [vmem:[#allocation137_spill] sm:$0xff] }
 0x1ee   : > { %v7181_v60 = vld [vmem:[#allocation141_spill] sm:$0xff] }
 0x1f0   : > { %2269 = vmatpush.bf16.msrb.mxu1 %v7173_v29  ;;  %2295 = vmatpush.bf16.msrb.mxu3 %v7174_v21  ;;  %v7182_v21 = vld [vmem:[#allocation144_spill] sm:$0xff] }
 0x1f1   : > { %2258 = vmatpush.bf16.msrb.mxu0 %v7175_v2  ;;  %2284 = vmatpush.bf16.msrb.mxu2 %v7176_v34 }
 0x1f4   : > { %2270 = vmatpush.bf16.msrb.mxu1 %v7177_v5  ;;  %2296 = vmatpush.bf16.msrb.mxu3 %v7178_v43 }
 0x1f5   : > { %2259 = vmatpush.bf16.msrb.mxu0 %v5737_v46  ;;  %2285 = vmatpush.bf16.msrb.mxu2 %v7179_v33 }
 0x1f8   : > { %2271 = vmatpush.bf16.msrb.mxu1 %v7180_v59  ;;  %2297 = vmatpush.bf16.msrb.mxu3 %v7181_v60 }
 0x1f9   : > { %2260 = vmatpush.bf16.msrb.mxu0 %v5755_v40  ;;  %2286 = vmatpush.bf16.msrb.mxu2 %v5763_v54 }
 0x1fc   : > { %2272 = vmatpush.bf16.msrb.mxu1 %v7182_v21  ;;  %2298 = vmatpush.bf16.msrb.mxu3 %v5746_v6 }
 0x1fd   : > { %2261 = vmatpush.bf16.msrb.mxu0 %v5777_v42  ;;  %2287 = vmatpush.bf16.msrb.mxu2 %v5783_v4 }
 0x200   : > { %2273 = vmatpush.bf16.msrb.mxu1 %v5761_v45  ;;  %2299 = vmatpush.bf16.msrb.mxu3 %v5768_v28 }
 0x201   : > { %2451 = vmatpush.bf16.msra.mxu0 %v5354_v12  ;;  %2477 = vmatpush.bf16.msra.mxu2 %v5358_v14 }
 0x202   : > { %2262 = vmatmul.bf16.vlgmr.msrb.gmra.mxu0 %v6005_v62  ;;  %2288 = vmatmul.bf16.vlgmr.msrb.gmra.mxu2 %v6005_v62  ;;  %v7183_v62 = vld [vmem:[#allocation40_spill] sm:$0xff] }
 0x204   : > { %2274 = vmatpush.bf16.msrb.mxu1 %v5781_v36  ;;  %2300 = vmatpush.bf16.msrb.mxu3 %v5786_v32 }
 0x205   : > { %2452 = vmatpush.bf16.msra.mxu0 %v5363_v24  ;;  %2478 = vmatpush.bf16.msra.mxu2 %v5369_v26 }
 0x207   : > { %2275 = vmatmul.bf16.vlgmr.msrb.gmra.mxu1 %v6011_v22  ;;  %2301 = vmatmul.bf16.vlgmr.msrb.gmra.mxu3 %v6011_v22  ;;  %v7184_v22 = vld [vmem:[#allocation42_spill] sm:$0xff] }
 0x208   : > { %2464 = vmatpush.bf16.msra.mxu1 %v5356_v13  ;;  %2490 = vmatpush.bf16.msra.mxu3 %v5360_v18  ;;  %v7230_v18 = vld [vmem:[#allocation142_spill] sm:$0xff] }
 0x209   : > { %2453 = vmatpush.bf16.msra.mxu0 %v5375_v37  ;;  %2479 = vmatpush.bf16.msra.mxu2 %v5381_v39 }
 0x20c   : > { %2465 = vmatpush.bf16.msra.mxu1 %v5367_v25  ;;  %2491 = vmatpush.bf16.msra.mxu3 %v5372_v31  ;;  %v7228_v31 = vld [vmem:[#allocation140_spill] sm:$0xff] }
 0x20d   : > { %2454 = vmatpush.bf16.msra.mxu0 %v5391_v50  ;;  %2480 = vmatpush.bf16.msra.mxu2 %v5397_v52  ;;  %v7185_v52 = vld [vmem:[#allocation47_spill] sm:$0xff] }
 0x210   : > { %2466 = vmatpush.bf16.msra.mxu1 %v5379_v38  ;;  %2492 = vmatpush.bf16.msra.mxu3 %v5385_v44  ;;  %v7186_v38 = vld [vmem:[#allocation49_spill] sm:$0xff]  ;;  %v7187_v44 = vld [vmem:[#allocation44_spill] sm:$0xff] }
 0x211   : > { %2455 = vmatpush.bf16.msra.mxu0 %v5403_v61  ;;  %2481 = vmatpush.bf16.msra.mxu2 %v5409_v63  ;;  %v7188_v61 = vld [vmem:[#allocation46_spill] sm:$0xff]  ;;  %v7189_v63 = vld [vmem:[#allocation51_spill] sm:$0xff] }
 0x214   : > { %2467 = vmatpush.bf16.msra.mxu1 %v5395_v51  ;;  %2493 = vmatpush.bf16.msra.mxu3 %v5400_v56  ;;  %v7190_v51 = vld [vmem:[#allocation53_spill] sm:$0xff]  ;;  %v7191_v56 = vld [vmem:[#allocation55_spill] sm:$0xff] }
 0x215   : > { %2456 = vmatpush.bf16.msra.mxu0 %v5415_v9  ;;  %2482 = vmatpush.bf16.msra.mxu2 %v5421_v11  ;;  %v7192_v9 = vld [vmem:[#allocation57_spill] sm:$0xff]  ;;  %v7193_v11 = vld [vmem:[#allocation48_spill] sm:$0xff] }
 0x218   : > { %2468 = vmatpush.bf16.msra.mxu1 %v7183_v62  ;;  %2494 = vmatpush.bf16.msra.mxu3 %v7184_v22  ;;  %v7194_v62 = vld [vmem:[#allocation50_spill] sm:$0xff]  ;;  %v7195_v22 = vld [vmem:[#allocation59_spill] sm:$0xff] }
 0x219   : > { %2457 = vmatpush.bf16.msra.mxu0 %v7185_v52  ;;  %2483 = vmatpush.bf16.msra.mxu2 %v7186_v38  ;;  %v7196_v52 = vld [vmem:[#allocation61_spill] sm:$0xff]  ;;  %v7197_v38 = vld [vmem:[#allocation52_spill] sm:$0xff] }
 0x21c   : > { %2469 = vmatpush.bf16.msra.mxu1 %v7187_v44  ;;  %2495 = vmatpush.bf16.msra.mxu3 %v7188_v61  ;;  %v7198_v44 = vld [vmem:[#allocation54_spill] sm:$0xff]  ;;  %v7199_v61 = vld [vmem:[#allocation56_spill] sm:$0xff] }
 0x21d   : > { %2458 = vmatpush.bf16.msra.mxu0 %v7189_v63  ;;  %2484 = vmatpush.bf16.msra.mxu2 %v7190_v51  ;;  %v7200_v63 = vld [vmem:[#allocation58_spill] sm:$0xff]  ;;  %v7201_v51 = vld [vmem:[#allocation63_spill] sm:$0xff] }
 0x220   : > { %2470 = vmatpush.bf16.msra.mxu1 %v7193_v11  ;;  %2496 = vmatpush.bf16.msra.mxu3 %v7194_v62  ;;  %v7204_v11 = vld [vmem:[#allocation62_spill] sm:$0xff]  ;;  %v7205_v62 = vld [vmem:[#allocation67_spill] sm:$0xff] }
 0x221   : > { %2503 = vmatpush.bf16.msrb.mxu0 %v7191_v56  ;;  %2529 = vmatpush.bf16.msrb.mxu2 %v7192_v9  ;;  %v7202_v56 = vld [vmem:[#allocation65_spill] sm:$0xff]  ;;  %v7203_v9 = vld [vmem:[#allocation60_spill] sm:$0xff] }
 0x224   : > { %2471 = vmatpush.bf16.msra.mxu1 %v7197_v38  ;;  %2497 = vmatpush.bf16.msra.mxu3 %v7198_v44  ;;  %v7208_v38 = vld [vmem:[#allocation66_spill] sm:$0xff]  ;;  %v7209_v44 = vld [vmem:[#allocation71_spill] sm:$0xff] }
 0x225   : > { %2504 = vmatpush.bf16.msrb.mxu0 %v7195_v22  ;;  %2530 = vmatpush.bf16.msrb.mxu2 %v7196_v52  ;;  %v7206_v22 = vld [vmem:[#allocation69_spill] sm:$0xff]  ;;  %v7207_v52 = vld [vmem:[#allocation64_spill] sm:$0xff] }
 0x228   : > { %2516 = vmatpush.bf16.msrb.mxu1 %v7199_v61  ;;  %2542 = vmatpush.bf16.msrb.mxu3 %v7200_v63  ;;  %v7210_v61 = vld [vmem:[#allocation73_spill] sm:$0xff]  ;;  %v7211_v63 = vld [vmem:[#allocation68_spill] sm:$0xff] }
 0x229   : > { %2505 = vmatpush.bf16.msrb.mxu0 %v7201_v51  ;;  %2531 = vmatpush.bf16.msrb.mxu2 %v7202_v56  ;;  %v7212_v51 = vld [vmem:[#allocation70_spill] sm:$0xff]  ;;  %v7213_v56 = vld [vmem:[#allocation75_spill] sm:$0xff] }
 0x22c   : > { %2517 = vmatpush.bf16.msrb.mxu1 %v7203_v9  ;;  %2543 = vmatpush.bf16.msrb.mxu3 %v7204_v11  ;;  %v7214_v9 = vld [vmem:[#allocation77_spill] sm:$0xff]  ;;  %v7215_v11 = vld [vmem:[#allocation72_spill] sm:$0xff] }
 0x22d   : > { %2506 = vmatpush.bf16.msrb.mxu0 %v7205_v62  ;;  %2532 = vmatpush.bf16.msrb.mxu2 %v7206_v22  ;;  %v7216_v62 = vld [vmem:[#allocation74_spill] sm:$0xff]  ;;  %v7217_v22 = vld [vmem:[#allocation79_spill] sm:$0xff] }
 0x230   : > { %2518 = vmatpush.bf16.msrb.mxu1 %v7207_v52  ;;  %2544 = vmatpush.bf16.msrb.mxu3 %v7208_v38  ;;  %v7218_v52 = vld [vmem:[#allocation81_spill] sm:$0xff]  ;;  %v7219_v38 = vld [vmem:[#allocation76_spill] sm:$0xff] }
 0x231   : > { %2507 = vmatpush.bf16.msrb.mxu0 %v7209_v44  ;;  %2533 = vmatpush.bf16.msrb.mxu2 %v7210_v61  ;;  %v7220_v44 = vld [vmem:[#allocation78_spill] sm:$0xff]  ;;  %v7221_v61 = vld [vmem:[#allocation83_spill] sm:$0xff] }
 0x234   : > { %2519 = vmatpush.bf16.msrb.mxu1 %v7211_v63  ;;  %2545 = vmatpush.bf16.msrb.mxu3 %v7212_v51  ;;  %v7222_v63 = vld [vmem:[#allocation85_spill] sm:$0xff]  ;;  %v7223_v51 = vld [vmem:[#allocation80_spill] sm:$0xff] }
 0x235   : > { %2508 = vmatpush.bf16.msrb.mxu0 %v7213_v56  ;;  %2534 = vmatpush.bf16.msrb.mxu2 %v7214_v9  ;;  %v7224_v56 = vld [vmem:[#allocation82_spill] sm:$0xff]  ;;  %v7225_v9 = vld [vmem:[#allocation84_spill] sm:$0xff] }
 0x238   : > { %2520 = vmatpush.bf16.msrb.mxu1 %v7215_v11  ;;  %2546 = vmatpush.bf16.msrb.mxu3 %v7216_v62  ;;  %v7226_v11 = vld [vmem:[#allocation86_spill] sm:$0xff] }
 0x239   : > { %2509 = vmatpush.bf16.msrb.mxu0 %v7217_v22  ;;  %2535 = vmatpush.bf16.msrb.mxu2 %v7218_v52  ;;  %v7227_v52 = vld [vmem:[#allocation147_spill] sm:$0xff] }
 0x23c   : > { %2521 = vmatpush.bf16.msrb.mxu1 %v7219_v38  ;;  %2547 = vmatpush.bf16.msrb.mxu3 %v7220_v44  ;;  %v2107_v62 = vpop.f32.mrf.mxu0  ;;  %v791_v38 = vadd.f32 %v7228_v31, %v7227_v52 }
 0x23d   : > { %2510 = vmatpush.bf16.msrb.mxu0 %v7221_v61  ;;  %2536 = vmatpush.bf16.msrb.mxu2 %v7222_v63  ;;  %v7229_v63 = vld [vmem:[#allocation148_spill] sm:$0xff] }
 0x240   : > { %2522 = vmatpush.bf16.msrb.mxu1 %v7223_v51  ;;  %2548 = vmatpush.bf16.msrb.mxu3 %v7224_v56  ;;  %v810_v51 = vadd.f32 %v7230_v18, %v7229_v63 }
 0x242   : > { %v2133_v22 = vpop.f32.mrf.mxu2 }
 0x244   : > { %2523 = vmatpush.bf16.msrb.mxu1 %v7225_v9  ;;  %2549 = vmatpush.bf16.msrb.mxu3 %v7226_v11  ;;  %v2120_v50 = vpop.f32.mrf.mxu1  ;;  %v2109_v44 = vpop.f32.mrf.mxu0 }
 0x245   : > { %v2121_v25 = vadd.f32 %v2120_v50, %v2107_v62  ;;  %v7231_v44 = vld [vmem:[#allocation161_spill] sm:$0xff] }
 0x247   : > { %v2306_v39 = vadd.f32 %v2121_v25, %v791_v38  ;;  %v7232_v25 = vld [vmem:[#allocation150_spill] sm:$0xff] }
 0x248   : > { %v829_v38 = vadd.f32 %v7232_v25, %v7231_v44 }
 0x249   : > { %v4254_v61 = vmul.f32 -1.442695, %v2306_v39 }
 0x24a   : > { %v2146_v37 = vpop.f32.mrf.mxu3  ;;  %v2135_v13 = vpop.f32.mrf.mxu2 }
 0x24b   : > { %4733 = vpow2.f32 %v4254_v61  ;;  %v2147_v56 = vadd.f32 %v2146_v37, %v2133_v22 }
 0x24c   : > { %v2122_v9 = vpop.f32.mrf.mxu1  ;;  %v2159_v11 = vpop.f32.mrf.mxu0 }
 0x24d   : > { %v2307_v32 = vadd.f32 %v2147_v56, %v810_v51  ;;  %v7234_v9 = vld [vmem:[#allocation153_spill] sm:$0xff] }
 0x24f   : > { %v4255_v36 = vmul.f32 -1.442695, %v2307_v32 }
 0x251   : > { %v4734_v26 = vpop.eup %4733  ;;  %4735 = vpow2.f32 %v4255_v36 }
 0x252   : > { %v2320_v24 = vadd.f32 1.0, %v4734_v26  ;;  %v2148_v28 = vpop.f32.mrf.mxu3  ;;  %v2185_v50 = vpop.f32.mrf.mxu2  ;;  %v7233_v26 = vld [vmem:[#allocation162_spill] sm:$0xff] }
 0x253   : > { %v848_v28 = vadd.f32 %v7234_v9, %v7233_v26 }
 0x254   : > { %v2172_v31 = vpop.f32.mrf.mxu1  ;;  %4737 = vrcp.f32 %v2320_v24  ;;  %v2161_v62 = vpop.f32.mrf.mxu0  ;;  %vm2327_vm9 = vweird.f32 %v2320_v24 }
 0x255   : > { %v2173_v39 = vadd.f32 %v2172_v31, %v2159_v11 }
 0x257   : > { %v4736_v18 = vpop.eup %4735  ;;  %v2308_v61 = vadd.f32 %v2173_v39, %v829_v38 }
 0x258   : > { %v6159_v37 = vadd.f32 1.0, %v4736_v18 }
 0x259   : > { %v4256_v13 = vmul.f32 -1.442695, %v2308_v61 }
 0x25a   : > { %4739 = vrcp.f32 %v6159_v37  ;;  %v2198_v51 = vpop.f32.mrf.mxu3  ;;  %v6162_v56 = vpop.eup %4737  ;;  %vm2342_vm14 = vweird.f32 %v6159_v37 }
 0x25b   : > { %4741 = vpow2.f32 %v4256_v13  ;;  %v2199_v36 = vadd.f32 %v2198_v51, %v2185_v50  ;;  %v2187_v22 = vpop.f32.mrf.mxu2  ;;  %v2323_v11 = vmul.f32 %v6162_v56, %v2320_v24  ;;  %v7235_v51 = vld [vmem:[#allocation169_spill] sm:$0xff]  ;;  %vm2328_vm8 = vweird.f32 %v6162_v56 }
 0x25c   : > { %v2174_v32 = vpop.f32.mrf.mxu1  ;;  %v867_v9 = vadd.f32 %v7235_v51, %v5852_v49  ;;  %vm6182_vm10 = vmor %vm2327_vm9, %vm2328_vm8 }
 0x25d   : > { %v2309_v25 = vadd.f32 %v2199_v36, %v848_v28  ;;  %v2324_v18 = vsub.f32 1.0, %v2323_v11 }
 0x25f   : > { %v2211_v31 = vpop.f32.mrf.mxu0  ;;  %v4257_v38 = vmul.f32 -1.442695, %v2309_v25  ;;  %v2325_v36 = vmul.f32 %v6162_v56, %v2324_v18 }
 0x260   : > { %v6167_v39 = vpop.eup %4739 }
 0x261   : > { %v4742_v62 = vpop.eup %4741  ;;  %4743 = vpow2.f32 %v4257_v38  ;;  %v2338_v63 = vmul.f32 %v6167_v39, %v6159_v37  ;;  %v2331_v38 = vand.u32 2147483647, %v2320_v24  ;;  %v2326_v52 = vadd.f32 %v6162_v56, %v2325_v36 }
 0x262   : > { %v2358_v61 = vadd.f32 1.0, %v4742_v62  ;;  %v2200_v44 = vpop.f32.mrf.mxu3  ;;  %vm2343_vm12 = vweird.f32 %v6167_v39 }
 0x263   : > { %v2339_v25 = vsub.f32 1.0, %v2338_v63  ;;  %v2333_v44 = vand.u32 2147483648, %v2320_v24  ;;  %vm6186_vm11 = vcmp.eq.f32.partialorder %v2331_v38, 8.507059e+37  ;;  %v2346_v38 = vand.u32 2147483647, %v6159_v37  ;;  %vm6203_vm0 = vmor %vm2342_vm14, %vm2343_vm12 }
 0x264   : > { %4745 = vrcp.f32 %v2358_v61  ;;  %v2224_v50 = vpop.f32.mrf.mxu1  ;;  %v2371_v49 = vand.u32 2147483648, %v2358_v61  ;;  %vm2365_vm15 = vweird.f32 %v2358_v61 }
 0x265   : > { %v2237_v13 = vpop.f32.mrf.mxu2  ;;  %v2225_v28 = vadd.f32 %v2224_v50, %v2211_v31  ;;  %v2340_v18 = vmul.f32 %v6167_v39, %v2339_v25  ;;  %v7236_v50 = vld [vmem:[#allocation170_spill] sm:$0xff]  ;;  %v2330_v25 = vsel %vm6182_vm10, %v6162_v56, %v2326_v52  ;;  %vm2347_vm3 = vcmp.eq.f32.partialorder %v2346_v38, 8.507059e+37 }
 0x266   : > { %v886_v63 = vadd.f32 %v7236_v50, %v5859_v17  ;;  %v7270_v17 = vld [vmem:[#allocation126_spill] sm:$0xff] }
 0x267   : > { %v2213_v32 = vpop.f32.mrf.mxu0  ;;  %v4744_v22 = vpop.eup %4743  ;;  %v2310_v11 = vadd.f32 %v2225_v28, %v867_v9 }
 0x268   : > { %v6174_v26 = vadd.f32 1.0, %v4744_v22  ;;  %v2334_v22 = vor.u32 1.1754944e-38, %v2333_v44  ;;  %v2348_v44 = vand.u32 2147483648, %v6159_v37 }
 0x26a   : > { %v4746_v62 = vpop.eup %4745  ;;  %4747 = vrcp.f32 %v6174_v26  ;;  %v2250_v31 = vpop.f32.mrf.mxu3  ;;  %v2335_v56 = vsel %vm6186_vm11, %v2334_v22, %v2330_v25  ;;  %v2386_v36 = vand.u32 2147483648, %v6174_v26  ;;  %v2349_v25 = vor.u32 1.1754944e-38, %v2348_v44 }
 0x26b   : > { %v2361_v45 = vmul.f32 %v4746_v62, %v2358_v61  ;;  %4749 = vtanh.f32 %v2310_v11  ;;  %v2251_v51 = vadd.f32 %v2250_v31, %v2237_v13  ;;  %vm2366_vm13 = vweird.f32 %v4746_v62 }
 0x26c   : > { %v2226_v11 = vpop.f32.mrf.mxu1  ;;  %v2341_v13 = vadd.f32 %v6167_v39, %v2340_v18  ;;  %vm2367_vm1 = vmor %vm2365_vm15, %vm2366_vm13  ;;  %vm2380_vm5 = vweird.f32 %v6174_v26 }
 0x26d   : > { %v2239_v9 = vpop.f32.mrf.mxu2  ;;  %v2362_v28 = vsub.f32 1.0, %v2361_v45  ;;  %v2311_v50 = vadd.f32 %v2251_v51, %v886_v63  ;;  %v2369_v45 = vand.u32 2147483647, %v2358_v61  ;;  %v2372_v51 = vor.u32 1.1754944e-38, %v2371_v49 }
 0x26e   : > { %v2345_v61 = vsel %vm6203_vm0, %v6167_v39, %v2341_v13  ;;  %v2384_v49 = vand.u32 2147483647, %v6174_v26  ;;  %v2387_v13 = vor.u32 1.1754944e-38, %v2386_v36  ;;  %v7244_v36 = vld [vmem:[#allocation174_spill] sm:$0xff] }
 0x26f   : > { %v2363_v24 = vmul.f32 %v4746_v62, %v2362_v28  ;;  %4751 = vtanh.f32 %v2311_v50  ;;  %vm2370_vm2 = vcmp.eq.f32.partialorder %v2369_v45, 8.507059e+37 }
 0x270   : > { %v4748_v31 = vpop.eup %4747  ;;  %vm2385_vm7 = vcmp.eq.f32.partialorder %v2384_v49, 8.507059e+37 }
 0x271   : > { %v4750_v9 = vpop.eup %4749  ;;  %v2376_v52 = vmul.f32 %v4748_v31, %v6174_v26  ;;  %v2364_v63 = vadd.f32 %v4746_v62, %v2363_v24  ;;  %vm2381_vm4 = vweird.f32 %v4748_v31 }
 0x272   : > { %v2432_v28 = vmul.f32 %v4750_v9, %v2335_v56  ;;  %v2252_v11 = vpop.f32.mrf.mxu3  ;;  %vm2382_vm6 = vmor %vm2380_vm5, %vm2381_vm4 }
 0x273   : > { %v2377_v32 = vsub.f32 1.0, %v2376_v52  ;;  %v2368_v37 = vsel %vm2367_vm1, %v4746_v62, %v2364_v63  ;;  %v2350_v52 = vsel %vm2347_vm3, %v2349_v25, %v2345_v61 }
 0x274   : > { %v2373_v22 = vsel %vm2370_vm2, %v2372_v51, %v2368_v37 }
 0x275   : > { %v2378_v50 = vmul.f32 %v4748_v31, %v2377_v32  ;;  %v2430_v24 = vmul.f32 %v2373_v22, %v5992_v1  ;;  %v4752_v9 = vpop.eup %4751  ;;  %v7243_v32 = vld [vmem:[#allocation172_spill] sm:$0xff] }
 0x276   : > { %v2433_v39 = vmul.f32 %v4752_v9, %v2350_v52  ;;  %v905_v37 = vadd.f32 %v7243_v32, %v5877_v35  ;;  %v7269_v35 = vld [vmem:[#allocation124_spill] sm:$0xff] }
 0x277   : > { %v6214_v62 = vadd.f32 %v2432_v28, %v2430_v24  ;;  %v2379_v45 = vadd.f32 %v4748_v31, %v2378_v50 }
 0x279   : > { %v2383_v56 = vsel %vm2382_vm6, %v4748_v31, %v2379_v45  ;;  %v924_v31 = vadd.f32 %v7244_v36, %v5881_v23  ;;  %v7268_v23 = vld [vmem:[#allocation129_spill] sm:$0xff] }
 0x27a   : > { %v2388_v38 = vsel %vm2385_vm7, %v2387_v13, %v2383_v56 }
 0x27b   : > { %v2431_v44 = vmul.f32 %v2388_v38, %v5997_v19 }
 0x27d   : > { %v6217_v18 = vadd.f32 %v2433_v39, %v2431_v44 }
 0x27f   : > { %v2263_v63 = vpop.f32.mrf.mxu0 }
 0x284   : > { %v2276_v1 = vpop.f32.mrf.mxu1 }
 0x285   : > { %v2289_v51 = vpop.f32.mrf.mxu2  ;;  %v2277_v26 = vadd.f32 %v2276_v1, %v2263_v63 }
 0x287   : > { %v2265_v28 = vpop.f32.mrf.mxu0  ;;  %v2312_v61 = vadd.f32 %v2277_v26, %v905_v37 }
 0x289   : > { %v4258_v11 = vmul.f32 -1.442695, %v2312_v61 }
 0x28a   : > { %v2302_v22 = vpop.f32.mrf.mxu3 }
 0x28b   : > { %4753 = vpow2.f32 %v4258_v11  ;;  %v2303_v25 = vadd.f32 %v2302_v22, %v2289_v51 }
 0x28c   : > { %v2278_v50 = vpop.f32.mrf.mxu1 }
 0x28d   : > { %v2291_v19 = vpop.f32.mrf.mxu2  ;;  %v2313_v24 = vadd.f32 %v2303_v25, %v924_v31 }
 0x28f   : > { %v4259_v49 = vmul.f32 -1.442695, %v2313_v24 }
 0x291   : > { %v4754_v9 = vpop.eup %4753  ;;  %4755 = vpow2.f32 %v4259_v49 }
 0x292   : > { %v2398_v52 = vadd.f32 1.0, %v4754_v9  ;;  %v2304_v45 = vpop.f32.mrf.mxu3 }
 0x294   : > { %4757 = vrcp.f32 %v2398_v52  ;;  %v2411_v63 = vand.u32 2147483648, %v2398_v52  ;;  %v2409_v51 = vand.u32 2147483647, %v2398_v52  ;;  %vm2405_vm9 = vweird.f32 %v2398_v52 }
 0x296   : > { %v2412_v28 = vor.u32 1.1754944e-38, %v2411_v63  ;;  %vm2410_vm11 = vcmp.eq.f32.partialorder %v2409_v51, 8.507059e+37  ;;  %v7247_v63 = vld [vmem:[#allocation102_spill] sm:$0xff]  ;;  %v7249_v51 = vld [vmem:[#allocation109_spill] sm:$0xff] }
 0x297   : > { %v4756_v39 = vpop.eup %4755 }
 0x298   : > { %v2399_v13 = vadd.f32 1.0, %v4756_v39 }
 0x29a   : > { %v4758_v56 = vpop.eup %4757  ;;  %4759 = vrcp.f32 %v2399_v13  ;;  %v2426_v31 = vand.u32 2147483648, %v2399_v13  ;;  %v2424_v19 = vand.u32 2147483647, %v2399_v13  ;;  %vm2420_vm13 = vweird.f32 %v2399_v13 }
 0x29b   : > { %v2401_v38 = vmul.f32 %v4758_v56, %v2398_v52  ;;  %4761 = vtanh.f32 %v6214_v62  ;;  %vm2406_vm8 = vweird.f32 %v4758_v56 }
 0x29c   : > { %vm2407_vm10 = vmor %vm2405_vm9, %vm2406_vm8  ;;  %4763 = vtanh.f32 %v6217_v18  ;;  %v2427_v9 = vor.u32 1.1754944e-38, %v2426_v31  ;;  %vm2425_vm15 = vcmp.eq.f32.partialorder %v2424_v19, 8.507059e+37  ;;  %v7258_v31 = vld [vmem:[#allocation121_spill] sm:$0xff]  ;;  %v7261_v19 = vld [vmem:[#allocation123_spill] sm:$0xff] }
 0x29d   : > { %v2402_v44 = vsub.f32 1.0, %v2401_v38 }
 0x29f   : > { %v2403_v1 = vmul.f32 %v4758_v56, %v2402_v44  ;;  %v7246_v44 = vld [vmem:[#allocation100_spill] sm:$0xff] }
 0x2a0   : > { %v4760_v32 = vpop.eup %4759 }
 0x2a1   : > { %v2404_v37 = vadd.f32 %v4758_v56, %v2403_v1  ;;  %v2416_v26 = vmul.f32 %v4760_v32, %v2399_v13  ;;  %v4762_v22 = vpop.eup %4761  ;;  %vm2421_vm12 = vweird.f32 %v4760_v32  ;;  %v7245_v13 = vld [vmem:[#allocation105_spill] sm:$0xff]  ;;  %v7248_v1 = vld [vmem:[#allocation107_spill] sm:$0xff] }
 0x2a2   : > { %vm2422_vm14 = vmor %vm2420_vm13, %vm2421_vm12  ;;  %v4764_v45 = vpop.eup %4763 }
 0x2a3   : > { %v2408_v61 = vsel %vm2407_vm10, %v4758_v56, %v2404_v37  ;;  %v2417_v11 = vsub.f32 1.0, %v2416_v26  ;;  %v7251_v37 = vld [vmem:[#allocation111_spill] sm:$0xff]  ;;  %v7252_v26 = vld [vmem:[#allocation113_spill] sm:$0xff] }
 0x2a4   : > { %v2413_v36 = vsel %vm2410_vm11, %v2412_v28, %v2408_v61  ;;  %v7253_v28 = vld [vmem:[#allocation108_spill] sm:$0xff]  ;;  %v7254_v61 = vld [vmem:[#allocation110_spill] sm:$0xff] }
 0x2a5   : > { %v2438_v25 = vmul.f32 %v4762_v22, %v2413_v36  ;;  %v2418_v50 = vmul.f32 %v4760_v32, %v2417_v11  ;;  %v7255_v11 = vld [vmem:[#allocation115_spill] sm:$0xff]  ;;  %v7256_v22 = vld [vmem:[#allocation117_spill] sm:$0xff] }
 0x2a6   : > { %v7257_v36 = vld [vmem:[#allocation119_spill] sm:$0xff] }
 0x2a7   : > { %v6225_v24 = vpack.c.bf16 %v2438_v25, %v2438_v25  ;;  %v2419_v49 = vadd.f32 %v4760_v32, %v2418_v50  ;;  %v7259_v25 = vld [vmem:[#allocation112_spill] sm:$0xff]  ;;  %v7260_v50 = vld [vmem:[#allocation114_spill] sm:$0xff] }
 0x2a9   : > { %v2423_v52 = vsel %vm2422_vm14, %v4760_v32, %v2419_v49  ;;  %2459 = vmatmul.bf16.vlgmr.msra.gmra.mxu0 %v6225_v24  ;;  %2485 = vmatmul.bf16.vlgmr.msra.gmra.mxu2 %v6225_v24  ;;  %v7250_v32 = vld [vmem:[#allocation104_spill] sm:$0xff]  ;;  %v7262_v49 = vld [vmem:[#allocation125_spill] sm:$0xff] }
 0x2aa   : > { %v2428_v39 = vsel %vm2425_vm15, %v2427_v9, %v2423_v52  ;;  %2555 = vmatpush.bf16.msra.mxu0 %v7129_v10  ;;  %2581 = vmatpush.bf16.msra.mxu2 %v7130_v55  ;;  %v7263_v9 = vld [vmem:[#allocation116_spill] sm:$0xff]  ;;  %v7264_v52 = vld [vmem:[#allocation118_spill] sm:$0xff] }
 0x2ab   : > { %v2439_v56 = vmul.f32 %v4764_v45, %v2428_v39  ;;  %v7265_v45 = vld [vmem:[#allocation120_spill] sm:$0xff]  ;;  %v7266_v39 = vld [vmem:[#allocation122_spill] sm:$0xff] }
 0x2ad   : > { %v6231_v38 = vpack.c.bf16 %v2439_v56, %v2439_v56  ;;  %v7267_v56 = vld [vmem:[#allocation127_spill] sm:$0xff] }
 0x2ae   : > { %2556 = vmatpush.bf16.msra.mxu0 %v7131_v16  ;;  %2582 = vmatpush.bf16.msra.mxu2 %v7132_v53 }
 0x2af   : > { %2472 = vmatmul.bf16.vlgmr.msra.gmra.mxu1 %v6231_v38  ;;  %2498 = vmatmul.bf16.vlgmr.msra.gmra.mxu3 %v6231_v38 }
 0x2b0   : > { %2568 = vmatpush.bf16.msra.mxu1 %v7133_v15  ;;  %2594 = vmatpush.bf16.msra.mxu3 %v7134_v57 }
 0x2b2   : > { %2557 = vmatpush.bf16.msra.mxu0 %v7135_v47  ;;  %2583 = vmatpush.bf16.msra.mxu2 %v7136_v3 }
 0x2b4   : > { %2569 = vmatpush.bf16.msra.mxu1 %v7137_v30  ;;  %2595 = vmatpush.bf16.msra.mxu3 %v7138_v41 }
 0x2b6   : > { %2558 = vmatpush.bf16.msra.mxu0 %v7139_v27  ;;  %2584 = vmatpush.bf16.msra.mxu2 %v7140_v20 }
 0x2b8   : > { %2570 = vmatpush.bf16.msra.mxu1 %v7141_v0  ;;  %2596 = vmatpush.bf16.msra.mxu3 %v7142_v8 }
 0x2b9   : > { %2511 = vmatmul.bf16.vlgmr.msrb.gmra.mxu0 %v6225_v24  ;;  %2537 = vmatmul.bf16.vlgmr.msrb.gmra.mxu2 %v6225_v24 }
 0x2ba   : > { %2559 = vmatpush.bf16.msra.mxu0 %v7143_v48  ;;  %2585 = vmatpush.bf16.msra.mxu2 %v7245_v13 }
 0x2bc   : > { %2571 = vmatpush.bf16.msra.mxu1 %v7246_v44  ;;  %2597 = vmatpush.bf16.msra.mxu3 %v7247_v63 }
 0x2be   : > { %2560 = vmatpush.bf16.msra.mxu0 %v7248_v1  ;;  %2586 = vmatpush.bf16.msra.mxu2 %v7249_v51 }
 0x2bf   : > { %2524 = vmatmul.bf16.vlgmr.msrb.gmra.mxu1 %v6231_v38  ;;  %2550 = vmatmul.bf16.vlgmr.msrb.gmra.mxu3 %v6231_v38 }
 0x2c0   : > { %2572 = vmatpush.bf16.msra.mxu1 %v7250_v32  ;;  %2598 = vmatpush.bf16.msra.mxu3 %v7150_v58 }
 0x2c2   : > { %2561 = vmatpush.bf16.msra.mxu0 %v7251_v37  ;;  %2587 = vmatpush.bf16.msra.mxu2 %v7252_v26 }
 0x2c4   : > { %2573 = vmatpush.bf16.msra.mxu1 %v7253_v28  ;;  %2599 = vmatpush.bf16.msra.mxu3 %v7254_v61 }
 0x2c6   : > { %2562 = vmatpush.bf16.msra.mxu0 %v7255_v11  ;;  %2588 = vmatpush.bf16.msra.mxu2 %v7256_v22 }
 0x2c8   : > { %2574 = vmatpush.bf16.msra.mxu1 %v7259_v25  ;;  %2600 = vmatpush.bf16.msra.mxu3 %v7260_v50 }
 0x2c9   : > { %2563 = vmatmul.bf16.vlgmr.msra.gmra.mxu0 %v6225_v24  ;;  %2589 = vmatmul.bf16.vlgmr.msra.gmra.mxu2 %v6225_v24 }
 0x2ca   : > { %2607 = vmatpush.bf16.msrb.mxu0 %v7257_v36  ;;  %2633 = vmatpush.bf16.msrb.mxu2 %v7258_v31 }
 0x2cc   : > { %2575 = vmatpush.bf16.msra.mxu1 %v7263_v9  ;;  %2601 = vmatpush.bf16.msra.mxu3 %v7264_v52 }
 0x2ce   : > { %2608 = vmatpush.bf16.msrb.mxu0 %v7261_v19  ;;  %2634 = vmatpush.bf16.msrb.mxu2 %v7262_v49  ;;  %v7271_v49 = vld [vmem:[#allocation131_spill] sm:$0xff] }
 0x2cf   : > { %2576 = vmatmul.bf16.vlgmr.msra.gmra.mxu1 %v6231_v38  ;;  %2602 = vmatmul.bf16.vlgmr.msra.gmra.mxu3 %v6231_v38 }
 0x2d0   : > { %2620 = vmatpush.bf16.msrb.mxu1 %v7265_v45  ;;  %2646 = vmatpush.bf16.msrb.mxu3 %v7266_v39  ;;  %v7272_v45 = vld [vmem:[#allocation130_spill] sm:$0xff] }
 0x2d2   : > { %2609 = vmatpush.bf16.msrb.mxu0 %v7267_v56  ;;  %2635 = vmatpush.bf16.msrb.mxu2 %v7268_v23  ;;  %v7348_v23 = vld [vmem:[#allocation176_spill] sm:$0xff] }
 0x2d4   : > { %2621 = vmatpush.bf16.msrb.mxu1 %v7269_v35  ;;  %2647 = vmatpush.bf16.msrb.mxu3 %v7270_v17 }
 0x2d6   : > { %2610 = vmatpush.bf16.msrb.mxu0 %v7271_v49  ;;  %2636 = vmatpush.bf16.msrb.mxu2 %v7172_v7 }
 0x2d8   : > { %2622 = vmatpush.bf16.msrb.mxu1 %v7173_v29  ;;  %2648 = vmatpush.bf16.msrb.mxu3 %v7272_v45 }
 0x2da   : > { %2611 = vmatpush.bf16.msrb.mxu0 %v7175_v2  ;;  %2637 = vmatpush.bf16.msrb.mxu2 %v7176_v34 }
 0x2dc   : > { %2623 = vmatpush.bf16.msrb.mxu1 %v7177_v5  ;;  %2649 = vmatpush.bf16.msrb.mxu3 %v7178_v43 }
 0x2de   : > { %2612 = vmatpush.bf16.msrb.mxu0 %v5737_v46  ;;  %2638 = vmatpush.bf16.msrb.mxu2 %v7179_v33  ;;  %v7273_v33 = vld [vmem:[#allocation151_spill] sm:$0xff] }
 0x2e0   : > { %2624 = vmatpush.bf16.msrb.mxu1 %v7180_v59  ;;  %2650 = vmatpush.bf16.msrb.mxu3 %v7181_v60  ;;  %v7274_v59 = vld [vmem:[#allocation154_spill] sm:$0xff] }
 0x2e2   : > { %2613 = vmatpush.bf16.msrb.mxu0 %v5755_v40  ;;  %2639 = vmatpush.bf16.msrb.mxu2 %v5763_v54  ;;  %v7275_v54 = vld [vmem:[#allocation27_spill] sm:$0xff] }
 0x2e4   : > { %2625 = vmatpush.bf16.msrb.mxu1 %v7182_v21  ;;  %2651 = vmatpush.bf16.msrb.mxu3 %v5746_v6  ;;  %v7276_v21 = vld [vmem:[#allocation29_spill] sm:$0xff]  ;;  %v7277_v6 = vld [vmem:[#allocation158_spill] sm:$0xff] }
 0x2e6   : > { %2614 = vmatpush.bf16.msrb.mxu0 %v5777_v42  ;;  %2640 = vmatpush.bf16.msrb.mxu2 %v5783_v4  ;;  %v7278_v42 = vld [vmem:[#allocation160_spill] sm:$0xff]  ;;  %v7279_v4 = vld [vmem:[#allocation25_spill] sm:$0xff] }
 0x2e8   : > { %2626 = vmatpush.bf16.msrb.mxu1 %v7273_v33  ;;  %2652 = vmatpush.bf16.msrb.mxu3 %v7274_v59  ;;  %v7282_v59 = vld [vmem:[#allocation33_spill] sm:$0xff] }
 0x2e9   : > { %2615 = vmatmul.bf16.vlgmr.msrb.gmra.mxu0 %v6225_v24  ;;  %2641 = vmatmul.bf16.vlgmr.msrb.gmra.mxu2 %v6225_v24  ;;  %v7283_v24 = vld [vmem:[#allocation28_spill] sm:$0xff]  ;;  %v7290_v33 = vld [vmem:[#allocation41_spill] sm:$0xff] }
 0x2ea   : > { %2804 = vmatpush.bf16.msra.mxu0 %v5354_v12  ;;  %2830 = vmatpush.bf16.msra.mxu2 %v5358_v14  ;;  %v7280_v12 = vld [vmem:[#allocation26_spill] sm:$0xff]  ;;  %v7281_v14 = vld [vmem:[#allocation31_spill] sm:$0xff] }
 0x2ec   : > { %2627 = vmatpush.bf16.msrb.mxu1 %v7277_v6  ;;  %2653 = vmatpush.bf16.msrb.mxu3 %v7278_v42  ;;  %v7286_v6 = vld [vmem:[#allocation37_spill] sm:$0xff]  ;;  %v7287_v42 = vld [vmem:[#allocation32_spill] sm:$0xff] }
 0x2ee   : > { %2805 = vmatpush.bf16.msra.mxu0 %v7275_v54  ;;  %2831 = vmatpush.bf16.msra.mxu2 %v7276_v21  ;;  %v7284_v54 = vld [vmem:[#allocation30_spill] sm:$0xff]  ;;  %v7285_v21 = vld [vmem:[#allocation35_spill] sm:$0xff] }
 0x2ef   : > { %2628 = vmatmul.bf16.vlgmr.msrb.gmra.mxu1 %v6231_v38  ;;  %2654 = vmatmul.bf16.vlgmr.msrb.gmra.mxu3 %v6231_v38  ;;  %v7291_v38 = vld [vmem:[#allocation36_spill] sm:$0xff] }
 0x2f0   : > { %2817 = vmatpush.bf16.msra.mxu1 %v7279_v4  ;;  %2843 = vmatpush.bf16.msra.mxu3 %v7280_v12  ;;  %v7288_v4 = vld [vmem:[#allocation34_spill] sm:$0xff]  ;;  %v7289_v12 = vld [vmem:[#allocation39_spill] sm:$0xff] }
 0x2f2   : > { %2806 = vmatpush.bf16.msra.mxu0 %v7281_v14  ;;  %2832 = vmatpush.bf16.msra.mxu2 %v7282_v59  ;;  %v7292_v14 = vld [vmem:[#allocation38_spill] sm:$0xff]  ;;  %v7293_v59 = vld [vmem:[#allocation43_spill] sm:$0xff] }
 0x2f4   : > { %2818 = vmatpush.bf16.msra.mxu1 %v7283_v24  ;;  %2844 = vmatpush.bf16.msra.mxu3 %v7284_v54  ;;  %v7294_v24 = vld [vmem:[#allocation45_spill] sm:$0xff]  ;;  %v7295_v54 = vld [vmem:[#allocation40_spill] sm:$0xff] }
 0x2f6   : > { %2807 = vmatpush.bf16.msra.mxu0 %v7285_v21  ;;  %2833 = vmatpush.bf16.msra.mxu2 %v7286_v6  ;;  %v7296_v21 = vld [vmem:[#allocation42_spill] sm:$0xff]  ;;  %v7297_v6 = vld [vmem:[#allocation47_spill] sm:$0xff] }
 0x2f8   : > { %2819 = vmatpush.bf16.msra.mxu1 %v7287_v42  ;;  %2845 = vmatpush.bf16.msra.mxu3 %v7288_v4  ;;  %v7298_v42 = vld [vmem:[#allocation49_spill] sm:$0xff]  ;;  %v7299_v4 = vld [vmem:[#allocation44_spill] sm:$0xff] }
 0x2fa   : > { %2808 = vmatpush.bf16.msra.mxu0 %v7289_v12  ;;  %2834 = vmatpush.bf16.msra.mxu2 %v7290_v33  ;;  %v7300_v12 = vld [vmem:[#allocation46_spill] sm:$0xff]  ;;  %v7301_v33 = vld [vmem:[#allocation51_spill] sm:$0xff] }
 0x2fc   : > { %2820 = vmatpush.bf16.msra.mxu1 %v7291_v38  ;;  %2846 = vmatpush.bf16.msra.mxu3 %v7292_v14  ;;  %v7302_v38 = vld [vmem:[#allocation53_spill] sm:$0xff]  ;;  %v7303_v14 = vld [vmem:[#allocation55_spill] sm:$0xff] }
 0x2fe   : > { %2809 = vmatpush.bf16.msra.mxu0 %v7293_v59  ;;  %2835 = vmatpush.bf16.msra.mxu2 %v7294_v24  ;;  %v7304_v59 = vld [vmem:[#allocation57_spill] sm:$0xff]  ;;  %v7305_v24 = vld [vmem:[#allocation48_spill] sm:$0xff] }
 0x300   : > { %2821 = vmatpush.bf16.msra.mxu1 %v7295_v54  ;;  %2847 = vmatpush.bf16.msra.mxu3 %v7296_v21  ;;  %v7306_v54 = vld [vmem:[#allocation50_spill] sm:$0xff]  ;;  %v7307_v21 = vld [vmem:[#allocation59_spill] sm:$0xff] }
 0x302   : > { %2810 = vmatpush.bf16.msra.mxu0 %v7297_v6  ;;  %2836 = vmatpush.bf16.msra.mxu2 %v7298_v42  ;;  %v7308_v6 = vld [vmem:[#allocation61_spill] sm:$0xff]  ;;  %v7309_v42 = vld [vmem:[#allocation52_spill] sm:$0xff] }
 0x304   : > { %2822 = vmatpush.bf16.msra.mxu1 %v7299_v4  ;;  %2848 = vmatpush.bf16.msra.mxu3 %v7300_v12  ;;  %v7310_v4 = vld [vmem:[#allocation54_spill] sm:$0xff]  ;;  %v7311_v12 = vld [vmem:[#allocation56_spill] sm:$0xff] }
 0x306   : > { %2811 = vmatpush.bf16.msra.mxu0 %v7301_v33  ;;  %2837 = vmatpush.bf16.msra.mxu2 %v7302_v38  ;;  %v7312_v33 = vld [vmem:[#allocation58_spill] sm:$0xff]  ;;  %v7313_v38 = vld [vmem:[#allocation63_spill] sm:$0xff] }
 0x308   : > { %2823 = vmatpush.bf16.msra.mxu1 %v7305_v24  ;;  %2849 = vmatpush.bf16.msra.mxu3 %v7306_v54  ;;  %v7316_v24 = vld [vmem:[#allocation62_spill] sm:$0xff]  ;;  %v7317_v54 = vld [vmem:[#allocation67_spill] sm:$0xff] }
 0x30a   : > { %2856 = vmatpush.bf16.msrb.mxu0 %v7303_v14  ;;  %2882 = vmatpush.bf16.msrb.mxu2 %v7304_v59  ;;  %v7314_v14 = vld [vmem:[#allocation65_spill] sm:$0xff]  ;;  %v7315_v59 = vld [vmem:[#allocation60_spill] sm:$0xff] }
 0x30c   : > { %2824 = vmatpush.bf16.msra.mxu1 %v7309_v42  ;;  %2850 = vmatpush.bf16.msra.mxu3 %v7310_v4  ;;  %v7320_v42 = vld [vmem:[#allocation66_spill] sm:$0xff]  ;;  %v7321_v4 = vld [vmem:[#allocation71_spill] sm:$0xff] }
 0x30e   : > { %2857 = vmatpush.bf16.msrb.mxu0 %v7307_v21  ;;  %2883 = vmatpush.bf16.msrb.mxu2 %v7308_v6  ;;  %v7318_v21 = vld [vmem:[#allocation69_spill] sm:$0xff]  ;;  %v7319_v6 = vld [vmem:[#allocation64_spill] sm:$0xff] }
 0x310   : > { %2869 = vmatpush.bf16.msrb.mxu1 %v7311_v12  ;;  %2895 = vmatpush.bf16.msrb.mxu3 %v7312_v33  ;;  %v7322_v12 = vld [vmem:[#allocation73_spill] sm:$0xff]  ;;  %v7323_v33 = vld [vmem:[#allocation68_spill] sm:$0xff] }
 0x312   : > { %2858 = vmatpush.bf16.msrb.mxu0 %v7313_v38  ;;  %2884 = vmatpush.bf16.msrb.mxu2 %v7314_v14  ;;  %v7324_v38 = vld [vmem:[#allocation70_spill] sm:$0xff]  ;;  %v7325_v14 = vld [vmem:[#allocation75_spill] sm:$0xff] }
 0x314   : > { %2870 = vmatpush.bf16.msrb.mxu1 %v7315_v59  ;;  %2896 = vmatpush.bf16.msrb.mxu3 %v7316_v24  ;;  %v7326_v59 = vld [vmem:[#allocation77_spill] sm:$0xff]  ;;  %v7327_v24 = vld [vmem:[#allocation72_spill] sm:$0xff] }
 0x316   : > { %2859 = vmatpush.bf16.msrb.mxu0 %v7317_v54  ;;  %2885 = vmatpush.bf16.msrb.mxu2 %v7318_v21  ;;  %v7328_v54 = vld [vmem:[#allocation74_spill] sm:$0xff]  ;;  %v7329_v21 = vld [vmem:[#allocation79_spill] sm:$0xff] }
 0x318   : > { %2871 = vmatpush.bf16.msrb.mxu1 %v7319_v6  ;;  %2897 = vmatpush.bf16.msrb.mxu3 %v7320_v42  ;;  %v7330_v6 = vld [vmem:[#allocation81_spill] sm:$0xff]  ;;  %v7331_v42 = vld [vmem:[#allocation76_spill] sm:$0xff] }
 0x31a   : > { %2860 = vmatpush.bf16.msrb.mxu0 %v7321_v4  ;;  %2886 = vmatpush.bf16.msrb.mxu2 %v7322_v12  ;;  %v7332_v4 = vld [vmem:[#allocation78_spill] sm:$0xff]  ;;  %v7333_v12 = vld [vmem:[#allocation83_spill] sm:$0xff] }
 0x31c   : > { %2872 = vmatpush.bf16.msrb.mxu1 %v7323_v33  ;;  %2898 = vmatpush.bf16.msrb.mxu3 %v7324_v38  ;;  %v7334_v33 = vld [vmem:[#allocation85_spill] sm:$0xff]  ;;  %v7335_v38 = vld [vmem:[#allocation80_spill] sm:$0xff] }
 0x31e   : > { %2861 = vmatpush.bf16.msrb.mxu0 %v7325_v14  ;;  %2887 = vmatpush.bf16.msrb.mxu2 %v7326_v59  ;;  %v7336_v14 = vld [vmem:[#allocation82_spill] sm:$0xff]  ;;  %v7337_v59 = vld [vmem:[#allocation84_spill] sm:$0xff] }
 0x320   : > { %2873 = vmatpush.bf16.msrb.mxu1 %v7327_v24  ;;  %2899 = vmatpush.bf16.msrb.mxu3 %v7328_v54  ;;  %v7338_v24 = vld [vmem:[#allocation86_spill] sm:$0xff] }
 0x322   : > { %2862 = vmatpush.bf16.msrb.mxu0 %v7329_v21  ;;  %2888 = vmatpush.bf16.msrb.mxu2 %v7330_v6 }
 0x324   : > { %2874 = vmatpush.bf16.msrb.mxu1 %v7331_v42  ;;  %2900 = vmatpush.bf16.msrb.mxu3 %v7332_v4  ;;  %v7339_v42 = vld [vmem:[#allocation155_spill] sm:$0xff] }
 0x326   : > { %2863 = vmatpush.bf16.msrb.mxu0 %v7333_v12  ;;  %2889 = vmatpush.bf16.msrb.mxu2 %v7334_v33  ;;  %v2460_v54 = vpop.f32.mrf.mxu0 }
 0x328   : > { %2875 = vmatpush.bf16.msrb.mxu1 %v7335_v38  ;;  %2901 = vmatpush.bf16.msrb.mxu3 %v7336_v14  ;;  %v7340_v38 = vld [vmem:[#allocation156_spill] sm:$0xff] }
 0x32c   : > { %2876 = vmatpush.bf16.msrb.mxu1 %v7337_v59  ;;  %2902 = vmatpush.bf16.msrb.mxu3 %v7338_v24  ;;  %v2473_v21 = vpop.f32.mrf.mxu1  ;;  %v2486_v40 = vpop.f32.mrf.mxu2 }
 0x32d   : > { %v2474_v6 = vadd.f32 %v2473_v21, %v2460_v54 }
 0x32e   : > { %v2462_v60 = vpop.f32.mrf.mxu0 }
 0x32f   : > { %v2659_v46 = vadd.f32 %v2474_v6, %v7339_v42 }
 0x331   : > { %v4260_v4 = vmul.f32 -1.442695, %v2659_v46  ;;  %v7341_v46 = vld [vmem:[#allocation163_spill] sm:$0xff] }
 0x332   : > { %v2499_v43 = vpop.f32.mrf.mxu3 }
 0x333   : > { %4765 = vpow2.f32 %v4260_v4  ;;  %v2500_v12 = vadd.f32 %v2499_v43, %v2486_v40 }
 0x334   : > { %v2475_v33 = vpop.f32.mrf.mxu1  ;;  %v2488_v5 = vpop.f32.mrf.mxu2 }
 0x335   : > { %v2660_v34 = vadd.f32 %v2500_v12, %v7340_v38 }
 0x336   : > { %v2512_v14 = vpop.f32.mrf.mxu0 }
 0x337   : > { %v4261_v2 = vmul.f32 -1.442695, %v2660_v34 }
 0x339   : > { %v4766_v59 = vpop.eup %4765  ;;  %4767 = vpow2.f32 %v4261_v2 }
 0x33a   : > { %v2673_v24 = vadd.f32 1.0, %v4766_v59  ;;  %v2501_v45 = vpop.f32.mrf.mxu3 }
 0x33b   : > { %v7342_v45 = vld [vmem:[#allocation165_spill] sm:$0xff] }
 0x33c   : > { %v2525_v29 = vpop.f32.mrf.mxu1  ;;  %v2538_v7 = vpop.f32.mrf.mxu2  ;;  %4769 = vrcp.f32 %v2673_v24  ;;  %v2684_v17 = vand.u32 2147483647, %v2673_v24  ;;  %vm2680_vm1 = vweird.f32 %v2673_v24 }
 0x33d   : > { %v2526_v60 = vadd.f32 %v2525_v29, %v2512_v14 }
 0x33e   : > { %v2514_v54 = vpop.f32.mrf.mxu0  ;;  %vm6393_vm3 = vcmp.eq.f32.partialorder %v2684_v17, 8.507059e+37 }
 0x33f   : > { %v4768_v21 = vpop.eup %4767  ;;  %v2661_v6 = vadd.f32 %v2526_v60, %v7341_v46 }
 0x340   : > { %v6376_v42 = vadd.f32 1.0, %v4768_v21 }
 0x341   : > { %v4262_v40 = vmul.f32 -1.442695, %v2661_v6 }
 0x342   : > { %4771 = vrcp.f32 %v6376_v42  ;;  %v2551_v5 = vpop.f32.mrf.mxu3  ;;  %v4770_v43 = vpop.eup %4769  ;;  %vm2695_vm6 = vweird.f32 %v6376_v42  ;;  %v2699_v17 = vand.u32 2147483647, %v6376_v42 }
 0x343   : > { %4773 = vpow2.f32 %v4262_v40  ;;  %v2552_v34 = vadd.f32 %v2551_v5, %v2538_v7  ;;  %v2676_v33 = vmul.f32 %v4770_v43, %v2673_v24  ;;  %vm2681_vm0 = vweird.f32 %v4770_v43 }
 0x344   : > { %v2527_v2 = vpop.f32.mrf.mxu1  ;;  %v2540_v4 = vpop.f32.mrf.mxu2  ;;  %vm6389_vm2 = vmor %vm2680_vm1, %vm2681_vm0  ;;  %vm2700_vm11 = vcmp.eq.f32.partialorder %v2699_v17, 8.507059e+37 }
 0x345   : > { %v2662_v12 = vadd.f32 %v2552_v34, %v7342_v45  ;;  %v2677_v60 = vsub.f32 1.0, %v2676_v33 }
 0x346   : > { %v2564_v38 = vpop.f32.mrf.mxu0 }
 0x347   : > { %v4263_v29 = vmul.f32 -1.442695, %v2662_v12  ;;  %v2678_v5 = vmul.f32 %v4770_v43, %v2677_v60  ;;  %v7343_v12 = vld [vmem:[#allocation175_spill] sm:$0xff] }
 0x348   : > { %v6380_v14 = vpop.eup %4771 }
 0x349   : > { %v4774_v59 = vpop.eup %4773  ;;  %4775 = vpow2.f32 %v4263_v29  ;;  %v2691_v46 = vmul.f32 %v6380_v14, %v6376_v42  ;;  %v2686_v29 = vand.u32 2147483648, %v2673_v24  ;;  %vm2696_vm4 = vweird.f32 %v6380_v14 }
 0x34a   : > { %v2711_v54 = vadd.f32 1.0, %v4774_v59  ;;  %v2553_v21 = vpop.f32.mrf.mxu3  ;;  %v2679_v59 = vadd.f32 %v4770_v43, %v2678_v5  ;;  %vm6410_vm8 = vmor %vm2695_vm6, %vm2696_vm4 }
 0x34b   : > { %v2692_v4 = vsub.f32 1.0, %v2691_v46 }
 0x34c   : > { %4777 = vrcp.f32 %v2711_v54  ;;  %v2590_v6 = vpop.f32.mrf.mxu2  ;;  %v2577_v7 = vpop.f32.mrf.mxu1  ;;  %v2722_v24 = vand.u32 2147483647, %v2711_v54  ;;  %vm2718_vm7 = vweird.f32 %v2711_v54 }
 0x34d   : > { %v2578_v40 = vadd.f32 %v2577_v7, %v2564_v38  ;;  %v2693_v38 = vmul.f32 %v6380_v14, %v2692_v4 }
 0x34e   : > { %v2566_v2 = vpop.f32.mrf.mxu0  ;;  %vm2723_vm10 = vcmp.eq.f32.partialorder %v2722_v24, 8.507059e+37 }
 0x34f   : > { %v4776_v34 = vpop.eup %4775  ;;  %v2663_v49 = vadd.f32 %v2578_v40, %v7343_v12  ;;  %v2724_v12 = vand.u32 2147483648, %v2711_v54 }
 0x350   : > { %v6384_v45 = vadd.f32 1.0, %v4776_v34  ;;  %v2687_v34 = vor.u32 1.1754944e-38, %v2686_v29  ;;  %v2701_v29 = vand.u32 2147483648, %v6376_v42 }
 0x352   : > { %v4778_v33 = vpop.eup %4777  ;;  %4779 = vrcp.f32 %v6384_v45  ;;  %v2603_v35 = vpop.f32.mrf.mxu3  ;;  %v2739_v40 = vand.u32 2147483648, %v6384_v45  ;;  %vm2733_vm13 = vweird.f32 %v6384_v45 }
 0x353   : > { %v2714_v21 = vmul.f32 %v4778_v33, %v2711_v54  ;;  %4781 = vtanh.f32 %v2663_v49  ;;  %v2604_v60 = vadd.f32 %v2603_v35, %v2590_v6  ;;  %v2683_v49 = vsel %vm6389_vm2, %v4770_v43, %v2679_v59 }
 0x354   : > { %v2592_v7 = vpop.f32.mrf.mxu2  ;;  %v2579_v5 = vpop.f32.mrf.mxu1  ;;  %vm2719_vm5 = vweird.f32 %v4778_v33  ;;  %v2694_v6 = vadd.f32 %v6380_v14, %v2693_v38 }
 0x355   : > { %v2715_v46 = vsub.f32 1.0, %v2714_v21  ;;  %v2664_v4 = vadd.f32 %v2604_v60, %v7348_v23  ;;  %v2688_v23 = vsel %vm6393_vm3, %v2687_v34, %v2683_v49  ;;  %vm2720_vm9 = vmor %vm2718_vm7, %vm2719_vm5  ;;  %v2725_v60 = vor.u32 1.1754944e-38, %v2724_v12 }
 0x356   : > { %v2698_v54 = vsel %vm6410_vm8, %v6380_v14, %v2694_v6  ;;  %v2702_v49 = vor.u32 1.1754944e-38, %v2701_v29  ;;  %v2737_v12 = vand.u32 2147483647, %v6384_v45  ;;  %v2740_v6 = vor.u32 1.1754944e-38, %v2739_v40 }
 0x357   : > { %v2716_v35 = vmul.f32 %v4778_v33, %v2715_v46  ;;  %4783 = vtanh.f32 %v2664_v4 }
 0x358   : > { %v4780_v21 = vpop.eup %4779  ;;  %vm2738_vm15 = vcmp.eq.f32.partialorder %v2737_v12, 8.507059e+37 }
 0x359   : > { %v4782_v7 = vpop.eup %4781  ;;  %v2729_v43 = vmul.f32 %v4780_v21, %v6384_v45  ;;  %v2717_v59 = vadd.f32 %v4778_v33, %v2716_v35  ;;  %vm2734_vm12 = vweird.f32 %v4780_v21 }
 0x35a   : > { %v2785_v46 = vmul.f32 %v4782_v7, %v2688_v23  ;;  %v2605_v5 = vpop.f32.mrf.mxu3  ;;  %vm2735_vm14 = vmor %vm2733_vm13, %vm2734_vm12 }
 0x35b   : > { %v2730_v2 = vsub.f32 1.0, %v2729_v43  ;;  %v2721_v42 = vsel %vm2720_vm9, %v4778_v33, %v2717_v59  ;;  %v2703_v43 = vsel %vm2700_vm11, %v2702_v49, %v2698_v54  ;;  %v7351_v54 = vld [vmem:[#allocation179_spill] sm:$0xff] }
 0x35c   : > { %v2726_v34 = vsel %vm2723_vm10, %v2725_v60, %v2721_v42 }
 0x35d   : > { %v2731_v4 = vmul.f32 %v4780_v21, %v2730_v2  ;;  %v2783_v35 = vmul.f32 %v2726_v34, %v6214_v62  ;;  %v4784_v7 = vpop.eup %4783 }
 0x35e   : > { %v2786_v14 = vmul.f32 %v4784_v7, %v2703_v43 }
 0x35f   : > { %v6421_v33 = vadd.f32 %v2785_v46, %v2783_v35  ;;  %v2732_v24 = vadd.f32 %v4780_v21, %v2731_v4 }
 0x361   : > { %v2736_v23 = vsel %vm2735_vm14, %v4780_v21, %v2732_v24  ;;  %v7352_v21 = vld [vmem:[#allocation181_spill] sm:$0xff] }
 0x362   : > { %v2741_v17 = vsel %vm2738_vm15, %v2740_v6, %v2736_v23 }
 0x363   : > { %v2784_v29 = vmul.f32 %v2741_v17, %v6217_v18 }
 0x365   : > { %v6424_v38 = vadd.f32 %v2786_v14, %v2784_v29 }
 0x366   : > { %v2616_v59 = vpop.f32.mrf.mxu0 }
 0x36c   : > { %v2629_v62 = vpop.f32.mrf.mxu1  ;;  %v2642_v60 = vpop.f32.mrf.mxu2 }
 0x36d   : > { %v2630_v2 = vadd.f32 %v2629_v62, %v2616_v59 }
 0x36e   : > { %v2618_v42 = vpop.f32.mrf.mxu0 }
 0x36f   : > { %v2665_v45 = vadd.f32 %v2630_v2, %v7351_v54 }
 0x371   : > { %v4264_v46 = vmul.f32 -1.442695, %v2665_v45 }
 0x372   : > { %v2655_v5 = vpop.f32.mrf.mxu3 }
 0x373   : > { %4785 = vpow2.f32 %v4264_v46  ;;  %v2656_v34 = vadd.f32 %v2655_v5, %v2642_v60 }
 0x374   : > { %v2631_v49 = vpop.f32.mrf.mxu1  ;;  %v2644_v40 = vpop.f32.mrf.mxu2 }
 0x375   : > { %v2666_v4 = vadd.f32 %v2656_v34, %v7352_v21 }
 0x377   : > { %v4265_v35 = vmul.f32 -1.442695, %v2666_v4 }
 0x379   : > { %v4786_v12 = vpop.eup %4785  ;;  %4787 = vpow2.f32 %v4265_v35 }
 0x37a   : > { %v2751_v18 = vadd.f32 1.0, %v4786_v12  ;;  %v2657_v7 = vpop.f32.mrf.mxu3 }
 0x37c   : > { %4789 = vrcp.f32 %v2751_v18  ;;  %v2764_v17 = vand.u32 2147483648, %v2751_v18  ;;  %v2762_v59 = vand.u32 2147483647, %v2751_v18  ;;  %vm2758_vm1 = vweird.f32 %v2751_v18 }
 0x37e   : > { %v2765_v42 = vor.u32 1.1754944e-38, %v2764_v17  ;;  %vm2763_vm3 = vcmp.eq.f32.partialorder %v2762_v59, 8.507059e+37  ;;  %v7383_v17 = vld [vmem:[#allocation166_spill] sm:$0xff] }
 0x37f   : > { %v4788_v43 = vpop.eup %4787 }
 0x380   : > { %v2752_v24 = vadd.f32 1.0, %v4788_v43 }
 0x382   : > { %v4790_v14 = vpop.eup %4789  ;;  %4791 = vrcp.f32 %v2752_v24  ;;  %v2779_v34 = vand.u32 2147483648, %v2752_v24  ;;  %v2777_v21 = vand.u32 2147483647, %v2752_v24  ;;  %vm2773_vm5 = vweird.f32 %v2752_v24 }
 0x383   : > { %v2754_v6 = vmul.f32 %v4790_v14, %v2751_v18  ;;  %4793 = vtanh.f32 %v6421_v33  ;;  %vm2759_vm0 = vweird.f32 %v4790_v14 }
 0x384   : > { %vm2760_vm2 = vmor %vm2758_vm1, %vm2759_vm0  ;;  %4795 = vtanh.f32 %v6424_v38  ;;  %v2780_v12 = vor.u32 1.1754944e-38, %v2779_v34  ;;  %vm2778_vm7 = vcmp.eq.f32.partialorder %v2777_v21, 8.507059e+37  ;;  %v7385_v21 = vld [vmem:[#allocation167_spill] sm:$0xff] }
 0x385   : > { %v2755_v23 = vsub.f32 1.0, %v2754_v6 }
 0x387   : > { %v2756_v29 = vmul.f32 %v4790_v14, %v2755_v23  ;;  %v7382_v23 = vld [vmem:[#allocation148_spill] sm:$0xff] }
 0x388   : > { %v4792_v62 = vpop.eup %4791 }
 0x389   : > { %v2757_v60 = vadd.f32 %v4790_v14, %v2756_v29  ;;  %v2769_v2 = vmul.f32 %v4792_v62, %v2752_v24  ;;  %v4794_v46 = vpop.eup %4793  ;;  %vm2774_vm4 = vweird.f32 %v4792_v62  ;;  %v815_v29 = vadd.f32 %v7383_v17, %v7382_v23 }
 0x38a   : > { %vm2775_vm6 = vmor %vm2773_vm5, %vm2774_vm4  ;;  %v4796_v7 = vpop.eup %4795 }
 0x38b   : > { %v2761_v54 = vsel %vm2760_vm2, %v4790_v14, %v2757_v60  ;;  %v2770_v45 = vsub.f32 1.0, %v2769_v2 }
 0x38c   : > { %v2766_v5 = vsel %vm2763_vm3, %v2765_v42, %v2761_v54 }
 0x38d   : > { %v2791_v49 = vmul.f32 %v4794_v46, %v2766_v5  ;;  %v2771_v40 = vmul.f32 %v4792_v62, %v2770_v45 }
 0x38f   : > { %v6430_v4 = vpack.c.bf16 %v2791_v49, %v2791_v49  ;;  %v2772_v35 = vadd.f32 %v4792_v62, %v2771_v40  ;;  %v7384_v40 = vld [vmem:[#allocation161_spill] sm:$0xff] }
 0x391   : > { %v2776_v18 = vsel %vm2775_vm6, %v4792_v62, %v2772_v35  ;;  %2812 = vmatmul.bf16.vlgmr.msra.gmra.mxu0 %v6430_v4  ;;  %2838 = vmatmul.bf16.vlgmr.msra.gmra.mxu2 %v6430_v4 }
 0x392   : > { %v2781_v43 = vsel %vm2778_vm7, %v2780_v12, %v2776_v18  ;;  %2908 = vmatpush.bf16.msra.mxu0 %v7129_v10  ;;  %2934 = vmatpush.bf16.msra.mxu2 %v7130_v55  ;;  %v7353_v10 = vld [vmem:[#allocation125_spill] sm:$0xff]  ;;  %v7354_v55 = vld [vmem:[#allocation120_spill] sm:$0xff] }
 0x393   : > { %v2792_v14 = vmul.f32 %v4796_v7, %v2781_v43 }
 0x395   : > { %v6436_v6 = vpack.c.bf16 %v2792_v14, %v2792_v14 }
 0x396   : > { %2909 = vmatpush.bf16.msra.mxu0 %v7131_v16  ;;  %2935 = vmatpush.bf16.msra.mxu2 %v7132_v53  ;;  %v7355_v16 = vld [vmem:[#allocation129_spill] sm:$0xff]  ;;  %v7356_v53 = vld [vmem:[#allocation124_spill] sm:$0xff] }
 0x397   : > { %2825 = vmatmul.bf16.vlgmr.msra.gmra.mxu1 %v6436_v6  ;;  %2851 = vmatmul.bf16.vlgmr.msra.gmra.mxu3 %v6436_v6 }
 0x398   : > { %2921 = vmatpush.bf16.msra.mxu1 %v7133_v15  ;;  %2947 = vmatpush.bf16.msra.mxu3 %v7134_v57  ;;  %v7357_v15 = vld [vmem:[#allocation126_spill] sm:$0xff]  ;;  %v7358_v57 = vld [vmem:[#allocation131_spill] sm:$0xff] }
 0x39a   : > { %2910 = vmatpush.bf16.msra.mxu0 %v7135_v47  ;;  %2936 = vmatpush.bf16.msra.mxu2 %v7136_v3  ;;  %v7359_v47 = vld [vmem:[#allocation133_spill] sm:$0xff]  ;;  %v7360_v3 = vld [vmem:[#allocation128_spill] sm:$0xff] }
 0x39c   : > { %2922 = vmatpush.bf16.msra.mxu1 %v7137_v30  ;;  %2948 = vmatpush.bf16.msra.mxu3 %v7138_v41  ;;  %v7361_v30 = vld [vmem:[#allocation130_spill] sm:$0xff]  ;;  %v7362_v41 = vld [vmem:[#allocation135_spill] sm:$0xff] }
 0x39e   : > { %2911 = vmatpush.bf16.msra.mxu0 %v7139_v27  ;;  %2937 = vmatpush.bf16.msra.mxu2 %v7140_v20  ;;  %v7363_v27 = vld [vmem:[#allocation138_spill] sm:$0xff]  ;;  %v7364_v20 = vld [vmem:[#allocation132_spill] sm:$0xff] }
 0x3a0   : > { %2923 = vmatpush.bf16.msra.mxu1 %v7141_v0  ;;  %2949 = vmatpush.bf16.msra.mxu3 %v7142_v8  ;;  %v7365_v0 = vld [vmem:[#allocation134_spill] sm:$0xff]  ;;  %v7366_v8 = vld [vmem:[#allocation143_spill] sm:$0xff] }
 0x3a1   : > { %2864 = vmatmul.bf16.vlgmr.msrb.gmra.mxu0 %v6430_v4  ;;  %2890 = vmatmul.bf16.vlgmr.msrb.gmra.mxu2 %v6430_v4 }
 0x3a2   : > { %2912 = vmatpush.bf16.msra.mxu0 %v7143_v48  ;;  %2938 = vmatpush.bf16.msra.mxu2 %v7245_v13  ;;  %v7367_v48 = vld [vmem:[#allocation145_spill] sm:$0xff] }
 0x3a3   : > { %v7369_v13 = vld [vmem:[#allocation141_spill] sm:$0xff] }
 0x3a4   : > { %2924 = vmatpush.bf16.msra.mxu1 %v7246_v44  ;;  %2950 = vmatpush.bf16.msra.mxu3 %v7247_v63  ;;  %v7370_v44 = vld [vmem:[#allocation149_spill] sm:$0xff]  ;;  %v7371_v63 = vld [vmem:[#allocation152_spill] sm:$0xff] }
 0x3a6   : > { %2913 = vmatpush.bf16.msra.mxu0 %v7248_v1  ;;  %2939 = vmatpush.bf16.msra.mxu2 %v7249_v51  ;;  %v7372_v1 = vld [vmem:[#allocation144_spill] sm:$0xff]  ;;  %v7373_v51 = vld [vmem:[#allocation146_spill] sm:$0xff] }
 0x3a7   : > { %2877 = vmatmul.bf16.vlgmr.msrb.gmra.mxu1 %v6436_v6  ;;  %2903 = vmatmul.bf16.vlgmr.msrb.gmra.mxu3 %v6436_v6 }
 0x3a8   : > { %2925 = vmatpush.bf16.msra.mxu1 %v7250_v32  ;;  %2951 = vmatpush.bf16.msra.mxu3 %v7150_v58  ;;  %v7368_v58 = vld [vmem:[#allocation137_spill] sm:$0xff] }
 0x3a9   : > { %v7374_v32 = vld [vmem:[#allocation157_spill] sm:$0xff] }
 0x3aa   : > { %2914 = vmatpush.bf16.msra.mxu0 %v7251_v37  ;;  %2940 = vmatpush.bf16.msra.mxu2 %v7252_v26  ;;  %v7375_v37 = vld [vmem:[#allocation159_spill] sm:$0xff] }
 0x3ab   : > { %v7376_v26 = vld [vmem:[#allocation151_spill] sm:$0xff] }
 0x3ac   : > { %2926 = vmatpush.bf16.msra.mxu1 %v7253_v28  ;;  %2952 = vmatpush.bf16.msra.mxu3 %v7254_v61  ;;  %v7377_v28 = vld [vmem:[#allocation154_spill] sm:$0xff] }
 0x3ad   : > { %v7378_v61 = vld [vmem:[#allocation158_spill] sm:$0xff] }
 0x3ae   : > { %2915 = vmatpush.bf16.msra.mxu0 %v7255_v11  ;;  %2941 = vmatpush.bf16.msra.mxu2 %v7256_v22  ;;  %v7379_v11 = vld [vmem:[#allocation160_spill] sm:$0xff] }
 0x3b0   : > { %2927 = vmatpush.bf16.msra.mxu1 %v7259_v25  ;;  %2953 = vmatpush.bf16.msra.mxu3 %v7260_v50  ;;  %v7380_v25 = vld [vmem:[#allocation147_spill] sm:$0xff]  ;;  %v7381_v50 = vld [vmem:[#allocation164_spill] sm:$0xff] }
 0x3b1   : > { %2916 = vmatmul.bf16.vlgmr.msra.gmra.mxu0 %v6430_v4  ;;  %2942 = vmatmul.bf16.vlgmr.msra.gmra.mxu2 %v6430_v4 }
 0x3b2   : > { %2960 = vmatpush.bf16.msrb.mxu0 %v7257_v36  ;;  %2986 = vmatpush.bf16.msrb.mxu2 %v7258_v31 }
 0x3b4   : > { %2928 = vmatpush.bf16.msra.mxu1 %v7263_v9  ;;  %2954 = vmatpush.bf16.msra.mxu3 %v7264_v52 }
 0x3b6   : > { %2961 = vmatpush.bf16.msrb.mxu0 %v7261_v19  ;;  %2987 = vmatpush.bf16.msrb.mxu2 %v7353_v10  ;;  %v796_v19 = vadd.f32 %v7381_v50, %v7380_v25 }
 0x3b7   : > { %2929 = vmatmul.bf16.vlgmr.msra.gmra.mxu1 %v6436_v6  ;;  %2955 = vmatmul.bf16.vlgmr.msra.gmra.mxu3 %v6436_v6 }
 0x3b8   : > { %2973 = vmatpush.bf16.msrb.mxu1 %v7354_v55  ;;  %2999 = vmatpush.bf16.msrb.mxu3 %v7266_v39  ;;  %v7386_v55 = vld [vmem:[#allocation162_spill] sm:$0xff] }
 0x3ba   : > { %2962 = vmatpush.bf16.msrb.mxu0 %v7267_v56  ;;  %2988 = vmatpush.bf16.msrb.mxu2 %v7355_v16  ;;  %v7387_v16 = vld [vmem:[#allocation168_spill] sm:$0xff] }
 0x3bc   : > { %2974 = vmatpush.bf16.msrb.mxu1 %v7356_v53  ;;  %3000 = vmatpush.bf16.msrb.mxu3 %v7357_v15  ;;  %v853_v53 = vadd.f32 %v7387_v16, %v7386_v55 }
 0x3be   : > { %2963 = vmatpush.bf16.msrb.mxu0 %v7358_v57  ;;  %2989 = vmatpush.bf16.msrb.mxu2 %v7359_v47 }
 0x3c0   : > { %2975 = vmatpush.bf16.msrb.mxu1 %v7360_v3  ;;  %3001 = vmatpush.bf16.msrb.mxu3 %v7361_v30 }
 0x3c2   : > { %2964 = vmatpush.bf16.msrb.mxu0 %v7362_v41  ;;  %2990 = vmatpush.bf16.msrb.mxu2 %v7363_v27 }
 0x3c4   : > { %2976 = vmatpush.bf16.msrb.mxu1 %v7364_v20  ;;  %3002 = vmatpush.bf16.msrb.mxu3 %v7365_v0 }
 0x3c6   : > { %2965 = vmatpush.bf16.msrb.mxu0 %v7366_v8  ;;  %2991 = vmatpush.bf16.msrb.mxu2 %v7367_v48 }
 0x3c8   : > { %2977 = vmatpush.bf16.msrb.mxu1 %v7368_v58  ;;  %3003 = vmatpush.bf16.msrb.mxu3 %v7369_v13 }
 0x3ca   : > { %2966 = vmatpush.bf16.msrb.mxu0 %v7370_v44  ;;  %2992 = vmatpush.bf16.msrb.mxu2 %v7371_v63 }
 0x3cc   : > { %2978 = vmatpush.bf16.msrb.mxu1 %v7372_v1  ;;  %3004 = vmatpush.bf16.msrb.mxu3 %v7373_v51  ;;  %v7388_v1 = vld [vmem:[#allocation171_spill] sm:$0xff]  ;;  %v7389_v51 = vld [vmem:[#allocation180_spill] sm:$0xff] }
 0x3ce   : > { %2967 = vmatpush.bf16.msrb.mxu0 %v7374_v32  ;;  %2993 = vmatpush.bf16.msrb.mxu2 %v7375_v37  ;;  %v872_v32 = vadd.f32 %v7389_v51, %v7388_v1 }
 0x3d0   : > { %2979 = vmatpush.bf16.msrb.mxu1 %v7376_v26  ;;  %3005 = vmatpush.bf16.msrb.mxu3 %v7377_v28 }
 0x3d1   : > { %2968 = vmatmul.bf16.vlgmr.msrb.gmra.mxu0 %v6430_v4  ;;  %2994 = vmatmul.bf16.vlgmr.msrb.gmra.mxu2 %v6430_v4  ;;  %v834_v4 = vadd.f32 %v7385_v21, %v7384_v40 }
 0x3d4   : > { %2980 = vmatpush.bf16.msrb.mxu1 %v7378_v61  ;;  %3006 = vmatpush.bf16.msrb.mxu3 %v7379_v11 }
 0x3d7   : > { %2981 = vmatmul.bf16.vlgmr.msrb.gmra.mxu1 %v6436_v6  ;;  %3007 = vmatmul.bf16.vlgmr.msrb.gmra.mxu3 %v6436_v6 }
 0x40e   : > { %v2813_v22 = vpop.f32.mrf.mxu0 }
 0x414   : > { %v2826_v36 = vpop.f32.mrf.mxu1  ;;  %v2839_v31 = vpop.f32.mrf.mxu2 }
 0x415   : > { %v2827_v9 = vadd.f32 %v2826_v36, %v2813_v22 }
 0x416   : > { %v2815_v52 = vpop.f32.mrf.mxu0 }
 0x417   : > { %v3012_v39 = vadd.f32 %v2827_v9, %v796_v19 }
 0x419   : > { %v4266_v56 = vmul.f32 -1.442695, %v3012_v39 }
 0x41a   : > { %v2852_v24 = vpop.f32.mrf.mxu3 }
 0x41b   : > { %4797 = vpow2.f32 %v4266_v56  ;;  %v2853_v59 = vadd.f32 %v2852_v24, %v2839_v31  ;;  %v7390_v56 = vld [vmem:[#allocation173_spill] sm:$0xff]  ;;  %v7391_v24 = vld [vmem:[#allocation182_spill] sm:$0xff] }
 0x41c   : > { %v2828_v62 = vpop.f32.mrf.mxu1  ;;  %v2841_v60 = vpop.f32.mrf.mxu2  ;;  %v891_v23 = vadd.f32 %v7391_v24, %v7390_v56 }
 0x41d   : > { %v3013_v2 = vadd.f32 %v2853_v59, %v815_v29 }
 0x41e   : > { %v2865_v42 = vpop.f32.mrf.mxu0 }
 0x41f   : > { %v4267_v54 = vmul.f32 -1.442695, %v3013_v2 }
 0x421   : > { %v4798_v45 = vpop.eup %4797  ;;  %4799 = vpow2.f32 %v4267_v54 }
 0x422   : > { %v3026_v46 = vadd.f32 1.0, %v4798_v45  ;;  %v2854_v5 = vpop.f32.mrf.mxu3 }
 0x424   : > { %v2878_v34 = vpop.f32.mrf.mxu1  ;;  %v2891_v49 = vpop.f32.mrf.mxu2  ;;  %4801 = vrcp.f32 %v3026_v46  ;;  %v3037_v31 = vand.u32 2147483647, %v3026_v46  ;;  %v3039_v25 = vand.u32 2147483648, %v3026_v46  ;;  %vm3033_vm9 = vweird.f32 %v3026_v46 }
 0x425   : > { %v2879_v35 = vadd.f32 %v2878_v34, %v2865_v42 }
 0x426   : > { %v2867_v12 = vpop.f32.mrf.mxu0  ;;  %vm6547_vm11 = vcmp.eq.f32.partialorder %v3037_v31, 8.507059e+37  ;;  %v3040_v2 = vor.u32 1.1754944e-38, %v3039_v25  ;;  %v7400_v25 = vld [vmem:[#allocation178_spill] sm:$0xff] }
 0x427   : > { %v4800_v18 = vpop.eup %4799  ;;  %v3014_v7 = vadd.f32 %v2879_v35, %v834_v4 }
 0x428   : > { %v6520_v43 = vadd.f32 1.0, %v4800_v18 }
 0x429   : > { %v4268_v14 = vmul.f32 -1.442695, %v3014_v7 }
 0x42a   : > { %4803 = vrcp.f32 %v6520_v43  ;;  %v2904_v6 = vpop.f32.mrf.mxu3  ;;  %v6523_v10 = vpop.eup %4801  ;;  %vm3048_vm14 = vweird.f32 %v6520_v43  ;;  %v3052_v21 = vand.u32 2147483647, %v6520_v43  ;;  %v3054_v4 = vand.u32 2147483648, %v6520_v43 }
 0x42b   : > { %4805 = vpow2.f32 %v4268_v14  ;;  %v2905_v15 = vadd.f32 %v2904_v6, %v2891_v49  ;;  %v3029_v30 = vmul.f32 %v6523_v10, %v3026_v46  ;;  %vm3034_vm8 = vweird.f32 %v6523_v10 }
 0x42c   : > { %v2880_v57 = vpop.f32.mrf.mxu1  ;;  %v2893_v47 = vpop.f32.mrf.mxu2  ;;  %vm6543_vm10 = vmor %vm3033_vm9, %vm3034_vm8  ;;  %vm3053_vm3 = vcmp.eq.f32.partialorder %v3052_v21, 8.507059e+37 }
 0x42d   : > { %v3015_v3 = vadd.f32 %v2905_v15, %v853_v53  ;;  %v3030_v8 = vsub.f32 1.0, %v3029_v30  ;;  %v3055_v47 = vor.u32 1.1754944e-38, %v3054_v4 }
 0x42e   : > { %v2917_v41 = vpop.f32.mrf.mxu0 }
 0x42f   : > { %v4269_v27 = vmul.f32 -1.442695, %v3015_v3  ;;  %v3031_v26 = vmul.f32 %v6523_v10, %v3030_v8 }
 0x430   : > { %v6528_v20 = vpop.eup %4803 }
 0x431   : > { %v4806_v0 = vpop.eup %4805  ;;  %4807 = vpow2.f32 %v4269_v27  ;;  %v3044_v13 = vmul.f32 %v6528_v20, %v6520_v43  ;;  %v3032_v19 = vadd.f32 %v6523_v10, %v3031_v26  ;;  %vm3049_vm12 = vweird.f32 %v6528_v20  ;;  %v7399_v26 = vld [vmem:[#allocation183_spill] sm:$0xff] }
 0x432   : > { %v3064_v48 = vadd.f32 1.0, %v4806_v0  ;;  %v2906_v58 = vpop.f32.mrf.mxu3  ;;  %vm6564_vm0 = vmor %vm3048_vm14, %vm3049_vm12 }
 0x433   : > { %v3045_v11 = vsub.f32 1.0, %v3044_v13  ;;  %v3036_v45 = vsel %vm6543_vm10, %v6523_v10, %v3032_v19 }
 0x434   : > { %4809 = vrcp.f32 %v3064_v48  ;;  %v2943_v44 = vpop.f32.mrf.mxu2  ;;  %v2930_v63 = vpop.f32.mrf.mxu1  ;;  %v3077_v54 = vand.u32 2147483648, %v3064_v48  ;;  %v3075_v34 = vand.u32 2147483647, %v3064_v48  ;;  %vm3071_vm15 = vweird.f32 %v3064_v48 }
 0x435   : > { %v2931_v37 = vadd.f32 %v2930_v63, %v2917_v41  ;;  %v3046_v39 = vmul.f32 %v6528_v20, %v3045_v11  ;;  %v3041_v18 = vsel %vm6547_vm11, %v3040_v2, %v3036_v45 }
 0x436   : > { %v2919_v28 = vpop.f32.mrf.mxu0  ;;  %v3078_v6 = vor.u32 1.1754944e-38, %v3077_v54  ;;  %vm3076_vm2 = vcmp.eq.f32.partialorder %v3075_v34, 8.507059e+37 }
 0x437   : > { %v4808_v61 = vpop.eup %4807  ;;  %v3016_v36 = vadd.f32 %v2931_v37, %v872_v32  ;;  %v3047_v49 = vadd.f32 %v6528_v20, %v3046_v39  ;;  %v7398_v37 = vld [vmem:[#allocation177_spill] sm:$0xff] }
 0x438   : > { %v6535_v22 = vadd.f32 1.0, %v4808_v61  ;;  %v910_v28 = vadd.f32 %v7399_v26, %v7398_v37 }
 0x439   : > { %v3051_v16 = vsel %vm6564_vm0, %v6528_v20, %v3047_v49 }
 0x43a   : > { %v4810_v50 = vpop.eup %4809  ;;  %4811 = vrcp.f32 %v6535_v22  ;;  %v2956_v52 = vpop.f32.mrf.mxu3  ;;  %v3092_v15 = vand.u32 2147483648, %v6535_v22  ;;  %v3090_v41 = vand.u32 2147483647, %v6535_v22  ;;  %v3056_v0 = vsel %vm3053_vm3, %v3055_v47, %v3051_v16 }
 0x43b   : > { %v3067_v9 = vmul.f32 %v4810_v50, %v3064_v48  ;;  %4813 = vtanh.f32 %v3016_v36  ;;  %v2957_v17 = vadd.f32 %v2956_v52, %v2943_v44  ;;  %vm3072_vm13 = vweird.f32 %v4810_v50 }
 0x43c   : > { %v2945_v29 = vpop.f32.mrf.mxu2  ;;  %v2932_v42 = vpop.f32.mrf.mxu1  ;;  %vm3073_vm1 = vmor %vm3071_vm15, %vm3072_vm13  ;;  %vm3086_vm5 = vweird.f32 %v6535_v22  ;;  %v3093_v20 = vor.u32 1.1754944e-38, %v3092_v15  ;;  %vm3091_vm7 = vcmp.eq.f32.partialorder %v3090_v41, 8.507059e+37 }
 0x43d   : > { %v3068_v59 = vsub.f32 1.0, %v3067_v9  ;;  %v3017_v5 = vadd.f32 %v2957_v17, %v891_v23 }
 0x43f   : > { %v3069_v46 = vmul.f32 %v4810_v50, %v3068_v59  ;;  %4815 = vtanh.f32 %v3017_v5 }
 0x440   : > { %v4812_v40 = vpop.eup %4811 }
 0x441   : > { %v4814_v35 = vpop.eup %4813  ;;  %v3082_v12 = vmul.f32 %v4812_v40, %v6535_v22  ;;  %v3070_v7 = vadd.f32 %v4810_v50, %v3069_v46  ;;  %vm3087_vm4 = vweird.f32 %v4812_v40 }
 0x442   : > { %v3138_v10 = vmul.f32 %v4814_v35, %v3041_v18  ;;  %v2958_v53 = vpop.f32.mrf.mxu3  ;;  %vm3088_vm6 = vmor %vm3086_vm5, %vm3087_vm4 }
 0x443   : > { %v3083_v55 = vsub.f32 1.0, %v3082_v12  ;;  %v3074_v43 = vsel %vm3073_vm1, %v4810_v50, %v3070_v7  ;;  %v7401_v50 = vld [vmem:[#allocation184_spill] sm:$0xff] }
 0x444   : > { %v3079_v57 = vsel %vm3076_vm2, %v3078_v6, %v3074_v43  ;;  %v929_v19 = vadd.f32 %v7401_v50, %v7400_v25 }
 0x445   : > { %v3084_v3 = vmul.f32 %v4812_v40, %v3083_v55  ;;  %v3136_v30 = vmul.f32 %v3079_v57, %v6421_v33  ;;  %v4816_v27 = vpop.eup %4815 }
 0x446   : > { %v3139_v58 = vmul.f32 %v4816_v27, %v3056_v0 }
 0x447   : > { %v3140_v8 = vadd.f32 %v3138_v10, %v3136_v30  ;;  %v3085_v48 = vadd.f32 %v4812_v40, %v3084_v3 }
 0x449   : > { %3148 = vst [vmem:[#allocation4 + $0x8] sm:$0xff] %v3140_v8  ;;  %v3089_v13 = vsel %vm3088_vm6, %v4812_v40, %v3085_v48 }
 0x44a   : > { %v3094_v44 = vsel %vm3091_vm7, %v3093_v20, %v3089_v13 }
 0x44b   : > { %v3137_v63 = vmul.f32 %v3094_v44, %v6424_v38 }
 0x44d   : > { %v3141_v51 = vadd.f32 %v3139_v58, %v3137_v63 }
 0x44e   : > { %v2969_v1 = vpop.f32.mrf.mxu0 }
 0x44f   : > { %3149 = vst [vmem:[#allocation4] sm:$0xff] %v3141_v51 }
 0x454   : > { %v2982_v33 = vpop.f32.mrf.mxu1  ;;  %v2995_v32 = vpop.f32.mrf.mxu2 }
 0x455   : > { %v2983_v61 = vadd.f32 %v2982_v33, %v2969_v1 }
 0x456   : > { %v2971_v11 = vpop.f32.mrf.mxu0 }
 0x457   : > { %v3018_v22 = vadd.f32 %v2983_v61, %v910_v28 }
 0x459   : > { %v4270_v36 = vmul.f32 -1.442695, %v3018_v22 }
 0x45a   : > { %v3008_v31 = vpop.f32.mrf.mxu3 }
 0x45b   : > { %4817 = vpow2.f32 %v4270_v36  ;;  %v3009_v9 = vadd.f32 %v3008_v31, %v2995_v32 }
 0x45c   : > { %v2984_v52 = vpop.f32.mrf.mxu1  ;;  %v2997_v38 = vpop.f32.mrf.mxu2 }
 0x45d   : > { %v3019_v39 = vadd.f32 %v3009_v9, %v929_v19 }
 0x45f   : > { %v4271_v56 = vmul.f32 -1.442695, %v3019_v39 }
 0x461   : > { %v4818_v24 = vpop.eup %4817  ;;  %4819 = vpow2.f32 %v4271_v56 }
 0x462   : > { %v3104_v23 = vadd.f32 1.0, %v4818_v24  ;;  %v3010_v17 = vpop.f32.mrf.mxu3 }
 0x464   : > { %4821 = vrcp.f32 %v3104_v23  ;;  %v3117_v42 = vand.u32 2147483648, %v3104_v23  ;;  %v3115_v45 = vand.u32 2147483647, %v3104_v23  ;;  %vm3111_vm9 = vweird.f32 %v3104_v23 }
 0x466   : > { %v3118_v49 = vor.u32 1.1754944e-38, %v3117_v42  ;;  %vm3116_vm11 = vcmp.eq.f32.partialorder %v3115_v45, 8.507059e+37 }
 0x467   : > { %v4820_v29 = vpop.eup %4819 }
 0x468   : > { %v3105_v59 = vadd.f32 1.0, %v4820_v29 }
 0x46a   : > { %v4822_v62 = vpop.eup %4821  ;;  %4823 = vrcp.f32 %v3105_v59  ;;  %v3132_v12 = vand.u32 2147483648, %v3105_v59  ;;  %v3130_v14 = vand.u32 2147483647, %v3105_v59  ;;  %vm3126_vm13 = vweird.f32 %v3105_v59 }
 0x46b   : > { %v3107_v60 = vmul.f32 %v4822_v62, %v3104_v23  ;;  %4825 = vtanh.f32 %v3140_v8  ;;  %vm3112_vm8 = vweird.f32 %v4822_v62 }
 0x46c   : > { %vm3113_vm10 = vmor %vm3111_vm9, %vm3112_vm8  ;;  %4827 = vtanh.f32 %v3141_v51  ;;  %v3133_v10 = vor.u32 1.1754944e-38, %v3132_v12  ;;  %vm3131_vm15 = vcmp.eq.f32.partialorder %v3130_v14, 8.507059e+37 }
 0x46d   : > { %v3108_v2 = vsub.f32 1.0, %v3107_v60 }
 0x46f   : > { %v3109_v54 = vmul.f32 %v4822_v62, %v3108_v2 }
 0x470   : > { %v4824_v5 = vpop.eup %4823 }
 0x471   : > { %v3110_v46 = vadd.f32 %v4822_v62, %v3109_v54  ;;  %v3122_v34 = vmul.f32 %v4824_v5, %v3105_v59  ;;  %v4826_v4 = vpop.eup %4825  ;;  %vm3127_vm12 = vweird.f32 %v4824_v5 }
 0x472   : > { %vm3128_vm14 = vmor %vm3126_vm13, %vm3127_vm12  ;;  %v4828_v43 = vpop.eup %4827 }
 0x473   : > { %v3114_v40 = vsel %vm3113_vm10, %v4822_v62, %v3110_v46  ;;  %v3123_v21 = vsub.f32 1.0, %v3122_v34 }
 0x474   : > { %v3119_v35 = vsel %vm3116_vm11, %v3118_v49, %v3114_v40 }
 0x475   : > { %v3144_v18 = vmul.f32 %v4826_v4, %v3119_v35  ;;  %v3124_v7 = vmul.f32 %v4824_v5, %v3123_v21 }
 0x477   : > { %3146 = vst [vmem:[#allocation3] sm:$0xff] %v3144_v18  ;;  %v3125_v6 = vadd.f32 %v4824_v5, %v3124_v7 }
 0x479   : > { %v3129_v55 = vsel %vm3128_vm14, %v4824_v5, %v3125_v6  ;;  %3153 = sbr.rel (%p4272_p1) target bundleno = 1317 (0x525), region = 72 }
 0x47a   : > { %v3134_v16 = vsel %vm3131_vm15, %v3133_v10, %v3129_v55 }
 0x47b   : > { %v3145_v53 = vmul.f32 %v4828_v43, %v3134_v16 }
 0x47d   : > { %3147 = vst [vmem:[#allocation3 + $0x8] sm:$0xff] %v3145_v53 }
 0x47e   : > { %v4543_v15 = vld [vmem:[#allocation13 + $0x38] sm:$0xff]  ;;  %v4542_v47 = vld [vmem:[#allocation13 + $0x30] sm:$0xff]  ;;  %v4541_v30 = vld [vmem:[#allocation13 + $0x28] sm:$0xff]  ;;  %v3154_v51 = vpack.c.bf16 %v3144_v18, %v3144_v18  ;;  %v3155_v33 = vpack.c.bf16 %v3145_v53, %v3145_v53 }
 0x47f   : > { %v4551_v57 = vld [vmem:[#allocation13 + $0x78] sm:$0xff]  ;;  %3288 = vmatpush.bf16.msra.mxu0 %v4543_v15  ;;  %v4550_v3 = vld [vmem:[#allocation13 + $0x70] sm:$0xff]  ;;  %v4549_v41 = vld [vmem:[#allocation13 + $0x68] sm:$0xff] }
 0x480   : > { %3301 = vmatpush.bf16.msra.mxu1 %v4551_v57  ;;  %v4540_v27 = vld [vmem:[#allocation13 + $0x20] sm:$0xff]  ;;  %v4539_v8 = vld [vmem:[#allocation13 + $0x18] sm:$0xff]  ;;  %v4538_v58 = vld [vmem:[#allocation13 + $0x10] sm:$0xff] }
 0x481   : > { %v4548_v0 = vld [vmem:[#allocation13 + $0x60] sm:$0xff]  ;;  %v4547_v48 = vld [vmem:[#allocation13 + $0x58] sm:$0xff]  ;;  %v4546_v20 = vld [vmem:[#allocation13 + $0x50] sm:$0xff] }
 0x482   : > { %v4537_v13 = vld [vmem:[#allocation13 + $0x8] sm:$0xff]  ;;  %v4536_v63 = vld [vmem:[#allocation13] sm:$0xff]  ;;  %v4829_v32 = vld [vmem:[%s7402_s13] ss:$0 sm:$0xff] }
 0x483   : > { %3289 = vmatpush.bf16.msra.mxu0 %v4542_v47  ;;  %v4545_v44 = vld [vmem:[#allocation13 + $0x48] sm:$0xff]  ;;  %v4544_v1 = vld [vmem:[#allocation13 + $0x40] sm:$0xff] }
 0x484   : > { %3302 = vmatpush.bf16.msra.mxu1 %v4550_v3 }
 0x487   : > { %3290 = vmatpush.bf16.msra.mxu0 %v4541_v30 }
 0x488   : > { %3303 = vmatpush.bf16.msra.mxu1 %v4549_v41 }
 0x48b   : > { %3291 = vmatpush.bf16.msra.mxu0 %v4540_v27 }
 0x48c   : > { %3304 = vmatpush.bf16.msra.mxu1 %v4548_v0 }
 0x48f   : > { %3292 = vmatpush.bf16.msra.mxu0 %v4539_v8 }
 0x490   : > { %3305 = vmatpush.bf16.msra.mxu1 %v4547_v48 }
 0x493   : > { %3293 = vmatpush.bf16.msra.mxu0 %v4538_v58 }
 0x494   : > { %3306 = vmatpush.bf16.msra.mxu1 %v4546_v20 }
 0x497   : > { %3294 = vmatpush.bf16.msra.mxu0 %v4537_v13 }
 0x498   : > { %3307 = vmatpush.bf16.msra.mxu1 %v4545_v44 }
 0x49b   : > { %3295 = vmatpush.bf16.msra.mxu0 %v4536_v63 }
 0x49c   : > { %3308 = vmatpush.bf16.msra.mxu1 %v4544_v1 }
 0x49e   : > { %3296 = vmatmul.bf16.vlgmr.msra.gmra.mxu0 %v3154_v51 }
 0x49f   : > { %3309 = vmatmul.bf16.vlgmr.msra.gmra.mxu1 %v3155_v33 }
 0x51b   : > { %v3297_v37 = vpop.f32.mrf.mxu0 }
 0x51c   : > { %v3310_v26 = vpop.f32.mrf.mxu1  ;;  %v3298_v28 = vadd.f32 %v4829_v32, %v3297_v37 }
 0x51e   : > { %v3311_v61 = vadd.f32 %v3310_v26, %v3298_v28 }
 0x520   : > { %3314 = vst [vmem:[%s351_s12] sm:$0xff] %v3311_v61 }
 0x523   : > { %v3299_v11 = vpop.f32.mrf.mxu0 }
 0x524   : > { %v3312_v22 = vpop.f32.mrf.mxu1 }
 0x525 PF: > { %s7403_s18 = sld [smem:[#allocation20_spill]]  ;;  %s3328_s24 = sshll.u32 %s351_s12, 4  ;;  %s3329_s24 = int_to_ptr.vmem [resolvable:$true] %s3328_s24 }
 0x526   : > { %s7405_s21 = sld [smem:[#allocation190_spill]]  ;;  %s3316_s1 = scalar_lea.sflag [#allocation7], %s349_s5 }
 0x52b   : > { %s4338_s11 = sshll.u32 %s7403_s18, 3 }
 0x52c   : > { %s7406_s14 = smov %s7405_s21  ;;  %s3326_s6 = scalar_lea.hbm %s7405_s21, %s4338_s11 }
 0x52d   : > { %s3330_s17 = sshll.u32 %s3326_s6, 4  ;;  %s5000_s27 = scalar_lea.hbm %s7406_s14, 16  ;;  %s3331_s17 = int_to_ptr.hbm [resolvable:$true] %s3330_s17 }
 0x52e   : > { %s4994_s4 = sshra.s32 %s3331_s17, 4  ;;  %s4995_s4 = int_to_ptr.hbm [resolvable:$true] %s4994_s4 }
 0x52f   : > { %s4996_s9 = scalar_lea.hbm %s4995_s4, 8  ;;  %p5001_p4 = scmp.lt.s32.totalorder %s4995_s4, %s7406_s14 }
 0x530   : > { %p4997_p11 = scmp.ne.s32.totalorder %s4995_s4, %s4996_s9  ;;  %p5002_p5 = scmp.lt.s32.totalorder %s5000_s27, %s4996_s9 }
 0x532   : > { %p4998_p0 = pnand %p4997_p11, %p5228_p7  ;;  %p5003_p6 = por %p5002_p5, %p5001_p4 }
 0x534   : > { %p4999_p2 = pneg %p4998_p0 }
 0x536   : > { %p5004_p8 = pnand %p5003_p6, %p4999_p2 }
 0x538   : > { %5007 = shalt.err (!%p5004_p8)
}
 0x539   : > { %4570 = dma.vmem_to_hbm [thread:$0]  (%p5228_p7), %s3329_s24, 128, %s3331_s17, %s3316_s1  }
 0x53a PF: > { %s7407_s5 = sld [smem:[#allocation19_spill]]  ;;  %p4602_p10 = scmp.ge.s32.totalorder %s5110_s7, 2 }
 0x53c   : > { %p4590_p12 = pnand %p4602_p10, %p5233_p9 }
 0x53e   : > { %p4591_p13 = pneg %p4590_p12 }
 0x540   : > { %s3342_s12 = sand.u32 1, %s7407_s5  }
 0x541   : > { %s3343_s18 = scalar_lea.sflag [#allocation7], %s3342_s12 }
 0x542   : > { %5065 = dma.done.wait (%p4591_p13), %s3343_s18, 128  }
 0x543   : > { %5067 = vsyncadd (%p4591_p13), %s3343_s18, 4294967168  ;;  %s24_s7 = sadd.s32 1, %s5110_s7   ;;  %s7409_s27 = sld [smem:[#allocation21_spill]] }
 0x544   : > { %p21_p3 = scmp.ge.s32.totalorder %s24_s7, 6   ;;  %s7410_s29 = sld [smem:[#allocation24_spill]] }
 0x545   : > { %s7411_s21 = smov %s5074_s22  ;;  %s7412_s22 = smov %s5078_s23 }
 0x546   : > { %s7413_s23 = smov %s5299_s20  ;;  %s7414_s24 = smov %s5086_s25 }
 0x547   : > { %s7415_s25 = smov %s5090_s26  ;;  %s7416_s26 = smov %s5302_s15 }
 0x548   : > { %s7417_s28 = smov %s5106_s30  ;;  %s7418_s30 = smov %s7424_s8 }
 0x549   :  { %23 = sbr.rel (!%p21_p3) target bundleno = 18 (0x12), region = 116 }
 0x54e   :  { %3349 = vsyncpa [#allocation6], 1 }
 0x54f   :  { %3351 = vsyncpa [#allocation6 + $0x1], 1 }
 0x550   :  { %3352 = vsyncpa [#allocation9], 1 }
 0x551   :  { %3353 = vsyncpa [#allocation12], 1 }
 0x552   :  { %3354 = vsyncpa [#allocation7], 1 }
 0x553   :  { %3356 = vsyncpa [#allocation7 + $0x1], 1 }

</bundles_post_ra>
